<compile_context>
chip_gen: v7x
topology: tpu7x:2x2x1
jax: 0.10.0
libtpu: 0.0.40
codegen_flags: <defaults>
</compile_context>

<pallas_src>
import jax
import jax.numpy as jnp
from jax import lax
from jax.experimental import pallas as pl
from jax.experimental.pallas import tpu as pltpu

DIM = 128           # module default is 200; 128 keeps lanes aligned for the test
NUM_LAYERS = 8      # module default
CROSS_LAYERS = 2    # deepctr CrossNet default layer_num
LN_EPS = 1e-5       # torch.nn.LayerNorm default
# TODO(synk): dim=200 needs padding to 256 lanes + masking of the 56 dead
# lanes in the LN reductions before productionizing.


# ----------------------------------------------------------------------------
# Kernel helpers
# ----------------------------------------------------------------------------
def _mm(x_f32, w_bf16):
    # Cast the activation to bf16 only at the MXU boundary; accumulate in f32.
    return jnp.dot(x_f32.astype(jnp.bfloat16), w_bf16,
                   preferred_element_type=jnp.float32)


def _ln_normalize(x):
    # Two-pass variance (robust to large activation magnitude); affine is
    # folded into the next Linear at prep time.  rsqrt uses the EUP slot.
    mean = jnp.mean(x, axis=-1, keepdims=True)
    xc = x - mean
    var = jnp.mean(xc * xc, axis=-1, keepdims=True)
    return xc * lax.rsqrt(var + LN_EPS)


def _ln_halves(x):
    # Per-branch LayerNorm on the two lane-aligned 128-wide halves of the
    # fused (B, 2D) activation; 128-boundary slices need no relayout.
    return jnp.concatenate([_ln_normalize(x[:, :DIM]),
                            _ln_normalize(x[:, DIM:])], axis=-1)


# ----------------------------------------------------------------------------
# Fused kernel
# ----------------------------------------------------------------------------
def _numnet_kernel(d_ref, u_ref,
                   w0d_ref, b0d_ref, w0u_ref, b0u_ref,
                   Wdu_ref, bdu_ref, cb_ref, b0j_ref, bj_ref,
                   ck_hbm, w0j_hbm, Wj_hbm,
                   dout_ref, uout_ref, jout_ref,
                   ck_v, w0j_v, Wj_v, dma_sem):
    # d/u: (B,1) f32   w0*: (1,D) f32   Wdu: (9,2D,2D) bf16   bdu: (9,1,2D) f32
    # cb: (2,1,2D) f32  b0j: (1,D) f32  bj: (9,1,D) f32
    # ck_hbm: (2,2D,2D) bf16  w0j_hbm: (2D,D) bf16  Wj_hbm: (9,D,D) bf16  (HBM)

    # Kick off the joint-path weight DMAs now; they complete behind the
    # branch-stack compute (manual overlap, no grid needed).
    joint_copies = (
        pltpu.make_async_copy(ck_hbm, ck_v, dma_sem.at[0]),
        pltpu.make_async_copy(w0j_hbm, w0j_v, dma_sem.at[1]),
        pltpu.make_async_copy(Wj_hbm, Wj_v, dma_sem.at[2]),
    )
    for cp in joint_copies:
        cp.start()

    # ---- digit & unit branches fused into one (B, 2D) chain -------------
    hd = d_ref[...] * w0d_ref[...] + b0d_ref[...]          # Linear(1 -> D), f32 VPU
    hu = u_ref[...] * w0u_ref[...] + b0u_ref[...]
    h = jnp.concatenate([hd, hu], axis=-1)                  # (B, 2D)

    def branch_pair(p, h):
        # layer 2p (-> LayerNorm), then layer 2p+1 (LN affine pre-folded in)
        h = _mm(h, Wdu_ref[2 * p]) + bdu_ref[2 * p]
        h = _ln_halves(h)
        h = _mm(h, Wdu_ref[2 * p + 1]) + bdu_ref[2 * p + 1]
        return h

    h = lax.fori_loop(0, NUM_LAYERS // 2, branch_pair, h, unroll=True)
    h = _mm(h, Wdu_ref[NUM_LAYERS]) + bdu_ref[NUM_LAYERS]   # final Linear(D, D)

    dout_ref[...] = h[:, :DIM]
    uout_ref[...] = h[:, DIM:]

    # ---- joint path: CrossNet ('matrix') + MLP stack (weights prefetched) --
    for cp in joint_copies:
        cp.wait()

    x0 = h                                                   # == [digit | unit]
    xl = x0
    for i in range(CROSS_LAYERS):
        xl = x0 * (_mm(xl, ck_v[i]) + cb_ref[i]) + xl        # x0 * (W xl + b) + xl

    hj = _mm(xl, w0j_v[...]) + b0j_ref[...]                  # Linear(2D -> D)

    def joint_pair(p, hj):
        hj = _mm(hj, Wj_v[2 * p]) + bj_ref[2 * p]
        hj = _ln_normalize(hj)
        hj = _mm(hj, Wj_v[2 * p + 1]) + bj_ref[2 * p + 1]
        return hj

    hj = lax.fori_loop(0, NUM_LAYERS // 2, joint_pair, hj, unroll=True)
    hj = _mm(hj, Wj_v[NUM_LAYERS]) + bj_ref[NUM_LAYERS]
    jout_ref[...] = hj


# ----------------------------------------------------------------------------
# Parameter prep: fold LayerNorm affine into the following Linear, build the
# block-diagonal fused branch weights, cast MXU weights to bf16.
#   (norm * g + beta) @ W + b == norm @ (diag(g) @ W) + (beta @ W + b)
# ----------------------------------------------------------------------------
def _fold_ln_affine(W, b, g, beta):
    ln = 0
    for i in range(NUM_LAYERS):
        if i % 2 == 0:
            Wi = W[i + 1]
            b = b.at[i + 1].set(b[i + 1] + beta[ln] @ Wi)
            W = W.at[i + 1].set(g[ln].reshape(-1, 1) * Wi)
            ln += 1
    return W, b


def prepare_params(digit_p, unit_p, joint_p):
    Wd, bd = _fold_ln_affine(digit_p["W"], digit_p["b"], digit_p["g"], digit_p["beta"])
    Wu, bu = _fold_ln_affine(unit_p["W"], unit_p["b"], unit_p["g"], unit_p["beta"])
    Wj, bj = _fold_ln_affine(joint_p["W"], joint_p["b"], joint_p["g"], joint_p["beta"])
    n = NUM_LAYERS + 1
    # Block-diagonal fusion of the digit/unit stacks (v6e/v7x MXU is 256-wide).
    Z = jnp.zeros((n, DIM, DIM), jnp.float32)
    Wdu = jnp.concatenate([jnp.concatenate([Wd, Z], axis=2),
                           jnp.concatenate([Z, Wu], axis=2)], axis=1)   # (n, 2D, 2D)
    bdu = jnp.concatenate([bd, bu], axis=2)                             # (n, 1, 2D)
    bf16 = jnp.bfloat16
    return dict(
        # Linear(1->D) is a VPU broadcast-mul: keep f32 (v5e has no bf16 VPU).
        w0d=digit_p["w0"], b0d=digit_p["b0"], w0u=unit_p["w0"], b0u=unit_p["b0"],
        # MXU weights in bf16 (native MXU dtype, halves weight DMA); biases f32.
        Wdu=Wdu.astype(bf16), bdu=bdu,
        ck=joint_p["ck"].astype(bf16), cb=joint_p["cb"],
        w0j=joint_p["w0"].astype(bf16), b0j=joint_p["b0"],
        Wj=Wj.astype(bf16), bj=bj,
    )


# ----------------------------------------------------------------------------
# Wrapper: single pallas_call; branch weights auto-DMA'd (VMEM specs), joint
# weights left in HBM (pl.ANY) and prefetched manually inside the kernel.
# ----------------------------------------------------------------------------
@jax.jit
def numerical_net_forward(digit, unit, pp):
    B = digit.shape[0]
    vmem_args = (digit, unit, pp["w0d"], pp["b0d"], pp["w0u"], pp["b0u"],
                 pp["Wdu"], pp["bdu"], pp["cb"], pp["b0j"], pp["bj"])
    hbm_args = (pp["ck"], pp["w0j"], pp["Wj"])
    args = vmem_args + hbm_args

    vmem = pl.BlockSpec(memory_space=pltpu.MemorySpace.VMEM)
    hbm = pl.BlockSpec(memory_space=pl.ANY)

    flops = 2 * B * ((NUM_LAYERS + 1 + CROSS_LAYERS) * (2 * DIM) * (2 * DIM)
                     + (2 * DIM) * DIM + (NUM_LAYERS + 1) * DIM * DIM)
    bytes_accessed = int(sum(a.size * a.dtype.itemsize for a in args)
                         + 3 * B * DIM * 4)

    out_shape = tuple(jax.ShapeDtypeStruct((B, DIM), jnp.float32) for _ in range(3))
    d_emb, u_emb, j_emb = pl.pallas_call(
        _numnet_kernel,
        out_shape=out_shape,
        in_specs=[vmem] * len(vmem_args) + [hbm] * len(hbm_args),
        out_specs=tuple(pl.BlockSpec(memory_space=pltpu.MemorySpace.VMEM)
                        for _ in range(3)),
        scratch_shapes=[
            pltpu.VMEM((CROSS_LAYERS, 2 * DIM, 2 * DIM), jnp.bfloat16),  # ck
            pltpu.VMEM((2 * DIM, DIM), jnp.bfloat16),                    # w0j
            pltpu.VMEM((NUM_LAYERS + 1, DIM, DIM), jnp.bfloat16),        # Wj
            pltpu.SemaphoreType.DMA((3,)),
        ],
        cost_estimate=pl.CostEstimate(flops=flops, transcendentals=12 * B,
                                      bytes_accessed=bytes_accessed),
    )(*args)
    return d_emb, u_emb, j_emb
# TODO(synk): for large batch, add a batch grid (BlockSpec((TILE_B, DIM), lambda i:(i,0)),
# constant-index weight specs, dimension_semantics=("parallel",)) to pipeline DMA and use
# both v7x TensorCores (size TILE_B against v7x's 64 MiB VMEM); unnecessary at B=8.


# ----------------------------------------------------------------------------
# Deterministic parameter initialization (shapes from the module __init__).
# gamma/beta are random (not 1/0) so the LN-affine fold path is exercised.
# ----------------------------------------------------------------------------
def _xavier_uniform(key, fan_in, fan_out):
    limit = (6.0 / (fan_in + fan_out)) ** 0.5
    return jax.random.uniform(key, (fan_in, fan_out), jnp.float32, -limit, limit)


def _linear_bias(key, fan_in, fan_out):
    bound = 1.0 / (fan_in ** 0.5)
    return jax.random.uniform(key, (1, fan_out), jnp.float32, -bound, bound)


def init_branch_params(key):
    n_lin = NUM_LAYERS + 1
    n_ln = NUM_LAYERS // 2
    keys = jax.random.split(key, 4 + 2 * n_lin)
    w0 = _xavier_uniform(keys[0], 1, DIM)
    b0 = _linear_bias(keys[1], 1, DIM)
    W = jnp.stack([_xavier_uniform(keys[2 + i], DIM, DIM) for i in range(n_lin)])
    b = jnp.stack([_linear_bias(keys[2 + n_lin + i], DIM, DIM) for i in range(n_lin)])
    g = 1.0 + 0.2 * jax.random.normal(keys[2 + 2 * n_lin], (n_ln, 1, DIM), jnp.float32)
    beta = 0.2 * jax.random.normal(keys[3 + 2 * n_lin], (n_ln, 1, DIM), jnp.float32)
    return dict(w0=w0, b0=b0, W=W, b=b, g=g, beta=beta)


def init_joint_params(key):
    n_lin = NUM_LAYERS + 1
    n_ln = NUM_LAYERS // 2
    keys = jax.random.split(key, 4 + CROSS_LAYERS + 2 * n_lin)
    F = 2 * DIM
    # CrossNet 'matrix' parameterization: kernels (layer, F, F) xavier_normal, bias zeros.
    ck = jnp.stack([
        jax.random.normal(keys[i], (F, F), jnp.float32) * (2.0 / (F + F)) ** 0.5
        for i in range(CROSS_LAYERS)])
    cb = jnp.zeros((CROSS_LAYERS, 1, F), jnp.float32)
    w0 = _xavier_uniform(keys[CROSS_LAYERS], F, DIM)
    b0 = _linear_bias(keys[CROSS_LAYERS + 1], F, DIM)
    base = CROSS_LAYERS + 2
    W = jnp.stack([_xavier_uniform(keys[base + i], DIM, DIM) for i in range(n_lin)])
    b = jnp.stack([_linear_bias(keys[base + n_lin + i], DIM, DIM) for i in range(n_lin)])
    g = 1.0 + 0.2 * jax.random.normal(keys[base + 2 * n_lin], (n_ln, 1, DIM), jnp.float32)
    beta = 0.2 * jax.random.normal(keys[base + 2 * n_lin + 1], (n_ln, 1, DIM), jnp.float32)
    return dict(ck=ck, cb=cb, w0=w0, b0=b0, W=W, b=b, g=g, beta=beta)


# ----------------------------------------------------------------------------
# Pure-JAX reference: original un-folded, un-fused formulation (explicit LN
# affine), with the same bf16 weight quantization at the matmuls so the check
# isolates kernel/fold/fusion correctness from the intentional bf16 choice.
# ----------------------------------------------------------------------------
def _ref_mm(x, w):
    return jnp.dot(x.astype(jnp.bfloat16), w.astype(jnp.bfloat16),
                   preferred_element_type=jnp.float32)


def _ref_ln(h, g, beta):
    mean = jnp.mean(h, axis=-1, keepdims=True)
    var = jnp.mean((h - mean) ** 2, axis=-1, keepdims=True)
    return (h - mean) * lax.rsqrt(var + LN_EPS) * g + beta


def _branch_ref(x, p):
    h = x * p["w0"] + p["b0"]
    ln = 0
    for i in range(NUM_LAYERS + 1):
        h = _ref_mm(h, p["W"][i]) + p["b"][i]
        if i < NUM_LAYERS and i % 2 == 0:
            h = _ref_ln(h, p["g"][ln], p["beta"][ln])
            ln += 1
    return h


def _joint_ref(d_emb, u_emb, p):
    x0 = jnp.concatenate([d_emb, u_emb], axis=-1)
    xl = x0
    for i in range(CROSS_LAYERS):
        xl = x0 * (_ref_mm(xl, p["ck"][i]) + p["cb"][i]) + xl
    h = _ref_mm(xl, p["w0"]) + p["b0"]
    ln = 0
    for i in range(NUM_LAYERS + 1):
        h = _ref_mm(h, p["W"][i]) + p["b"][i]
        if i < NUM_LAYERS and i % 2 == 0:
            h = _ref_ln(h, p["g"][ln], p["beta"][ln])
            ln += 1
    return h


# ----------------------------------------------------------------------------
if __name__ == "__main__":
    key = jax.random.PRNGKey(0)
    k_d, k_u, k_j, k_x = jax.random.split(key, 4)

    digit_params = init_branch_params(k_d)
    unit_params = init_branch_params(k_u)
    joint_params = init_joint_params(k_j)
    prepped = prepare_params(digit_params, unit_params, joint_params)

    B = 8
    digit = jax.random.normal(k_x, (B, 1), jnp.float32)
    # unit scalar values, as produced from unit_value_dict ('kg'->1000, 'g'->1, ...)
    unit = jnp.array([1000.0, 1.0, 0.001, 1.0, 0.001, 1.0, 0.01, 0.001],
                     jnp.float32).reshape(B, 1)

    d_emb, u_emb, j_emb = numerical_net_forward(digit, unit, prepped)
    jax.block_until_ready((d_emb, u_emb, j_emb))

    # Correctness check vs pure-JAX reference (un-folded, un-fused math, same
    # bf16 matmul quantization).  Tolerance covers fold/fusion rounding only.
    d_ref = _branch_ref(digit, digit_params)
    u_ref = _branch_ref(unit, unit_params)
    j_ref = _joint_ref(d_ref, u_ref, joint_params)
    assert jnp.allclose(d_emb, d_ref, atol=5e-2, rtol=5e-2), "digit embedding mismatch"
    assert jnp.allclose(u_emb, u_ref, atol=5e-2, rtol=5e-2), "unit embedding mismatch"
    assert jnp.allclose(j_emb, j_ref, atol=5e-2, rtol=5e-2), "joint embedding mismatch"

    print("KERNEL_OK")
</pallas_src>

<mosaic_0001>
module attributes {stable_mosaic.version = 11 : i64} {
  func.func @_numnet_kernel(%arg0: memref<8x1xf32, #tpu.memory_space<vmem>>, %arg1: memref<8x1xf32, #tpu.memory_space<vmem>>, %arg2: memref<1x128xf32, #tpu.memory_space<vmem>>, %arg3: memref<1x128xf32, #tpu.memory_space<vmem>>, %arg4: memref<1x128xf32, #tpu.memory_space<vmem>>, %arg5: memref<1x128xf32, #tpu.memory_space<vmem>>, %arg6: memref<9x256x256xbf16, #tpu.memory_space<vmem>>, %arg7: memref<9x1x256xf32, #tpu.memory_space<vmem>>, %arg8: memref<2x1x256xf32, #tpu.memory_space<vmem>>, %arg9: memref<1x128xf32, #tpu.memory_space<vmem>>, %arg10: memref<9x1x128xf32, #tpu.memory_space<vmem>>, %arg11: memref<2x256x256xbf16, #tpu.memory_space<any>>, %arg12: memref<256x128xbf16, #tpu.memory_space<any>>, %arg13: memref<9x128x128xbf16, #tpu.memory_space<any>>, %arg14: memref<8x128xf32, #tpu.memory_space<vmem>>, %arg15: memref<8x128xf32, #tpu.memory_space<vmem>>, %arg16: memref<8x128xf32, #tpu.memory_space<vmem>>, %arg17: memref<2x256x256xbf16, #tpu.memory_space<vmem>>, %arg18: memref<256x128xbf16, #tpu.memory_space<vmem>>, %arg19: memref<9x128x128xbf16, #tpu.memory_space<vmem>>, %arg20: memref<3x!tpu.dma_semaphore, #tpu.memory_space<semaphore_mem>>) attributes {dimension_semantics = [], scalar_prefetch = 0 : i64, scratch_operands = 4 : i64, tpu.core_type = #tpu.core_type<tc>} {
    %c0_i32 = arith.constant 0 : i32
    %0 = tpu.memref_slice %arg20[%c0_i32] : memref<3x!tpu.dma_semaphore, #tpu.memory_space<semaphore_mem>> -> memref<1x!tpu.dma_semaphore, #tpu.memory_space<semaphore_mem>>
    %1 = tpu.memref_squeeze %0 : memref<1x!tpu.dma_semaphore, #tpu.memory_space<semaphore_mem>> -> memref<!tpu.dma_semaphore, #tpu.memory_space<semaphore_mem>>
    tpu.enqueue_dma source(%arg11 : memref<2x256x256xbf16, #tpu.memory_space<any>>) target(%arg17 : memref<2x256x256xbf16, #tpu.memory_space<vmem>>) target_semaphore(%1 : memref<!tpu.dma_semaphore, #tpu.memory_space<semaphore_mem>>)
    %c1_i32 = arith.constant 1 : i32
    %2 = tpu.memref_slice %arg20[%c1_i32] : memref<3x!tpu.dma_semaphore, #tpu.memory_space<semaphore_mem>> -> memref<1x!tpu.dma_semaphore, #tpu.memory_space<semaphore_mem>>
    %3 = tpu.memref_squeeze %2 : memref<1x!tpu.dma_semaphore, #tpu.memory_space<semaphore_mem>> -> memref<!tpu.dma_semaphore, #tpu.memory_space<semaphore_mem>>
    tpu.enqueue_dma source(%arg12 : memref<256x128xbf16, #tpu.memory_space<any>>) target(%arg18 : memref<256x128xbf16, #tpu.memory_space<vmem>>) target_semaphore(%3 : memref<!tpu.dma_semaphore, #tpu.memory_space<semaphore_mem>>)
    %c2_i32 = arith.constant 2 : i32
    %4 = tpu.memref_slice %arg20[%c2_i32] : memref<3x!tpu.dma_semaphore, #tpu.memory_space<semaphore_mem>> -> memref<1x!tpu.dma_semaphore, #tpu.memory_space<semaphore_mem>>
    %5 = tpu.memref_squeeze %4 : memref<1x!tpu.dma_semaphore, #tpu.memory_space<semaphore_mem>> -> memref<!tpu.dma_semaphore, #tpu.memory_space<semaphore_mem>>
    tpu.enqueue_dma source(%arg13 : memref<9x128x128xbf16, #tpu.memory_space<any>>) target(%arg19 : memref<9x128x128xbf16, #tpu.memory_space<vmem>>) target_semaphore(%5 : memref<!tpu.dma_semaphore, #tpu.memory_space<semaphore_mem>>)
    %c0 = arith.constant 0 : index
    %c0_0 = arith.constant 0 : index
    %6 = vector.load %arg0[%c0, %c0_0] : memref<8x1xf32, #tpu.memory_space<vmem>>, vector<8x1xf32>
    %c0_1 = arith.constant 0 : index
    %c0_2 = arith.constant 0 : index
    %7 = vector.load %arg2[%c0_1, %c0_2] : memref<1x128xf32, #tpu.memory_space<vmem>>, vector<1x128xf32>
    %8 = vector.broadcast %6 : vector<8x1xf32> to vector<8x128xf32>
    %9 = vector.broadcast %7 : vector<1x128xf32> to vector<8x128xf32>
    %10 = arith.mulf %8, %9 : vector<8x128xf32>
    %c0_3 = arith.constant 0 : index
    %c0_4 = arith.constant 0 : index
    %11 = vector.load %arg3[%c0_3, %c0_4] : memref<1x128xf32, #tpu.memory_space<vmem>>, vector<1x128xf32>
    %12 = vector.broadcast %11 : vector<1x128xf32> to vector<8x128xf32>
    %13 = arith.addf %10, %12 : vector<8x128xf32>
    %c0_5 = arith.constant 0 : index
    %c0_6 = arith.constant 0 : index
    %14 = vector.load %arg1[%c0_5, %c0_6] : memref<8x1xf32, #tpu.memory_space<vmem>>, vector<8x1xf32>
    %c0_7 = arith.constant 0 : index
    %c0_8 = arith.constant 0 : index
    %15 = vector.load %arg4[%c0_7, %c0_8] : memref<1x128xf32, #tpu.memory_space<vmem>>, vector<1x128xf32>
    %16 = vector.broadcast %14 : vector<8x1xf32> to vector<8x128xf32>
    %17 = vector.broadcast %15 : vector<1x128xf32> to vector<8x128xf32>
    %18 = arith.mulf %16, %17 : vector<8x128xf32>
    %c0_9 = arith.constant 0 : index
    %c0_10 = arith.constant 0 : index
    %19 = vector.load %arg5[%c0_9, %c0_10] : memref<1x128xf32, #tpu.memory_space<vmem>>, vector<1x128xf32>
    %20 = vector.broadcast %19 : vector<1x128xf32> to vector<8x128xf32>
    %21 = arith.addf %18, %20 : vector<8x128xf32>
    %22 = tpu.concatenate %13, %21 in 1 : vector<8x128xf32>, vector<8x128xf32> -> vector<8x256xf32>
    %c0_i32_11 = arith.constant 0 : i32
    %c2_i32_12 = arith.constant 2 : i32
    %23 = arith.muli %c2_i32_12, %c0_i32_11 : i32
    %24 = arith.index_cast %23 : i32 to index
    %c0_13 = arith.constant 0 : index
    %c0_14 = arith.constant 0 : index
    %25 = vector.load %arg6[%24, %c0_13, %c0_14] : memref<9x256x256xbf16, #tpu.memory_space<vmem>>, vector<1x256x256xbf16>
    %26 = vector.shape_cast %25 : vector<1x256x256xbf16> to vector<256x256xbf16>
    %27 = arith.truncf %22 : vector<8x256xf32> to vector<8x256xbf16>
    %cst = arith.constant dense<0.000000e+00> : vector<8x256xf32>
    %28 = tpu.matmul %27, %26, %cst {dimension_numbers = #tpu.dot_dimension_numbers<[1], [0], [0], [1], [0, 0, 1, 1], [], []>} : vector<8x256xbf16>, vector<256x256xbf16>, vector<8x256xf32> -> vector<8x256xf32>
    %c2_i32_15 = arith.constant 2 : i32
    %29 = arith.muli %c2_i32_15, %c0_i32_11 : i32
    %30 = arith.index_cast %29 : i32 to index
    %c0_16 = arith.constant 0 : index
    %c0_17 = arith.constant 0 : index
    %31 = vector.load %arg7[%30, %c0_16, %c0_17] : memref<9x1x256xf32, #tpu.memory_space<vmem>>, vector<1x1x256xf32>
    %32 = vector.shape_cast %31 : vector<1x1x256xf32> to vector<1x256xf32>
    %33 = vector.broadcast %32 : vector<1x256xf32> to vector<8x256xf32>
    %34 = arith.addf %28, %33 : vector<8x256xf32>
    %35 = vector.extract_strided_slice %34 {offsets = [0, 0], sizes = [8, 128], strides = [1, 1]} : vector<8x256xf32> to vector<8x128xf32>
    %cst_18 = arith.constant dense<0.000000e+00> : vector<8xf32>
    %36 = vector.multi_reduction <add>, %35, %cst_18 [1] : vector<8x128xf32> to vector<8xf32>
    %37 = vector.shape_cast %36 : vector<8xf32> to vector<8x1xf32>
    %cst_19 = arith.constant 1.280000e+02 : f32
    %38 = vector.broadcast %cst_19 : f32 to vector<8x1xf32>
    %39 = arith.divf %37, %38 : vector<8x1xf32>
    %40 = vector.broadcast %39 : vector<8x1xf32> to vector<8x128xf32>
    %41 = arith.subf %35, %40 : vector<8x128xf32>
    %42 = arith.mulf %41, %41 : vector<8x128xf32>
    %cst_20 = arith.constant dense<0.000000e+00> : vector<8xf32>
    %43 = vector.multi_reduction <add>, %42, %cst_20 [1] : vector<8x128xf32> to vector<8xf32>
    %44 = vector.shape_cast %43 : vector<8xf32> to vector<8x1xf32>
    %cst_21 = arith.constant 1.280000e+02 : f32
    %45 = vector.broadcast %cst_21 : f32 to vector<8x1xf32>
    %46 = arith.divf %44, %45 : vector<8x1xf32>
    %cst_22 = arith.constant 9.99999974E-6 : f32
    %47 = vector.broadcast %cst_22 : f32 to vector<8x1xf32>
    %48 = arith.addf %46, %47 : vector<8x1xf32>
    %49 = math.rsqrt %48 : vector<8x1xf32>
    %50 = vector.broadcast %49 : vector<8x1xf32> to vector<8x128xf32>
    %51 = arith.mulf %41, %50 : vector<8x128xf32>
    %52 = vector.extract_strided_slice %34 {offsets = [0, 128], sizes = [8, 128], strides = [1, 1]} : vector<8x256xf32> to vector<8x128xf32>
    %cst_23 = arith.constant dense<0.000000e+00> : vector<8xf32>
    %53 = vector.multi_reduction <add>, %52, %cst_23 [1] : vector<8x128xf32> to vector<8xf32>
    %54 = vector.shape_cast %53 : vector<8xf32> to vector<8x1xf32>
    %cst_24 = arith.constant 1.280000e+02 : f32
    %55 = vector.broadcast %cst_24 : f32 to vector<8x1xf32>
    %56 = arith.divf %54, %55 : vector<8x1xf32>
    %57 = vector.broadcast %56 : vector<8x1xf32> to vector<8x128xf32>
    %58 = arith.subf %52, %57 : vector<8x128xf32>
    %59 = arith.mulf %58, %58 : vector<8x128xf32>
    %cst_25 = arith.constant dense<0.000000e+00> : vector<8xf32>
    %60 = vector.multi_reduction <add>, %59, %cst_25 [1] : vector<8x128xf32> to vector<8xf32>
    %61 = vector.shape_cast %60 : vector<8xf32> to vector<8x1xf32>
    %cst_26 = arith.constant 1.280000e+02 : f32
    %62 = vector.broadcast %cst_26 : f32 to vector<8x1xf32>
    %63 = arith.divf %61, %62 : vector<8x1xf32>
    %cst_27 = arith.constant 9.99999974E-6 : f32
    %64 = vector.broadcast %cst_27 : f32 to vector<8x1xf32>
    %65 = arith.addf %63, %64 : vector<8x1xf32>
    %66 = math.rsqrt %65 : vector<8x1xf32>
    %67 = vector.broadcast %66 : vector<8x1xf32> to vector<8x128xf32>
    %68 = arith.mulf %58, %67 : vector<8x128xf32>
    %69 = tpu.concatenate %51, %68 in 1 : vector<8x128xf32>, vector<8x128xf32> -> vector<8x256xf32>
    %c2_i32_28 = arith.constant 2 : i32
    %70 = arith.muli %c2_i32_28, %c0_i32_11 : i32
    %c1_i32_29 = arith.constant 1 : i32
    %71 = arith.addi %70, %c1_i32_29 : i32
    %72 = arith.index_cast %71 : i32 to index
    %c0_30 = arith.constant 0 : index
    %c0_31 = arith.constant 0 : index
    %73 = vector.load %arg6[%72, %c0_30, %c0_31] : memref<9x256x256xbf16, #tpu.memory_space<vmem>>, vector<1x256x256xbf16>
    %74 = vector.shape_cast %73 : vector<1x256x256xbf16> to vector<256x256xbf16>
    %75 = arith.truncf %69 : vector<8x256xf32> to vector<8x256xbf16>
    %cst_32 = arith.constant dense<0.000000e+00> : vector<8x256xf32>
    %76 = tpu.matmul %75, %74, %cst_32 {dimension_numbers = #tpu.dot_dimension_numbers<[1], [0], [0], [1], [0, 0, 1, 1], [], []>} : vector<8x256xbf16>, vector<256x256xbf16>, vector<8x256xf32> -> vector<8x256xf32>
    %c2_i32_33 = arith.constant 2 : i32
    %77 = arith.muli %c2_i32_33, %c0_i32_11 : i32
    %c1_i32_34 = arith.constant 1 : i32
    %78 = arith.addi %77, %c1_i32_34 : i32
    %79 = arith.index_cast %78 : i32 to index
    %c0_35 = arith.constant 0 : index
    %c0_36 = arith.constant 0 : index
    %80 = vector.load %arg7[%79, %c0_35, %c0_36] : memref<9x1x256xf32, #tpu.memory_space<vmem>>, vector<1x1x256xf32>
    %81 = vector.shape_cast %80 : vector<1x1x256xf32> to vector<1x256xf32>
    %82 = vector.broadcast %81 : vector<1x256xf32> to vector<8x256xf32>
    %83 = arith.addf %76, %82 : vector<8x256xf32>
    %c1_i32_37 = arith.constant 1 : i32
    %c2_i32_38 = arith.constant 2 : i32
    %84 = arith.muli %c2_i32_38, %c1_i32_37 : i32
    %85 = arith.index_cast %84 : i32 to index
    %c0_39 = arith.constant 0 : index
    %c0_40 = arith.constant 0 : index
    %86 = vector.load %arg6[%85, %c0_39, %c0_40] : memref<9x256x256xbf16, #tpu.memory_space<vmem>>, vector<1x256x256xbf16>
    %87 = vector.shape_cast %86 : vector<1x256x256xbf16> to vector<256x256xbf16>
    %88 = arith.truncf %83 : vector<8x256xf32> to vector<8x256xbf16>
    %cst_41 = arith.constant dense<0.000000e+00> : vector<8x256xf32>
    %89 = tpu.matmul %88, %87, %cst_41 {dimension_numbers = #tpu.dot_dimension_numbers<[1], [0], [0], [1], [0, 0, 1, 1], [], []>} : vector<8x256xbf16>, vector<256x256xbf16>, vector<8x256xf32> -> vector<8x256xf32>
    %c2_i32_42 = arith.constant 2 : i32
    %90 = arith.muli %c2_i32_42, %c1_i32_37 : i32
    %91 = arith.index_cast %90 : i32 to index
    %c0_43 = arith.constant 0 : index
    %c0_44 = arith.constant 0 : index
    %92 = vector.load %arg7[%91, %c0_43, %c0_44] : memref<9x1x256xf32, #tpu.memory_space<vmem>>, vector<1x1x256xf32>
    %93 = vector.shape_cast %92 : vector<1x1x256xf32> to vector<1x256xf32>
    %94 = vector.broadcast %93 : vector<1x256xf32> to vector<8x256xf32>
    %95 = arith.addf %89, %94 : vector<8x256xf32>
    %96 = vector.extract_strided_slice %95 {offsets = [0, 0], sizes = [8, 128], strides = [1, 1]} : vector<8x256xf32> to vector<8x128xf32>
    %cst_45 = arith.constant dense<0.000000e+00> : vector<8xf32>
    %97 = vector.multi_reduction <add>, %96, %cst_45 [1] : vector<8x128xf32> to vector<8xf32>
    %98 = vector.shape_cast %97 : vector<8xf32> to vector<8x1xf32>
    %cst_46 = arith.constant 1.280000e+02 : f32
    %99 = vector.broadcast %cst_46 : f32 to vector<8x1xf32>
    %100 = arith.divf %98, %99 : vector<8x1xf32>
    %101 = vector.broadcast %100 : vector<8x1xf32> to vector<8x128xf32>
    %102 = arith.subf %96, %101 : vector<8x128xf32>
    %103 = arith.mulf %102, %102 : vector<8x128xf32>
    %cst_47 = arith.constant dense<0.000000e+00> : vector<8xf32>
    %104 = vector.multi_reduction <add>, %103, %cst_47 [1] : vector<8x128xf32> to vector<8xf32>
    %105 = vector.shape_cast %104 : vector<8xf32> to vector<8x1xf32>
    %cst_48 = arith.constant 1.280000e+02 : f32
    %106 = vector.broadcast %cst_48 : f32 to vector<8x1xf32>
    %107 = arith.divf %105, %106 : vector<8x1xf32>
    %cst_49 = arith.constant 9.99999974E-6 : f32
    %108 = vector.broadcast %cst_49 : f32 to vector<8x1xf32>
    %109 = arith.addf %107, %108 : vector<8x1xf32>
    %110 = math.rsqrt %109 : vector<8x1xf32>
    %111 = vector.broadcast %110 : vector<8x1xf32> to vector<8x128xf32>
    %112 = arith.mulf %102, %111 : vector<8x128xf32>
    %113 = vector.extract_strided_slice %95 {offsets = [0, 128], sizes = [8, 128], strides = [1, 1]} : vector<8x256xf32> to vector<8x128xf32>
    %cst_50 = arith.constant dense<0.000000e+00> : vector<8xf32>
    %114 = vector.multi_reduction <add>, %113, %cst_50 [1] : vector<8x128xf32> to vector<8xf32>
    %115 = vector.shape_cast %114 : vector<8xf32> to vector<8x1xf32>
    %cst_51 = arith.constant 1.280000e+02 : f32
    %116 = vector.broadcast %cst_51 : f32 to vector<8x1xf32>
    %117 = arith.divf %115, %116 : vector<8x1xf32>
    %118 = vector.broadcast %117 : vector<8x1xf32> to vector<8x128xf32>
    %119 = arith.subf %113, %118 : vector<8x128xf32>
    %120 = arith.mulf %119, %119 : vector<8x128xf32>
    %cst_52 = arith.constant dense<0.000000e+00> : vector<8xf32>
    %121 = vector.multi_reduction <add>, %120, %cst_52 [1] : vector<8x128xf32> to vector<8xf32>
    %122 = vector.shape_cast %121 : vector<8xf32> to vector<8x1xf32>
    %cst_53 = arith.constant 1.280000e+02 : f32
    %123 = vector.broadcast %cst_53 : f32 to vector<8x1xf32>
    %124 = arith.divf %122, %123 : vector<8x1xf32>
    %cst_54 = arith.constant 9.99999974E-6 : f32
    %125 = vector.broadcast %cst_54 : f32 to vector<8x1xf32>
    %126 = arith.addf %124, %125 : vector<8x1xf32>
    %127 = math.rsqrt %126 : vector<8x1xf32>
    %128 = vector.broadcast %127 : vector<8x1xf32> to vector<8x128xf32>
    %129 = arith.mulf %119, %128 : vector<8x128xf32>
    %130 = tpu.concatenate %112, %129 in 1 : vector<8x128xf32>, vector<8x128xf32> -> vector<8x256xf32>
    %c2_i32_55 = arith.constant 2 : i32
    %131 = arith.muli %c2_i32_55, %c1_i32_37 : i32
    %c1_i32_56 = arith.constant 1 : i32
    %132 = arith.addi %131, %c1_i32_56 : i32
    %133 = arith.index_cast %132 : i32 to index
    %c0_57 = arith.constant 0 : index
    %c0_58 = arith.constant 0 : index
    %134 = vector.load %arg6[%133, %c0_57, %c0_58] : memref<9x256x256xbf16, #tpu.memory_space<vmem>>, vector<1x256x256xbf16>
    %135 = vector.shape_cast %134 : vector<1x256x256xbf16> to vector<256x256xbf16>
    %136 = arith.truncf %130 : vector<8x256xf32> to vector<8x256xbf16>
    %cst_59 = arith.constant dense<0.000000e+00> : vector<8x256xf32>
    %137 = tpu.matmul %136, %135, %cst_59 {dimension_numbers = #tpu.dot_dimension_numbers<[1], [0], [0], [1], [0, 0, 1, 1], [], []>} : vector<8x256xbf16>, vector<256x256xbf16>, vector<8x256xf32> -> vector<8x256xf32>
    %c2_i32_60 = arith.constant 2 : i32
    %138 = arith.muli %c2_i32_60, %c1_i32_37 : i32
    %c1_i32_61 = arith.constant 1 : i32
    %139 = arith.addi %138, %c1_i32_61 : i32
    %140 = arith.index_cast %139 : i32 to index
    %c0_62 = arith.constant 0 : index
    %c0_63 = arith.constant 0 : index
    %141 = vector.load %arg7[%140, %c0_62, %c0_63] : memref<9x1x256xf32, #tpu.memory_space<vmem>>, vector<1x1x256xf32>
    %142 = vector.shape_cast %141 : vector<1x1x256xf32> to vector<1x256xf32>
    %143 = vector.broadcast %142 : vector<1x256xf32> to vector<8x256xf32>
    %144 = arith.addf %137, %143 : vector<8x256xf32>
    %c2_i32_64 = arith.constant 2 : i32
    %c2_i32_65 = arith.constant 2 : i32
    %145 = arith.muli %c2_i32_65, %c2_i32_64 : i32
    %146 = arith.index_cast %145 : i32 to index
    %c0_66 = arith.constant 0 : index
    %c0_67 = arith.constant 0 : index
    %147 = vector.load %arg6[%146, %c0_66, %c0_67] : memref<9x256x256xbf16, #tpu.memory_space<vmem>>, vector<1x256x256xbf16>
    %148 = vector.shape_cast %147 : vector<1x256x256xbf16> to vector<256x256xbf16>
    %149 = arith.truncf %144 : vector<8x256xf32> to vector<8x256xbf16>
    %cst_68 = arith.constant dense<0.000000e+00> : vector<8x256xf32>
    %150 = tpu.matmul %149, %148, %cst_68 {dimension_numbers = #tpu.dot_dimension_numbers<[1], [0], [0], [1], [0, 0, 1, 1], [], []>} : vector<8x256xbf16>, vector<256x256xbf16>, vector<8x256xf32> -> vector<8x256xf32>
    %c2_i32_69 = arith.constant 2 : i32
    %151 = arith.muli %c2_i32_69, %c2_i32_64 : i32
    %152 = arith.index_cast %151 : i32 to index
    %c0_70 = arith.constant 0 : index
    %c0_71 = arith.constant 0 : index
    %153 = vector.load %arg7[%152, %c0_70, %c0_71] : memref<9x1x256xf32, #tpu.memory_space<vmem>>, vector<1x1x256xf32>
    %154 = vector.shape_cast %153 : vector<1x1x256xf32> to vector<1x256xf32>
    %155 = vector.broadcast %154 : vector<1x256xf32> to vector<8x256xf32>
    %156 = arith.addf %150, %155 : vector<8x256xf32>
    %157 = vector.extract_strided_slice %156 {offsets = [0, 0], sizes = [8, 128], strides = [1, 1]} : vector<8x256xf32> to vector<8x128xf32>
    %cst_72 = arith.constant dense<0.000000e+00> : vector<8xf32>
    %158 = vector.multi_reduction <add>, %157, %cst_72 [1] : vector<8x128xf32> to vector<8xf32>
    %159 = vector.shape_cast %158 : vector<8xf32> to vector<8x1xf32>
    %cst_73 = arith.constant 1.280000e+02 : f32
    %160 = vector.broadcast %cst_73 : f32 to vector<8x1xf32>
    %161 = arith.divf %159, %160 : vector<8x1xf32>
    %162 = vector.broadcast %161 : vector<8x1xf32> to vector<8x128xf32>
    %163 = arith.subf %157, %162 : vector<8x128xf32>
    %164 = arith.mulf %163, %163 : vector<8x128xf32>
    %cst_74 = arith.constant dense<0.000000e+00> : vector<8xf32>
    %165 = vector.multi_reduction <add>, %164, %cst_74 [1] : vector<8x128xf32> to vector<8xf32>
    %166 = vector.shape_cast %165 : vector<8xf32> to vector<8x1xf32>
    %cst_75 = arith.constant 1.280000e+02 : f32
    %167 = vector.broadcast %cst_75 : f32 to vector<8x1xf32>
    %168 = arith.divf %166, %167 : vector<8x1xf32>
    %cst_76 = arith.constant 9.99999974E-6 : f32
    %169 = vector.broadcast %cst_76 : f32 to vector<8x1xf32>
    %170 = arith.addf %168, %169 : vector<8x1xf32>
    %171 = math.rsqrt %170 : vector<8x1xf32>
    %172 = vector.broadcast %171 : vector<8x1xf32> to vector<8x128xf32>
    %173 = arith.mulf %163, %172 : vector<8x128xf32>
    %174 = vector.extract_strided_slice %156 {offsets = [0, 128], sizes = [8, 128], strides = [1, 1]} : vector<8x256xf32> to vector<8x128xf32>
    %cst_77 = arith.constant dense<0.000000e+00> : vector<8xf32>
    %175 = vector.multi_reduction <add>, %174, %cst_77 [1] : vector<8x128xf32> to vector<8xf32>
    %176 = vector.shape_cast %175 : vector<8xf32> to vector<8x1xf32>
    %cst_78 = arith.constant 1.280000e+02 : f32
    %177 = vector.broadcast %cst_78 : f32 to vector<8x1xf32>
    %178 = arith.divf %176, %177 : vector<8x1xf32>
    %179 = vector.broadcast %178 : vector<8x1xf32> to vector<8x128xf32>
    %180 = arith.subf %174, %179 : vector<8x128xf32>
    %181 = arith.mulf %180, %180 : vector<8x128xf32>
    %cst_79 = arith.constant dense<0.000000e+00> : vector<8xf32>
    %182 = vector.multi_reduction <add>, %181, %cst_79 [1] : vector<8x128xf32> to vector<8xf32>
    %183 = vector.shape_cast %182 : vector<8xf32> to vector<8x1xf32>
    %cst_80 = arith.constant 1.280000e+02 : f32
    %184 = vector.broadcast %cst_80 : f32 to vector<8x1xf32>
    %185 = arith.divf %183, %184 : vector<8x1xf32>
    %cst_81 = arith.constant 9.99999974E-6 : f32
    %186 = vector.broadcast %cst_81 : f32 to vector<8x1xf32>
    %187 = arith.addf %185, %186 : vector<8x1xf32>
    %188 = math.rsqrt %187 : vector<8x1xf32>
    %189 = vector.broadcast %188 : vector<8x1xf32> to vector<8x128xf32>
    %190 = arith.mulf %180, %189 : vector<8x128xf32>
    %191 = tpu.concatenate %173, %190 in 1 : vector<8x128xf32>, vector<8x128xf32> -> vector<8x256xf32>
    %c2_i32_82 = arith.constant 2 : i32
    %192 = arith.muli %c2_i32_82, %c2_i32_64 : i32
    %c1_i32_83 = arith.constant 1 : i32
    %193 = arith.addi %192, %c1_i32_83 : i32
    %194 = arith.index_cast %193 : i32 to index
    %c0_84 = arith.constant 0 : index
    %c0_85 = arith.constant 0 : index
    %195 = vector.load %arg6[%194, %c0_84, %c0_85] : memref<9x256x256xbf16, #tpu.memory_space<vmem>>, vector<1x256x256xbf16>
    %196 = vector.shape_cast %195 : vector<1x256x256xbf16> to vector<256x256xbf16>
    %197 = arith.truncf %191 : vector<8x256xf32> to vector<8x256xbf16>
    %cst_86 = arith.constant dense<0.000000e+00> : vector<8x256xf32>
    %198 = tpu.matmul %197, %196, %cst_86 {dimension_numbers = #tpu.dot_dimension_numbers<[1], [0], [0], [1], [0, 0, 1, 1], [], []>} : vector<8x256xbf16>, vector<256x256xbf16>, vector<8x256xf32> -> vector<8x256xf32>
    %c2_i32_87 = arith.constant 2 : i32
    %199 = arith.muli %c2_i32_87, %c2_i32_64 : i32
    %c1_i32_88 = arith.constant 1 : i32
    %200 = arith.addi %199, %c1_i32_88 : i32
    %201 = arith.index_cast %200 : i32 to index
    %c0_89 = arith.constant 0 : index
    %c0_90 = arith.constant 0 : index
    %202 = vector.load %arg7[%201, %c0_89, %c0_90] : memref<9x1x256xf32, #tpu.memory_space<vmem>>, vector<1x1x256xf32>
    %203 = vector.shape_cast %202 : vector<1x1x256xf32> to vector<1x256xf32>
    %204 = vector.broadcast %203 : vector<1x256xf32> to vector<8x256xf32>
    %205 = arith.addf %198, %204 : vector<8x256xf32>
    %c3_i32 = arith.constant 3 : i32
    %c2_i32_91 = arith.constant 2 : i32
    %206 = arith.muli %c2_i32_91, %c3_i32 : i32
    %207 = arith.index_cast %206 : i32 to index
    %c0_92 = arith.constant 0 : index
    %c0_93 = arith.constant 0 : index
    %208 = vector.load %arg6[%207, %c0_92, %c0_93] : memref<9x256x256xbf16, #tpu.memory_space<vmem>>, vector<1x256x256xbf16>
    %209 = vector.shape_cast %208 : vector<1x256x256xbf16> to vector<256x256xbf16>
    %210 = arith.truncf %205 : vector<8x256xf32> to vector<8x256xbf16>
    %cst_94 = arith.constant dense<0.000000e+00> : vector<8x256xf32>
    %211 = tpu.matmul %210, %209, %cst_94 {dimension_numbers = #tpu.dot_dimension_numbers<[1], [0], [0], [1], [0, 0, 1, 1], [], []>} : vector<8x256xbf16>, vector<256x256xbf16>, vector<8x256xf32> -> vector<8x256xf32>
    %c2_i32_95 = arith.constant 2 : i32
    %212 = arith.muli %c2_i32_95, %c3_i32 : i32
    %213 = arith.index_cast %212 : i32 to index
    %c0_96 = arith.constant 0 : index
    %c0_97 = arith.constant 0 : index
    %214 = vector.load %arg7[%213, %c0_96, %c0_97] : memref<9x1x256xf32, #tpu.memory_space<vmem>>, vector<1x1x256xf32>
    %215 = vector.shape_cast %214 : vector<1x1x256xf32> to vector<1x256xf32>
    %216 = vector.broadcast %215 : vector<1x256xf32> to vector<8x256xf32>
    %217 = arith.addf %211, %216 : vector<8x256xf32>
    %218 = vector.extract_strided_slice %217 {offsets = [0, 0], sizes = [8, 128], strides = [1, 1]} : vector<8x256xf32> to vector<8x128xf32>
    %cst_98 = arith.constant dense<0.000000e+00> : vector<8xf32>
    %219 = vector.multi_reduction <add>, %218, %cst_98 [1] : vector<8x128xf32> to vector<8xf32>
    %220 = vector.shape_cast %219 : vector<8xf32> to vector<8x1xf32>
    %cst_99 = arith.constant 1.280000e+02 : f32
    %221 = vector.broadcast %cst_99 : f32 to vector<8x1xf32>
    %222 = arith.divf %220, %221 : vector<8x1xf32>
    %223 = vector.broadcast %222 : vector<8x1xf32> to vector<8x128xf32>
    %224 = arith.subf %218, %223 : vector<8x128xf32>
    %225 = arith.mulf %224, %224 : vector<8x128xf32>
    %cst_100 = arith.constant dense<0.000000e+00> : vector<8xf32>
    %226 = vector.multi_reduction <add>, %225, %cst_100 [1] : vector<8x128xf32> to vector<8xf32>
    %227 = vector.shape_cast %226 : vector<8xf32> to vector<8x1xf32>
    %cst_101 = arith.constant 1.280000e+02 : f32
    %228 = vector.broadcast %cst_101 : f32 to vector<8x1xf32>
    %229 = arith.divf %227, %228 : vector<8x1xf32>
    %cst_102 = arith.constant 9.99999974E-6 : f32
    %230 = vector.broadcast %cst_102 : f32 to vector<8x1xf32>
    %231 = arith.addf %229, %230 : vector<8x1xf32>
    %232 = math.rsqrt %231 : vector<8x1xf32>
    %233 = vector.broadcast %232 : vector<8x1xf32> to vector<8x128xf32>
    %234 = arith.mulf %224, %233 : vector<8x128xf32>
    %235 = vector.extract_strided_slice %217 {offsets = [0, 128], sizes = [8, 128], strides = [1, 1]} : vector<8x256xf32> to vector<8x128xf32>
    %cst_103 = arith.constant dense<0.000000e+00> : vector<8xf32>
    %236 = vector.multi_reduction <add>, %235, %cst_103 [1] : vector<8x128xf32> to vector<8xf32>
    %237 = vector.shape_cast %236 : vector<8xf32> to vector<8x1xf32>
    %cst_104 = arith.constant 1.280000e+02 : f32
    %238 = vector.broadcast %cst_104 : f32 to vector<8x1xf32>
    %239 = arith.divf %237, %238 : vector<8x1xf32>
    %240 = vector.broadcast %239 : vector<8x1xf32> to vector<8x128xf32>
    %241 = arith.subf %235, %240 : vector<8x128xf32>
    %242 = arith.mulf %241, %241 : vector<8x128xf32>
    %cst_105 = arith.constant dense<0.000000e+00> : vector<8xf32>
    %243 = vector.multi_reduction <add>, %242, %cst_105 [1] : vector<8x128xf32> to vector<8xf32>
    %244 = vector.shape_cast %243 : vector<8xf32> to vector<8x1xf32>
    %cst_106 = arith.constant 1.280000e+02 : f32
    %245 = vector.broadcast %cst_106 : f32 to vector<8x1xf32>
    %246 = arith.divf %244, %245 : vector<8x1xf32>
    %cst_107 = arith.constant 9.99999974E-6 : f32
    %247 = vector.broadcast %cst_107 : f32 to vector<8x1xf32>
    %248 = arith.addf %246, %247 : vector<8x1xf32>
    %249 = math.rsqrt %248 : vector<8x1xf32>
    %250 = vector.broadcast %249 : vector<8x1xf32> to vector<8x128xf32>
    %251 = arith.mulf %241, %250 : vector<8x128xf32>
    %252 = tpu.concatenate %234, %251 in 1 : vector<8x128xf32>, vector<8x128xf32> -> vector<8x256xf32>
    %c2_i32_108 = arith.constant 2 : i32
    %253 = arith.muli %c2_i32_108, %c3_i32 : i32
    %c1_i32_109 = arith.constant 1 : i32
    %254 = arith.addi %253, %c1_i32_109 : i32
    %255 = arith.index_cast %254 : i32 to index
    %c0_110 = arith.constant 0 : index
    %c0_111 = arith.constant 0 : index
    %256 = vector.load %arg6[%255, %c0_110, %c0_111] : memref<9x256x256xbf16, #tpu.memory_space<vmem>>, vector<1x256x256xbf16>
    %257 = vector.shape_cast %256 : vector<1x256x256xbf16> to vector<256x256xbf16>
    %258 = arith.truncf %252 : vector<8x256xf32> to vector<8x256xbf16>
    %cst_112 = arith.constant dense<0.000000e+00> : vector<8x256xf32>
    %259 = tpu.matmul %258, %257, %cst_112 {dimension_numbers = #tpu.dot_dimension_numbers<[1], [0], [0], [1], [0, 0, 1, 1], [], []>} : vector<8x256xbf16>, vector<256x256xbf16>, vector<8x256xf32> -> vector<8x256xf32>
    %c2_i32_113 = arith.constant 2 : i32
    %260 = arith.muli %c2_i32_113, %c3_i32 : i32
    %c1_i32_114 = arith.constant 1 : i32
    %261 = arith.addi %260, %c1_i32_114 : i32
    %262 = arith.index_cast %261 : i32 to index
    %c0_115 = arith.constant 0 : index
    %c0_116 = arith.constant 0 : index
    %263 = vector.load %arg7[%262, %c0_115, %c0_116] : memref<9x1x256xf32, #tpu.memory_space<vmem>>, vector<1x1x256xf32>
    %264 = vector.shape_cast %263 : vector<1x1x256xf32> to vector<1x256xf32>
    %265 = vector.broadcast %264 : vector<1x256xf32> to vector<8x256xf32>
    %266 = arith.addf %259, %265 : vector<8x256xf32>
    %c4_i32 = arith.constant 4 : i32
    %c8 = arith.constant 8 : index
    %c0_117 = arith.constant 0 : index
    %c0_118 = arith.constant 0 : index
    %267 = vector.load %arg6[%c8, %c0_117, %c0_118] : memref<9x256x256xbf16, #tpu.memory_space<vmem>>, vector<1x256x256xbf16>
    %268 = vector.shape_cast %267 : vector<1x256x256xbf16> to vector<256x256xbf16>
    %269 = arith.truncf %266 : vector<8x256xf32> to vector<8x256xbf16>
    %cst_119 = arith.constant dense<0.000000e+00> : vector<8x256xf32>
    %270 = tpu.matmul %269, %268, %cst_119 {dimension_numbers = #tpu.dot_dimension_numbers<[1], [0], [0], [1], [0, 0, 1, 1], [], []>} : vector<8x256xbf16>, vector<256x256xbf16>, vector<8x256xf32> -> vector<8x256xf32>
    %c8_120 = arith.constant 8 : index
    %c0_121 = arith.constant 0 : index
    %c0_122 = arith.constant 0 : index
    %271 = vector.load %arg7[%c8_120, %c0_121, %c0_122] : memref<9x1x256xf32, #tpu.memory_space<vmem>>, vector<1x1x256xf32>
    %272 = vector.shape_cast %271 : vector<1x1x256xf32> to vector<1x256xf32>
    %273 = vector.broadcast %272 : vector<1x256xf32> to vector<8x256xf32>
    %274 = arith.addf %270, %273 : vector<8x256xf32>
    %275 = vector.extract_strided_slice %274 {offsets = [0, 0], sizes = [8, 128], strides = [1, 1]} : vector<8x256xf32> to vector<8x128xf32>
    %c0_123 = arith.constant 0 : index
    %c0_124 = arith.constant 0 : index
    %276 = vector.load %arg14[%c0_123, %c0_124] : memref<8x128xf32, #tpu.memory_space<vmem>>, vector<8x128xf32>
    tpu.vector_store %arg14[%c0_123, %c0_124], %275 {strides = array<i32>} : memref<8x128xf32, #tpu.memory_space<vmem>>, vector<8x128xf32>,
    %277 = vector.extract_strided_slice %274 {offsets = [0, 128], sizes = [8, 128], strides = [1, 1]} : vector<8x256xf32> to vector<8x128xf32>
    %c0_125 = arith.constant 0 : index
    %c0_126 = arith.constant 0 : index
    %278 = vector.load %arg15[%c0_125, %c0_126] : memref<8x128xf32, #tpu.memory_space<vmem>>, vector<8x128xf32>
    tpu.vector_store %arg15[%c0_125, %c0_126], %277 {strides = array<i32>} : memref<8x128xf32, #tpu.memory_space<vmem>>, vector<8x128xf32>,
    %c0_i32_127 = arith.constant 0 : i32
    %279 = tpu.memref_slice %arg20[%c0_i32_127] : memref<3x!tpu.dma_semaphore, #tpu.memory_space<semaphore_mem>> -> memref<1x!tpu.dma_semaphore, #tpu.memory_space<semaphore_mem>>
    %280 = tpu.memref_squeeze %279 : memref<1x!tpu.dma_semaphore, #tpu.memory_space<semaphore_mem>> -> memref<!tpu.dma_semaphore, #tpu.memory_space<semaphore_mem>>
    tpu.wait_dma2 semaphore(%280 : memref<!tpu.dma_semaphore, #tpu.memory_space<semaphore_mem>>) src(%arg11 : memref<2x256x256xbf16, #tpu.memory_space<any>>) dst(%arg17 : memref<2x256x256xbf16, #tpu.memory_space<vmem>>)
    %c1_i32_128 = arith.constant 1 : i32
    %281 = tpu.memref_slice %arg20[%c1_i32_128] : memref<3x!tpu.dma_semaphore, #tpu.memory_space<semaphore_mem>> -> memref<1x!tpu.dma_semaphore, #tpu.memory_space<semaphore_mem>>
    %282 = tpu.memref_squeeze %281 : memref<1x!tpu.dma_semaphore, #tpu.memory_space<semaphore_mem>> -> memref<!tpu.dma_semaphore, #tpu.memory_space<semaphore_mem>>
    tpu.wait_dma2 semaphore(%282 : memref<!tpu.dma_semaphore, #tpu.memory_space<semaphore_mem>>) src(%arg12 : memref<256x128xbf16, #tpu.memory_space<any>>) dst(%arg18 : memref<256x128xbf16, #tpu.memory_space<vmem>>)
    %c2_i32_129 = arith.constant 2 : i32
    %283 = tpu.memref_slice %arg20[%c2_i32_129] : memref<3x!tpu.dma_semaphore, #tpu.memory_space<semaphore_mem>> -> memref<1x!tpu.dma_semaphore, #tpu.memory_space<semaphore_mem>>
    %284 = tpu.memref_squeeze %283 : memref<1x!tpu.dma_semaphore, #tpu.memory_space<semaphore_mem>> -> memref<!tpu.dma_semaphore, #tpu.memory_space<semaphore_mem>>
    tpu.wait_dma2 semaphore(%284 : memref<!tpu.dma_semaphore, #tpu.memory_space<semaphore_mem>>) src(%arg13 : memref<9x128x128xbf16, #tpu.memory_space<any>>) dst(%arg19 : memref<9x128x128xbf16, #tpu.memory_space<vmem>>)
    %c0_130 = arith.constant 0 : index
    %c0_131 = arith.constant 0 : index
    %c0_132 = arith.constant 0 : index
    %285 = vector.load %arg17[%c0_130, %c0_131, %c0_132] : memref<2x256x256xbf16, #tpu.memory_space<vmem>>, vector<1x256x256xbf16>
    %286 = vector.shape_cast %285 : vector<1x256x256xbf16> to vector<256x256xbf16>
    %287 = arith.truncf %274 : vector<8x256xf32> to vector<8x256xbf16>
    %cst_133 = arith.constant dense<0.000000e+00> : vector<8x256xf32>
    %288 = tpu.matmul %287, %286, %cst_133 {dimension_numbers = #tpu.dot_dimension_numbers<[1], [0], [0], [1], [0, 0, 1, 1], [], []>} : vector<8x256xbf16>, vector<256x256xbf16>, vector<8x256xf32> -> vector<8x256xf32>
    %c0_134 = arith.constant 0 : index
    %c0_135 = arith.constant 0 : index
    %c0_136 = arith.constant 0 : index
    %289 = vector.load %arg8[%c0_134, %c0_135, %c0_136] : memref<2x1x256xf32, #tpu.memory_space<vmem>>, vector<1x1x256xf32>
    %290 = vector.shape_cast %289 : vector<1x1x256xf32> to vector<1x256xf32>
    %291 = vector.broadcast %290 : vector<1x256xf32> to vector<8x256xf32>
    %292 = arith.addf %288, %291 : vector<8x256xf32>
    %293 = arith.mulf %274, %292 : vector<8x256xf32>
    %294 = arith.addf %293, %274 : vector<8x256xf32>
    %c1 = arith.constant 1 : index
    %c0_137 = arith.constant 0 : index
    %c0_138 = arith.constant 0 : index
    %295 = vector.load %arg17[%c1, %c0_137, %c0_138] : memref<2x256x256xbf16, #tpu.memory_space<vmem>>, vector<1x256x256xbf16>
    %296 = vector.shape_cast %295 : vector<1x256x256xbf16> to vector<256x256xbf16>
    %297 = arith.truncf %294 : vector<8x256xf32> to vector<8x256xbf16>
    %cst_139 = arith.constant dense<0.000000e+00> : vector<8x256xf32>
    %298 = tpu.matmul %297, %296, %cst_139 {dimension_numbers = #tpu.dot_dimension_numbers<[1], [0], [0], [1], [0, 0, 1, 1], [], []>} : vector<8x256xbf16>, vector<256x256xbf16>, vector<8x256xf32> -> vector<8x256xf32>
    %c1_140 = arith.constant 1 : index
    %c0_141 = arith.constant 0 : index
    %c0_142 = arith.constant 0 : index
    %299 = vector.load %arg8[%c1_140, %c0_141, %c0_142] : memref<2x1x256xf32, #tpu.memory_space<vmem>>, vector<1x1x256xf32>
    %300 = vector.shape_cast %299 : vector<1x1x256xf32> to vector<1x256xf32>
    %301 = vector.broadcast %300 : vector<1x256xf32> to vector<8x256xf32>
    %302 = arith.addf %298, %301 : vector<8x256xf32>
    %303 = arith.mulf %274, %302 : vector<8x256xf32>
    %304 = arith.addf %303, %294 : vector<8x256xf32>
    %c0_143 = arith.constant 0 : index
    %c0_144 = arith.constant 0 : index
    %305 = vector.load %arg18[%c0_143, %c0_144] : memref<256x128xbf16, #tpu.memory_space<vmem>>, vector<256x128xbf16>
    %306 = arith.truncf %304 : vector<8x256xf32> to vector<8x256xbf16>
    %cst_145 = arith.constant dense<0.000000e+00> : vector<8x128xf32>
    %307 = tpu.matmul %306, %305, %cst_145 {dimension_numbers = #tpu.dot_dimension_numbers<[1], [0], [0], [1], [0, 0, 1, 1], [], []>} : vector<8x256xbf16>, vector<256x128xbf16>, vector<8x128xf32> -> vector<8x128xf32>
    %c0_146 = arith.constant 0 : index
    %c0_147 = arith.constant 0 : index
    %308 = vector.load %arg9[%c0_146, %c0_147] : memref<1x128xf32, #tpu.memory_space<vmem>>, vector<1x128xf32>
    %309 = vector.broadcast %308 : vector<1x128xf32> to vector<8x128xf32>
    %310 = arith.addf %307, %309 : vector<8x128xf32>
    %c0_i32_148 = arith.constant 0 : i32
    %c2_i32_149 = arith.constant 2 : i32
    %311 = arith.muli %c2_i32_149, %c0_i32_148 : i32
    %312 = arith.index_cast %311 : i32 to index
    %c0_150 = arith.constant 0 : index
    %c0_151 = arith.constant 0 : index
    %313 = vector.load %arg19[%312, %c0_150, %c0_151] : memref<9x128x128xbf16, #tpu.memory_space<vmem>>, vector<1x128x128xbf16>
    %314 = vector.shape_cast %313 : vector<1x128x128xbf16> to vector<128x128xbf16>
    %315 = arith.truncf %310 : vector<8x128xf32> to vector<8x128xbf16>
    %cst_152 = arith.constant dense<0.000000e+00> : vector<8x128xf32>
    %316 = tpu.matmul %315, %314, %cst_152 {dimension_numbers = #tpu.dot_dimension_numbers<[1], [0], [0], [1], [0, 0, 1, 1], [], []>} : vector<8x128xbf16>, vector<128x128xbf16>, vector<8x128xf32> -> vector<8x128xf32>
    %c2_i32_153 = arith.constant 2 : i32
    %317 = arith.muli %c2_i32_153, %c0_i32_148 : i32
    %318 = arith.index_cast %317 : i32 to index
    %c0_154 = arith.constant 0 : index
    %c0_155 = arith.constant 0 : index
    %319 = vector.load %arg10[%318, %c0_154, %c0_155] : memref<9x1x128xf32, #tpu.memory_space<vmem>>, vector<1x1x128xf32>
    %320 = vector.shape_cast %319 : vector<1x1x128xf32> to vector<1x128xf32>
    %321 = vector.broadcast %320 : vector<1x128xf32> to vector<8x128xf32>
    %322 = arith.addf %316, %321 : vector<8x128xf32>
    %cst_156 = arith.constant dense<0.000000e+00> : vector<8xf32>
    %323 = vector.multi_reduction <add>, %322, %cst_156 [1] : vector<8x128xf32> to vector<8xf32>
    %324 = vector.shape_cast %323 : vector<8xf32> to vector<8x1xf32>
    %cst_157 = arith.constant 1.280000e+02 : f32
    %325 = vector.broadcast %cst_157 : f32 to vector<8x1xf32>
    %326 = arith.divf %324, %325 : vector<8x1xf32>
    %327 = vector.broadcast %326 : vector<8x1xf32> to vector<8x128xf32>
    %328 = arith.subf %322, %327 : vector<8x128xf32>
    %329 = arith.mulf %328, %328 : vector<8x128xf32>
    %cst_158 = arith.constant dense<0.000000e+00> : vector<8xf32>
    %330 = vector.multi_reduction <add>, %329, %cst_158 [1] : vector<8x128xf32> to vector<8xf32>
    %331 = vector.shape_cast %330 : vector<8xf32> to vector<8x1xf32>
    %cst_159 = arith.constant 1.280000e+02 : f32
    %332 = vector.broadcast %cst_159 : f32 to vector<8x1xf32>
    %333 = arith.divf %331, %332 : vector<8x1xf32>
    %cst_160 = arith.constant 9.99999974E-6 : f32
    %334 = vector.broadcast %cst_160 : f32 to vector<8x1xf32>
    %335 = arith.addf %333, %334 : vector<8x1xf32>
    %336 = math.rsqrt %335 : vector<8x1xf32>
    %337 = vector.broadcast %336 : vector<8x1xf32> to vector<8x128xf32>
    %338 = arith.mulf %328, %337 : vector<8x128xf32>
    %c2_i32_161 = arith.constant 2 : i32
    %339 = arith.muli %c2_i32_161, %c0_i32_148 : i32
    %c1_i32_162 = arith.constant 1 : i32
    %340 = arith.addi %339, %c1_i32_162 : i32
    %341 = arith.index_cast %340 : i32 to index
    %c0_163 = arith.constant 0 : index
    %c0_164 = arith.constant 0 : index
    %342 = vector.load %arg19[%341, %c0_163, %c0_164] : memref<9x128x128xbf16, #tpu.memory_space<vmem>>, vector<1x128x128xbf16>
    %343 = vector.shape_cast %342 : vector<1x128x128xbf16> to vector<128x128xbf16>
    %344 = arith.truncf %338 : vector<8x128xf32> to vector<8x128xbf16>
    %cst_165 = arith.constant dense<0.000000e+00> : vector<8x128xf32>
    %345 = tpu.matmul %344, %343, %cst_165 {dimension_numbers = #tpu.dot_dimension_numbers<[1], [0], [0], [1], [0, 0, 1, 1], [], []>} : vector<8x128xbf16>, vector<128x128xbf16>, vector<8x128xf32> -> vector<8x128xf32>
    %c2_i32_166 = arith.constant 2 : i32
    %346 = arith.muli %c2_i32_166, %c0_i32_148 : i32
    %c1_i32_167 = arith.constant 1 : i32
    %347 = arith.addi %346, %c1_i32_167 : i32
    %348 = arith.index_cast %347 : i32 to index
    %c0_168 = arith.constant 0 : index
    %c0_169 = arith.constant 0 : index
    %349 = vector.load %arg10[%348, %c0_168, %c0_169] : memref<9x1x128xf32, #tpu.memory_space<vmem>>, vector<1x1x128xf32>
    %350 = vector.shape_cast %349 : vector<1x1x128xf32> to vector<1x128xf32>
    %351 = vector.broadcast %350 : vector<1x128xf32> to vector<8x128xf32>
    %352 = arith.addf %345, %351 : vector<8x128xf32>
    %c1_i32_170 = arith.constant 1 : i32
    %c2_i32_171 = arith.constant 2 : i32
    %353 = arith.muli %c2_i32_171, %c1_i32_170 : i32
    %354 = arith.index_cast %353 : i32 to index
    %c0_172 = arith.constant 0 : index
    %c0_173 = arith.constant 0 : index
    %355 = vector.load %arg19[%354, %c0_172, %c0_173] : memref<9x128x128xbf16, #tpu.memory_space<vmem>>, vector<1x128x128xbf16>
    %356 = vector.shape_cast %355 : vector<1x128x128xbf16> to vector<128x128xbf16>
    %357 = arith.truncf %352 : vector<8x128xf32> to vector<8x128xbf16>
    %cst_174 = arith.constant dense<0.000000e+00> : vector<8x128xf32>
    %358 = tpu.matmul %357, %356, %cst_174 {dimension_numbers = #tpu.dot_dimension_numbers<[1], [0], [0], [1], [0, 0, 1, 1], [], []>} : vector<8x128xbf16>, vector<128x128xbf16>, vector<8x128xf32> -> vector<8x128xf32>
    %c2_i32_175 = arith.constant 2 : i32
    %359 = arith.muli %c2_i32_175, %c1_i32_170 : i32
    %360 = arith.index_cast %359 : i32 to index
    %c0_176 = arith.constant 0 : index
    %c0_177 = arith.constant 0 : index
    %361 = vector.load %arg10[%360, %c0_176, %c0_177] : memref<9x1x128xf32, #tpu.memory_space<vmem>>, vector<1x1x128xf32>
    %362 = vector.shape_cast %361 : vector<1x1x128xf32> to vector<1x128xf32>
    %363 = vector.broadcast %362 : vector<1x128xf32> to vector<8x128xf32>
    %364 = arith.addf %358, %363 : vector<8x128xf32>
    %cst_178 = arith.constant dense<0.000000e+00> : vector<8xf32>
    %365 = vector.multi_reduction <add>, %364, %cst_178 [1] : vector<8x128xf32> to vector<8xf32>
    %366 = vector.shape_cast %365 : vector<8xf32> to vector<8x1xf32>
    %cst_179 = arith.constant 1.280000e+02 : f32
    %367 = vector.broadcast %cst_179 : f32 to vector<8x1xf32>
    %368 = arith.divf %366, %367 : vector<8x1xf32>
    %369 = vector.broadcast %368 : vector<8x1xf32> to vector<8x128xf32>
    %370 = arith.subf %364, %369 : vector<8x128xf32>
    %371 = arith.mulf %370, %370 : vector<8x128xf32>
    %cst_180 = arith.constant dense<0.000000e+00> : vector<8xf32>
    %372 = vector.multi_reduction <add>, %371, %cst_180 [1] : vector<8x128xf32> to vector<8xf32>
    %373 = vector.shape_cast %372 : vector<8xf32> to vector<8x1xf32>
    %cst_181 = arith.constant 1.280000e+02 : f32
    %374 = vector.broadcast %cst_181 : f32 to vector<8x1xf32>
    %375 = arith.divf %373, %374 : vector<8x1xf32>
    %cst_182 = arith.constant 9.99999974E-6 : f32
    %376 = vector.broadcast %cst_182 : f32 to vector<8x1xf32>
    %377 = arith.addf %375, %376 : vector<8x1xf32>
    %378 = math.rsqrt %377 : vector<8x1xf32>
    %379 = vector.broadcast %378 : vector<8x1xf32> to vector<8x128xf32>
    %380 = arith.mulf %370, %379 : vector<8x128xf32>
    %c2_i32_183 = arith.constant 2 : i32
    %381 = arith.muli %c2_i32_183, %c1_i32_170 : i32
    %c1_i32_184 = arith.constant 1 : i32
    %382 = arith.addi %381, %c1_i32_184 : i32
    %383 = arith.index_cast %382 : i32 to index
    %c0_185 = arith.constant 0 : index
    %c0_186 = arith.constant 0 : index
    %384 = vector.load %arg19[%383, %c0_185, %c0_186] : memref<9x128x128xbf16, #tpu.memory_space<vmem>>, vector<1x128x128xbf16>
    %385 = vector.shape_cast %384 : vector<1x128x128xbf16> to vector<128x128xbf16>
    %386 = arith.truncf %380 : vector<8x128xf32> to vector<8x128xbf16>
    %cst_187 = arith.constant dense<0.000000e+00> : vector<8x128xf32>
    %387 = tpu.matmul %386, %385, %cst_187 {dimension_numbers = #tpu.dot_dimension_numbers<[1], [0], [0], [1], [0, 0, 1, 1], [], []>} : vector<8x128xbf16>, vector<128x128xbf16>, vector<8x128xf32> -> vector<8x128xf32>
    %c2_i32_188 = arith.constant 2 : i32
    %388 = arith.muli %c2_i32_188, %c1_i32_170 : i32
    %c1_i32_189 = arith.constant 1 : i32
    %389 = arith.addi %388, %c1_i32_189 : i32
    %390 = arith.index_cast %389 : i32 to index
    %c0_190 = arith.constant 0 : index
    %c0_191 = arith.constant 0 : index
    %391 = vector.load %arg10[%390, %c0_190, %c0_191] : memref<9x1x128xf32, #tpu.memory_space<vmem>>, vector<1x1x128xf32>
    %392 = vector.shape_cast %391 : vector<1x1x128xf32> to vector<1x128xf32>
    %393 = vector.broadcast %392 : vector<1x128xf32> to vector<8x128xf32>
    %394 = arith.addf %387, %393 : vector<8x128xf32>
    %c2_i32_192 = arith.constant 2 : i32
    %c2_i32_193 = arith.constant 2 : i32
    %395 = arith.muli %c2_i32_193, %c2_i32_192 : i32
    %396 = arith.index_cast %395 : i32 to index
    %c0_194 = arith.constant 0 : index
    %c0_195 = arith.constant 0 : index
    %397 = vector.load %arg19[%396, %c0_194, %c0_195] : memref<9x128x128xbf16, #tpu.memory_space<vmem>>, vector<1x128x128xbf16>
    %398 = vector.shape_cast %397 : vector<1x128x128xbf16> to vector<128x128xbf16>
    %399 = arith.truncf %394 : vector<8x128xf32> to vector<8x128xbf16>
    %cst_196 = arith.constant dense<0.000000e+00> : vector<8x128xf32>
    %400 = tpu.matmul %399, %398, %cst_196 {dimension_numbers = #tpu.dot_dimension_numbers<[1], [0], [0], [1], [0, 0, 1, 1], [], []>} : vector<8x128xbf16>, vector<128x128xbf16>, vector<8x128xf32> -> vector<8x128xf32>
    %c2_i32_197 = arith.constant 2 : i32
    %401 = arith.muli %c2_i32_197, %c2_i32_192 : i32
    %402 = arith.index_cast %401 : i32 to index
    %c0_198 = arith.constant 0 : index
    %c0_199 = arith.constant 0 : index
    %403 = vector.load %arg10[%402, %c0_198, %c0_199] : memref<9x1x128xf32, #tpu.memory_space<vmem>>, vector<1x1x128xf32>
    %404 = vector.shape_cast %403 : vector<1x1x128xf32> to vector<1x128xf32>
    %405 = vector.broadcast %404 : vector<1x128xf32> to vector<8x128xf32>
    %406 = arith.addf %400, %405 : vector<8x128xf32>
    %cst_200 = arith.constant dense<0.000000e+00> : vector<8xf32>
    %407 = vector.multi_reduction <add>, %406, %cst_200 [1] : vector<8x128xf32> to vector<8xf32>
    %408 = vector.shape_cast %407 : vector<8xf32> to vector<8x1xf32>
    %cst_201 = arith.constant 1.280000e+02 : f32
    %409 = vector.broadcast %cst_201 : f32 to vector<8x1xf32>
    %410 = arith.divf %408, %409 : vector<8x1xf32>
    %411 = vector.broadcast %410 : vector<8x1xf32> to vector<8x128xf32>
    %412 = arith.subf %406, %411 : vector<8x128xf32>
    %413 = arith.mulf %412, %412 : vector<8x128xf32>
    %cst_202 = arith.constant dense<0.000000e+00> : vector<8xf32>
    %414 = vector.multi_reduction <add>, %413, %cst_202 [1] : vector<8x128xf32> to vector<8xf32>
    %415 = vector.shape_cast %414 : vector<8xf32> to vector<8x1xf32>
    %cst_203 = arith.constant 1.280000e+02 : f32
    %416 = vector.broadcast %cst_203 : f32 to vector<8x1xf32>
    %417 = arith.divf %415, %416 : vector<8x1xf32>
    %cst_204 = arith.constant 9.99999974E-6 : f32
    %418 = vector.broadcast %cst_204 : f32 to vector<8x1xf32>
    %419 = arith.addf %417, %418 : vector<8x1xf32>
    %420 = math.rsqrt %419 : vector<8x1xf32>
    %421 = vector.broadcast %420 : vector<8x1xf32> to vector<8x128xf32>
    %422 = arith.mulf %412, %421 : vector<8x128xf32>
    %c2_i32_205 = arith.constant 2 : i32
    %423 = arith.muli %c2_i32_205, %c2_i32_192 : i32
    %c1_i32_206 = arith.constant 1 : i32
    %424 = arith.addi %423, %c1_i32_206 : i32
    %425 = arith.index_cast %424 : i32 to index
    %c0_207 = arith.constant 0 : index
    %c0_208 = arith.constant 0 : index
    %426 = vector.load %arg19[%425, %c0_207, %c0_208] : memref<9x128x128xbf16, #tpu.memory_space<vmem>>, vector<1x128x128xbf16>
    %427 = vector.shape_cast %426 : vector<1x128x128xbf16> to vector<128x128xbf16>
    %428 = arith.truncf %422 : vector<8x128xf32> to vector<8x128xbf16>
    %cst_209 = arith.constant dense<0.000000e+00> : vector<8x128xf32>
    %429 = tpu.matmul %428, %427, %cst_209 {dimension_numbers = #tpu.dot_dimension_numbers<[1], [0], [0], [1], [0, 0, 1, 1], [], []>} : vector<8x128xbf16>, vector<128x128xbf16>, vector<8x128xf32> -> vector<8x128xf32>
    %c2_i32_210 = arith.constant 2 : i32
    %430 = arith.muli %c2_i32_210, %c2_i32_192 : i32
    %c1_i32_211 = arith.constant 1 : i32
    %431 = arith.addi %430, %c1_i32_211 : i32
    %432 = arith.index_cast %431 : i32 to index
    %c0_212 = arith.constant 0 : index
    %c0_213 = arith.constant 0 : index
    %433 = vector.load %arg10[%432, %c0_212, %c0_213] : memref<9x1x128xf32, #tpu.memory_space<vmem>>, vector<1x1x128xf32>
    %434 = vector.shape_cast %433 : vector<1x1x128xf32> to vector<1x128xf32>
    %435 = vector.broadcast %434 : vector<1x128xf32> to vector<8x128xf32>
    %436 = arith.addf %429, %435 : vector<8x128xf32>
    %c3_i32_214 = arith.constant 3 : i32
    %c2_i32_215 = arith.constant 2 : i32
    %437 = arith.muli %c2_i32_215, %c3_i32_214 : i32
    %438 = arith.index_cast %437 : i32 to index
    %c0_216 = arith.constant 0 : index
    %c0_217 = arith.constant 0 : index
    %439 = vector.load %arg19[%438, %c0_216, %c0_217] : memref<9x128x128xbf16, #tpu.memory_space<vmem>>, vector<1x128x128xbf16>
    %440 = vector.shape_cast %439 : vector<1x128x128xbf16> to vector<128x128xbf16>
    %441 = arith.truncf %436 : vector<8x128xf32> to vector<8x128xbf16>
    %cst_218 = arith.constant dense<0.000000e+00> : vector<8x128xf32>
    %442 = tpu.matmul %441, %440, %cst_218 {dimension_numbers = #tpu.dot_dimension_numbers<[1], [0], [0], [1], [0, 0, 1, 1], [], []>} : vector<8x128xbf16>, vector<128x128xbf16>, vector<8x128xf32> -> vector<8x128xf32>
    %c2_i32_219 = arith.constant 2 : i32
    %443 = arith.muli %c2_i32_219, %c3_i32_214 : i32
    %444 = arith.index_cast %443 : i32 to index
    %c0_220 = arith.constant 0 : index
    %c0_221 = arith.constant 0 : index
    %445 = vector.load %arg10[%444, %c0_220, %c0_221] : memref<9x1x128xf32, #tpu.memory_space<vmem>>, vector<1x1x128xf32>
    %446 = vector.shape_cast %445 : vector<1x1x128xf32> to vector<1x128xf32>
    %447 = vector.broadcast %446 : vector<1x128xf32> to vector<8x128xf32>
    %448 = arith.addf %442, %447 : vector<8x128xf32>
    %cst_222 = arith.constant dense<0.000000e+00> : vector<8xf32>
    %449 = vector.multi_reduction <add>, %448, %cst_222 [1] : vector<8x128xf32> to vector<8xf32>
    %450 = vector.shape_cast %449 : vector<8xf32> to vector<8x1xf32>
    %cst_223 = arith.constant 1.280000e+02 : f32
    %451 = vector.broadcast %cst_223 : f32 to vector<8x1xf32>
    %452 = arith.divf %450, %451 : vector<8x1xf32>
    %453 = vector.broadcast %452 : vector<8x1xf32> to vector<8x128xf32>
    %454 = arith.subf %448, %453 : vector<8x128xf32>
    %455 = arith.mulf %454, %454 : vector<8x128xf32>
    %cst_224 = arith.constant dense<0.000000e+00> : vector<8xf32>
    %456 = vector.multi_reduction <add>, %455, %cst_224 [1] : vector<8x128xf32> to vector<8xf32>
    %457 = vector.shape_cast %456 : vector<8xf32> to vector<8x1xf32>
    %cst_225 = arith.constant 1.280000e+02 : f32
    %458 = vector.broadcast %cst_225 : f32 to vector<8x1xf32>
    %459 = arith.divf %457, %458 : vector<8x1xf32>
    %cst_226 = arith.constant 9.99999974E-6 : f32
    %460 = vector.broadcast %cst_226 : f32 to vector<8x1xf32>
    %461 = arith.addf %459, %460 : vector<8x1xf32>
    %462 = math.rsqrt %461 : vector<8x1xf32>
    %463 = vector.broadcast %462 : vector<8x1xf32> to vector<8x128xf32>
    %464 = arith.mulf %454, %463 : vector<8x128xf32>
    %c2_i32_227 = arith.constant 2 : i32
    %465 = arith.muli %c2_i32_227, %c3_i32_214 : i32
    %c1_i32_228 = arith.constant 1 : i32
    %466 = arith.addi %465, %c1_i32_228 : i32
    %467 = arith.index_cast %466 : i32 to index
    %c0_229 = arith.constant 0 : index
    %c0_230 = arith.constant 0 : index
    %468 = vector.load %arg19[%467, %c0_229, %c0_230] : memref<9x128x128xbf16, #tpu.memory_space<vmem>>, vector<1x128x128xbf16>
    %469 = vector.shape_cast %468 : vector<1x128x128xbf16> to vector<128x128xbf16>
    %470 = arith.truncf %464 : vector<8x128xf32> to vector<8x128xbf16>
    %cst_231 = arith.constant dense<0.000000e+00> : vector<8x128xf32>
    %471 = tpu.matmul %470, %469, %cst_231 {dimension_numbers = #tpu.dot_dimension_numbers<[1], [0], [0], [1], [0, 0, 1, 1], [], []>} : vector<8x128xbf16>, vector<128x128xbf16>, vector<8x128xf32> -> vector<8x128xf32>
    %c2_i32_232 = arith.constant 2 : i32
    %472 = arith.muli %c2_i32_232, %c3_i32_214 : i32
    %c1_i32_233 = arith.constant 1 : i32
    %473 = arith.addi %472, %c1_i32_233 : i32
    %474 = arith.index_cast %473 : i32 to index
    %c0_234 = arith.constant 0 : index
    %c0_235 = arith.constant 0 : index
    %475 = vector.load %arg10[%474, %c0_234, %c0_235] : memref<9x1x128xf32, #tpu.memory_space<vmem>>, vector<1x1x128xf32>
    %476 = vector.shape_cast %475 : vector<1x1x128xf32> to vector<1x128xf32>
    %477 = vector.broadcast %476 : vector<1x128xf32> to vector<8x128xf32>
    %478 = arith.addf %471, %477 : vector<8x128xf32>
    %c4_i32_236 = arith.constant 4 : i32
    %c8_237 = arith.constant 8 : index
    %c0_238 = arith.constant 0 : index
    %c0_239 = arith.constant 0 : index
    %479 = vector.load %arg19[%c8_237, %c0_238, %c0_239] : memref<9x128x128xbf16, #tpu.memory_space<vmem>>, vector<1x128x128xbf16>
    %480 = vector.shape_cast %479 : vector<1x128x128xbf16> to vector<128x128xbf16>
    %481 = arith.truncf %478 : vector<8x128xf32> to vector<8x128xbf16>
    %cst_240 = arith.constant dense<0.000000e+00> : vector<8x128xf32>
    %482 = tpu.matmul %481, %480, %cst_240 {dimension_numbers = #tpu.dot_dimension_numbers<[1], [0], [0], [1], [0, 0, 1, 1], [], []>} : vector<8x128xbf16>, vector<128x128xbf16>, vector<8x128xf32> -> vector<8x128xf32>
    %c8_241 = arith.constant 8 : index
    %c0_242 = arith.constant 0 : index
    %c0_243 = arith.constant 0 : index
    %483 = vector.load %arg10[%c8_241, %c0_242, %c0_243] : memref<9x1x128xf32, #tpu.memory_space<vmem>>, vector<1x1x128xf32>
    %484 = vector.shape_cast %483 : vector<1x1x128xf32> to vector<1x128xf32>
    %485 = vector.broadcast %484 : vector<1x128xf32> to vector<8x128xf32>
    %486 = arith.addf %482, %485 : vector<8x128xf32>
    %c0_244 = arith.constant 0 : index
    %c0_245 = arith.constant 0 : index
    %487 = vector.load %arg16[%c0_244, %c0_245] : memref<8x128xf32, #tpu.memory_space<vmem>>, vector<8x128xf32>
    tpu.vector_store %arg16[%c0_244, %c0_245], %486 {strides = array<i32>} : memref<8x128xf32, #tpu.memory_space<vmem>>, vector<8x128xf32>,
    return
  }
}

</mosaic_0001>

<bundles_post_ra>
// kernel: numerical_net_forward.1
= control target key start
LH: loop header
LB: loop body
LE: loop exit
PB: predicated region body
PF: predicated region fallthrough
CT: control target
= control target key end

     0   :  { %s5365_s0 = inlined_call_operand.vmem [shape: f32[8,1], index: 0, kind: input, shape index: {}]   ;;  %s5366_s1 = inlined_call_operand.vmem [shape: f32[8,1], index: 1, kind: input, shape index: {}]   ;;  %s5367_s2 = inlined_call_operand.hbm [shape: f32[1,128], index: 2, kind: input, shape index: {}]   ;;  %s5368_s3 = inlined_call_operand.hbm [shape: f32[1,128], index: 3, kind: input, shape index: {}]   ;;  %s5369_s4 = inlined_call_operand.hbm [shape: f32[1,128], index: 4, kind: input, shape index: {}]   ;;  %s5370_s5 = inlined_call_operand.hbm [shape: f32[1,128], index: 5, kind: input, shape index: {}]   ;;  %s5371_s6 = inlined_call_operand.hbm [shape: bf16[9,256,256], index: 6, kind: input, shape index: {}]   ;;  %s5372_s7 = inlined_call_operand.hbm [shape: f32[9,1,256], index: 7, kind: input, shape index: {}]   ;;  %s5373_s8 = inlined_call_operand.hbm [shape: f32[2,1,256], index: 8, kind: input, shape index: {}]   ;;  %s5374_s9 = inlined_call_operand.hbm [shape: f32[1,128], index: 9, kind: input, shape index: {}]   ;;  %s5375_s10 = inlined_call_operand.hbm [shape: f32[9,1,128], index: 10, kind: input, shape index: {}]   ;;  %s5376_s11 = inlined_call_operand.hbm [shape: bf16[2,256,256], index: 11, kind: input, shape index: {}]   ;;  %s5377_s12 = inlined_call_operand.hbm [shape: bf16[256,128], index: 12, kind: input, shape index: {}]   ;;  %s5378_s13 = inlined_call_operand.hbm [shape: bf16[9,128,128], index: 13, kind: input, shape index: {}]   ;;  %s5379_s14 = inlined_call_operand.hbm [shape: f32[8,128], index: 14, kind: output, shape index: {0}]   ;;  %s5380_s15 = inlined_call_operand.hbm [shape: f32[8,128], index: 15, kind: output, shape index: {1}]   ;;  %s5381_s16 = inlined_call_operand.hbm [shape: f32[8,128], index: 16, kind: output, shape index: {2}]  }
   0x1   :  { %5382 = sst [smem:[#allocation43_spill]] %s5365_s0 }
   0x2   :  { %22 = vsyncpa [#allocation7], 0 }
   0x3   :  { %23 = vsyncpa [#allocation10], 0 }
   0x4   :  { %24 = vsyncpa [#allocation13], 0 }
   0x5   :  { %25 = vsyncpa [#allocation16], 0 }
   0x6   :  { %26 = vsyncpa [#allocation19], 0 }
   0x7   :  { %27 = vsyncpa [#allocation8], 0 }
   0x8   :  { %28 = vsyncpa [#allocation23], 0  ;;  %s4890_s21 = smov [#allocation9]   ;;  %s4891_s23 = smov [#allocation12]  }
   0x9   :  { %s49_s22 = sshll.u32 %s4890_s21, 4  ;;  %s69_s24 = sshll.u32 %s4891_s23, 4  ;;  %s50_s22 = int_to_ptr.vmem [resolvable:$true] %s49_s22  ;;  %s70_s24 = int_to_ptr.vmem [resolvable:$true] %s69_s24 }
   0xa   :  { %s4562_s27 = scalar_lea.hbm %s5368_s3, 16 }
   0xb   :  { %p4563_p0 = scmp.ne.s32.totalorder %s5368_s3, %s4562_s27  ;;  %p4566_p1 = scmp.lt.u32.totalorder %s4562_s27, %s5368_s3 }
   0xd   :  { %p4568_p2 = pnand %p4566_p1, %p4563_p0 }
   0xf   :  { %4571 = shalt.err (!%p4568_p2)
}
  0x10   :  { %s4572_s17 = scalar_lea.vmem %s50_s22, 16  ;;  %s4576_s18 = scalar_lea.vmem %s50_s22, 32 }
  0x11   :  { %p4573_p3 = scmp.ne.s32.totalorder %s50_s22, %s4572_s17  ;;  %p4577_p4 = scmp.lt.s32.totalorder %s50_s22, %s50_s22 }
  0x12   :  { %p4578_p5 = scmp.lt.s32.totalorder %s4576_s18, %s4572_s17 }
  0x14   :  { %p4579_p6 = por %p4578_p5, %p4577_p4 }
  0x16   :  { %p4580_p7 = pnand %p4579_p6, %p4573_p3 }
  0x18   :  { %4583 = shalt.err (!%p4580_p7)
}
  0x19   :  { %52 = dma.hbm_to_vmem [thread:$0]  %s5368_s3, 16, %s50_s22, [#allocation10]  }
  0x1a   :  { %s4584_s25 = scalar_lea.hbm %s5370_s5, 16 }
  0x1b   :  { %p4585_p8 = scmp.ne.s32.totalorder %s5370_s5, %s4584_s25  ;;  %p4588_p9 = scmp.lt.u32.totalorder %s4584_s25, %s5370_s5 }
  0x1d   :  { %p4590_p10 = pnand %p4588_p9, %p4585_p8 }
  0x1f   :  { %4593 = shalt.err (!%p4590_p10)
}
  0x20   :  { %s4594_s30 = scalar_lea.vmem %s70_s24, 16  ;;  %s4598_s0 = scalar_lea.vmem %s70_s24, 32 }
  0x21   :  { %p4595_p11 = scmp.ne.s32.totalorder %s70_s24, %s4594_s30  ;;  %p4599_p12 = scmp.lt.s32.totalorder %s70_s24, %s70_s24 }
  0x22   :  { %p4600_p13 = scmp.lt.s32.totalorder %s4598_s0, %s4594_s30 }
  0x24   :  { %p4601_p0 = por %p4600_p13, %p4599_p12 }
  0x26   :  { %p4602_p1 = pnand %p4601_p0, %p4595_p11 }
  0x28   :  { %4605 = shalt.err (!%p4602_p1)
}
  0x29   :  { %72 = dma.hbm_to_vmem [thread:$0]  %s5370_s5, 16, %s70_s24, [#allocation13]  }
  0x2a   :  { %s4892_s17 = smov [#allocation15]   ;;  %s4606_s21 = scalar_lea.hbm %s5372_s7, 288 }
  0x2b   :  { %s90_s18 = sshll.u32 %s4892_s17, 4  ;;  %p4607_p2 = scmp.ne.s32.totalorder %s5372_s7, %s4606_s21  ;;  %s91_s18 = int_to_ptr.vmem [resolvable:$true] %s90_s18 }
  0x2c   :  { %p4610_p3 = scmp.lt.u32.totalorder %s4606_s21, %s5372_s7 }
  0x2e   :  { %p4612_p4 = pnand %p4610_p3, %p4607_p2 }
  0x30   :  { %4615 = shalt.err (!%p4612_p4)
}
  0x31   :  { %s4616_s28 = scalar_lea.vmem %s91_s18, 288  ;;  %p4621_p6 = scmp.lt.s32.totalorder %s91_s18, %s91_s18 }
  0x32   :  { %p4617_p5 = scmp.ne.s32.totalorder %s91_s18, %s4616_s28  ;;  %p4622_p7 = scmp.lt.s32.totalorder %s4616_s28, %s4616_s28 }
  0x34   :  { %p4623_p8 = por %p4622_p7, %p4621_p6 }
  0x36   :  { %p4624_p9 = pnand %p4623_p8, %p4617_p5 }
  0x38   :  { %4627 = shalt.err (!%p4624_p9)
}
  0x39   :  { %s4893_s5 = smov 32   ;;  %s4894_s24 = smov 2  }
  0x3a   :  { %96 = dma.hbm_to_vmem [thread:$0]  %s5372_s7, 288, %s91_s18, [#allocation16], %s4893_s5, %s4893_s5, %s4894_s24  }
  0x3b   :  { %s4895_s0 = smov [#allocation18]   ;;  %s4896_s22 = smov [#allocation6]  }
  0x3c   :  { %s115_s3 = sshll.u32 %s4895_s0, 4  ;;  %s39_s17 = sshll.u32 %s4896_s22, 4  ;;  %s116_s3 = int_to_ptr.vmem [resolvable:$true] %s115_s3  ;;  %s40_s17 = int_to_ptr.vmem [resolvable:$true] %s39_s17 }
  0x3d   :  { %s4628_s21 = scalar_lea.hbm %s5374_s9, 16 }
  0x3e   :  { %p4629_p10 = scmp.ne.s32.totalorder %s5374_s9, %s4628_s21  ;;  %p4632_p11 = scmp.lt.u32.totalorder %s4628_s21, %s5374_s9 }
  0x40   :  { %p4634_p12 = pnand %p4632_p11, %p4629_p10 }
  0x42   :  { %4637 = shalt.err (!%p4634_p12)
}
  0x43   :  { %s4638_s7 = scalar_lea.vmem %s116_s3, 16  ;;  %s4642_s18 = scalar_lea.vmem %s116_s3, 32 }
  0x44   :  { %p4639_p13 = scmp.ne.s32.totalorder %s116_s3, %s4638_s7  ;;  %p4643_p0 = scmp.lt.s32.totalorder %s116_s3, %s116_s3 }
  0x45   :  { %p4644_p1 = scmp.lt.s32.totalorder %s4642_s18, %s4638_s7 }
  0x47   :  { %p4645_p2 = por %p4644_p1, %p4643_p0 }
  0x49   :  { %p4646_p3 = pnand %p4645_p2, %p4639_p13 }
  0x4b   :  { %4649 = shalt.err (!%p4646_p3)
}
  0x4c   :  { %118 = dma.hbm_to_vmem [thread:$0]  %s5374_s9, 16, %s116_s3, [#allocation19]  }
  0x4d   :  { %s4650_s22 = scalar_lea.hbm %s5367_s2, 16 }
  0x4e   :  { %p4651_p4 = scmp.ne.s32.totalorder %s5367_s2, %s4650_s22  ;;  %p4654_p5 = scmp.lt.u32.totalorder %s4650_s22, %s5367_s2 }
  0x50   :  { %p4656_p6 = pnand %p4654_p5, %p4651_p4 }
  0x52   :  { %4659 = shalt.err (!%p4656_p6)
}
  0x53   :  { %s4660_s25 = scalar_lea.vmem %s40_s17, 16  ;;  %s4664_s26 = scalar_lea.vmem %s40_s17, 32 }
  0x54   :  { %p4661_p7 = scmp.ne.s32.totalorder %s40_s17, %s4660_s25  ;;  %p4665_p8 = scmp.lt.s32.totalorder %s40_s17, %s40_s17 }
  0x55   :  { %p4666_p9 = scmp.lt.s32.totalorder %s4664_s26, %s4660_s25 }
  0x57   :  { %p4667_p10 = por %p4666_p9, %p4665_p8 }
  0x59   :  { %p4668_p11 = pnand %p4667_p10, %p4661_p7 }
  0x5b   :  { %4671 = shalt.err (!%p4668_p11)
}
  0x5c   :  { %42 = dma.hbm_to_vmem [thread:$0]  %s5367_s2, 16, %s40_s17, [#allocation7]  }
  0x5d   :  { %s4897_s27 = smov [#allocation11]   ;;  %s4898_s18 = smov [#allocation14]  }
  0x5e   :  { %s59_s7 = sshll.u32 %s4897_s27, 4  ;;  %s78_s28 = sshll.u32 %s4898_s18, 4  ;;  %s60_s7 = int_to_ptr.vmem [resolvable:$true] %s59_s7  ;;  %s79_s28 = int_to_ptr.vmem [resolvable:$true] %s78_s28 }
  0x5f   :  { %s4672_s0 = scalar_lea.hbm %s5369_s4, 16 }
  0x60   :  { %p4673_p12 = scmp.ne.s32.totalorder %s5369_s4, %s4672_s0  ;;  %p4676_p13 = scmp.lt.u32.totalorder %s4672_s0, %s5369_s4 }
  0x62   :  { %p4678_p0 = pnand %p4676_p13, %p4673_p12 }
  0x64   :  { %4681 = shalt.err (!%p4678_p0)
}
  0x65   :  { %s4682_s2 = scalar_lea.vmem %s60_s7, 16  ;;  %s4686_s17 = scalar_lea.vmem %s60_s7, 32 }
  0x66   :  { %p4683_p1 = scmp.ne.s32.totalorder %s60_s7, %s4682_s2  ;;  %p4687_p2 = scmp.lt.s32.totalorder %s60_s7, %s60_s7 }
  0x67   :  { %p4688_p3 = scmp.lt.s32.totalorder %s4686_s17, %s4682_s2 }
  0x69   :  { %p4689_p4 = por %p4688_p3, %p4687_p2 }
  0x6b   :  { %p4690_p5 = pnand %p4689_p4, %p4683_p1 }
  0x6d   :  { %4693 = shalt.err (!%p4690_p5)
}
  0x6e   :  { %62 = dma.hbm_to_vmem [thread:$0]  %s5369_s4, 16, %s60_s7, [#allocation10]  }
  0x6f   :  { %s4694_s3 = scalar_lea.hbm %s5371_s6, 36864 }
  0x70   :  { %p4695_p6 = scmp.ne.s32.totalorder %s5371_s6, %s4694_s3  ;;  %p4698_p7 = scmp.lt.u32.totalorder %s4694_s3, %s5371_s6 }
  0x72   :  { %p4700_p8 = pnand %p4698_p7, %p4695_p6 }
  0x74   :  { %4703 = shalt.err (!%p4700_p8)
}
  0x75   :  { %s4704_s0 = scalar_lea.vmem %s79_s28, 36864  ;;  %p4709_p10 = scmp.lt.s32.totalorder %s79_s28, %s79_s28 }
  0x76   :  { %p4705_p9 = scmp.ne.s32.totalorder %s79_s28, %s4704_s0  ;;  %p4710_p11 = scmp.lt.s32.totalorder %s4704_s0, %s4704_s0 }
  0x78   :  { %p4711_p12 = por %p4710_p11, %p4709_p10 }
  0x7a   :  { %p4712_p13 = pnand %p4711_p12, %p4705_p9 }
  0x7c   :  { %4715 = shalt.err (!%p4712_p13)
}
  0x7d   :  { %s4899_s4 = smov 128   ;;  %s4900_s7 = smov 8  }
  0x7e   :  { %84 = dma.hbm_to_vmem [thread:$0]  %s5371_s6, 36864, %s79_s28, [#allocation13], %s4899_s4, %s4899_s4, %s4900_s7  }
  0x7f   :  { %s4901_s20 = smov [#allocation17]   ;;  %s4902_s2 = smov [#allocation20]  }
  0x80   :  { %s102_s21 = sshll.u32 %s4901_s20, 4  ;;  %s124_s17 = sshll.u32 %s4902_s2, 4  ;;  %s103_s21 = int_to_ptr.vmem [resolvable:$true] %s102_s21  ;;  %s125_s17 = int_to_ptr.vmem [resolvable:$true] %s124_s17 }
  0x81   :  { %s4716_s26 = scalar_lea.hbm %s5373_s8, 64 }
  0x82   :  { %p4717_p0 = scmp.ne.s32.totalorder %s5373_s8, %s4716_s26  ;;  %p4720_p1 = scmp.lt.u32.totalorder %s4716_s26, %s5373_s8 }
  0x84   :  { %p4722_p2 = pnand %p4720_p1, %p4717_p0 }
  0x86   :  { %4725 = shalt.err (!%p4722_p2)
}
  0x87   :  { %s4726_s6 = scalar_lea.vmem %s103_s21, 64  ;;  %p4731_p4 = scmp.lt.s32.totalorder %s103_s21, %s103_s21 }
  0x88   :  { %p4727_p3 = scmp.ne.s32.totalorder %s103_s21, %s4726_s6  ;;  %p4732_p5 = scmp.lt.s32.totalorder %s4726_s6, %s4726_s6 }
  0x8a   :  { %p4733_p6 = por %p4732_p5, %p4731_p4 }
  0x8c   :  { %p4734_p7 = pnand %p4733_p6, %p4727_p3 }
  0x8e   :  { %4737 = shalt.err (!%p4734_p7)
}
  0x8f   :  { %108 = dma.hbm_to_vmem [thread:$0]  %s5373_s8, 64, %s103_s21, [#allocation16], %s4893_s5, %s4893_s5, %s4894_s24  }
  0x90   :  { %s4738_s7 = scalar_lea.hbm %s5375_s10, 144 }
  0x91   :  { %p4739_p8 = scmp.ne.s32.totalorder %s5375_s10, %s4738_s7  ;;  %p4742_p9 = scmp.lt.u32.totalorder %s4738_s7, %s5375_s10 }
  0x93   :  { %p4744_p10 = pnand %p4742_p9, %p4739_p8 }
  0x95   :  { %4747 = shalt.err (!%p4744_p10)
}
  0x96   :  { %s4748_s23 = scalar_lea.vmem %s125_s17, 144  ;;  %s4752_s25 = scalar_lea.vmem %s125_s17, 160 }
  0x97   :  { %p4749_p11 = scmp.ne.s32.totalorder %s125_s17, %s4748_s23  ;;  %p4753_p12 = scmp.lt.s32.totalorder %s125_s17, %s125_s17 }
  0x98   :  { %p4754_p13 = scmp.lt.s32.totalorder %s4752_s25, %s4748_s23 }
  0x9a   :  { %p4755_p0 = por %p4754_p13, %p4753_p12 }
  0x9c   :  { %p4756_p1 = pnand %p4755_p0, %p4749_p11 }
  0x9e   :  { %4759 = shalt.err (!%p4756_p1)
}
  0x9f   :  { %s4903_s8 = smov 16   ;;  %s4904_s5 = smov 1  }
  0xa0   :  { %130 = dma.hbm_to_vmem [thread:$0]  %s5375_s10, 144, %s125_s17, [#allocation19], %s4903_s8, %s4903_s8, %s4904_s5  }
  0xa1   :  { %4870 = dma.done.wait [#allocation7], 16  }
  0xa2   :  { %4871 = vsyncadd [#allocation7], 4294967280 }
  0xa3   :  { %4872 = dma.done.wait [#allocation10], 32  }
  0xa4   :  { %4873 = vsyncadd [#allocation10], 4294967264 }
  0xa5   :  { %4874 = dma.done.wait [#allocation13], 36880  }
  0xa6   :  { %4875 = vsyncadd [#allocation13], 4294930416 }
  0xa7   :  { %4876 = dma.done.wait [#allocation16], 352  }
  0xa8   :  { %4877 = vsyncadd [#allocation16], 4294966944 }
  0xa9   :  { %4878 = dma.done.wait [#allocation19], 160  }
  0xaa   :  { %4879 = vsyncadd [#allocation19], 4294967136  ;;  %s163_s9 = sld [smem:[#allocation0]]   ;;  %s4905_s3 = smov 256   ;;  %v4906_v0 = vmov 0   ;;  %v298_v47 = vlaneseq }
  0xab   :  { %175 = sst [smem:[#allocation26]] %s4905_s3  ;;  %4105 = vset.pattern.permute.xlu0 %v4906_v0  ;;  %s4907_s27 = smov 64  }
  0xac   :  { %177 = sst [smem:[#allocation26 + $0x1]] %s4905_s3  ;;  %s4908_s10 = smov [#allocation2]   ;;  %v299_v48 = vshrl.u32 %v298_v47, 7 }
  0xad   :  { %179 = sst [smem:[#allocation26 + $0x2]] %s4894_s24  ;;  %s171_s17 = sshll.u32 %s4908_s10, 4  ;;  %s172_s17 = int_to_ptr.vmem [resolvable:$true] %s171_s17 }
  0xae   :  { %181 = sst [smem:[#allocation26 + $0x3]] %s4907_s27  ;;  %s4909_s28 = smov 4   ;;  %v5133_v49 = vsub.s32 1, %v299_v48  ;;  %v5135_v51 = vsub.s32 0, %v299_v48 }
  0xaf   :  { %183 = sst [smem:[#allocation26 + $0x4]] %s4899_s4  ;;  %s4910_s29 = smov [#allocation5]  }
  0xb0   :  { %185 = sst [smem:[#allocation26 + $0x5]] %s4894_s24  ;;  %s3486_s18 = sshll.u32 %s163_s9, 26 }
  0xb1   :  { %187 = sst [smem:[#allocation26 + $0x6]] %s4899_s4  ;;  %s3487_s6 = sadd.s32 134217728, %s3486_s18 }
  0xb2   :  { %189 = sst [smem:[#allocation26 + $0x7]] %s4907_s27  ;;  %s4911_s30 = smov [#allocation25]  }
  0xb3   :  { %191 = sst [smem:[#allocation26 + $0x8]] %s4909_s28  ;;  %s4913_s4 = smov [#allocation4]  }
  0xb4   :  { %193 = dma.general %s5376_s11, 8192, %s172_s17, %s4910_s29, %s4911_s30, [#allocation26], %s3487_s6, 0  }
  0xb5   :  { %v240_v1 = vld [vmem:[%s5366_s1] sm:$0xff]  ;;  %s5383_s24 = sld [smem:[#allocation43_spill]]  ;;  %v4106_v3 = vld [vmem:[#allocation14 + $0x4] ss:$8 sps:$4 sm:$0xff]   ;;  %v4108_v4 = vld [vmem:[#allocation14] ss:$8 sps:$4 sm:$0xff]  }
  0xb6   :  { %244 = vperm.xlu0 %4105, %v240_v1   ;;  %v4109_v5 = vld [vmem:[#allocation14 + $0x14] ss:$8 sps:$4 sm:$0xff]   ;;  %468 = vmatprep.subr.bf16.mxu0 %v4106_v3  ;;  %v4111_v6 = vld [vmem:[#allocation14 + $0x10] ss:$8 sps:$4 sm:$0xff]   ;;  %v4112_v7 = vld [vmem:[#allocation14 + $0x24] ss:$8 sps:$4 sm:$0xff]  }
  0xb7   :  { %469 = vmatpush1.bf16.msra.mxu0 %v4108_v4  ;;  %v4114_v8 = vld [vmem:[#allocation14 + $0x20] ss:$8 sps:$4 sm:$0xff]   ;;  %v4115_v9 = vld [vmem:[#allocation14 + $0x34] ss:$8 sps:$4 sm:$0xff]   ;;  %v4117_v10 = vld [vmem:[#allocation14 + $0x30] ss:$8 sps:$4 sm:$0xff]  }
  0xb8   :  { %470 = vmatprep.subr.bf16.mxu0 %v4109_v5  ;;  %v4118_v11 = vld [vmem:[#allocation14 + $0x44] ss:$8 sps:$4 sm:$0xff]   ;;  %v4120_v12 = vld [vmem:[#allocation14 + $0x40] ss:$8 sps:$4 sm:$0xff]   ;;  %v4121_v13 = vld [vmem:[#allocation14 + $0x54] ss:$8 sps:$4 sm:$0xff]  }
  0xb9   :  { %v4123_v14 = vld [vmem:[#allocation14 + $0x50] ss:$8 sps:$4 sm:$0xff]   ;;  %v4124_v15 = vld [vmem:[#allocation14 + $0x64] ss:$8 sps:$4 sm:$0xff]   ;;  %v4126_v16 = vld [vmem:[#allocation14 + $0x60] ss:$8 sps:$4 sm:$0xff]  }
  0xba   :  { %v4127_v17 = vld [vmem:[#allocation14 + $0x74] ss:$8 sps:$4 sm:$0xff]   ;;  %v4129_v18 = vld [vmem:[#allocation14 + $0x70] ss:$8 sps:$4 sm:$0xff]   ;;  %v4130_v19 = vld [vmem:[#allocation14 + $0x84] ss:$8 sps:$4 sm:$0xff]  }
  0xbb   :  { %v218_v2 = vld [vmem:[%s5383_s24] sm:$0xff]  ;;  %471 = vmatpush1.bf16.msra.mxu0 %v4111_v6  ;;  %v4132_v20 = vld [vmem:[#allocation14 + $0x80] ss:$8 sps:$4 sm:$0xff]   ;;  %v4136_v23 = vld [vmem:[#allocation14 + $0xa4] ss:$8 sps:$4 sm:$0xff]   ;;  %s4912_s1 = smov [#allocation3]  }
  0xbc   :  { %222 = vperm.xlu0 %4105, %v218_v2   ;;  %472 = vmatprep.subr.bf16.mxu0 %v4112_v7  ;;  %v4133_v21 = vld [vmem:[#allocation14 + $0x94] ss:$8 sps:$4 sm:$0xff]   ;;  %v4135_v22 = vld [vmem:[#allocation14 + $0x90] ss:$8 sps:$4 sm:$0xff]   ;;  %v4138_v24 = vld [vmem:[#allocation14 + $0xa0] ss:$8 sps:$4 sm:$0xff]  }
  0xbd   :  { %v4139_v25 = vld [vmem:[#allocation14 + $0xb4] ss:$8 sps:$4 sm:$0xff]   ;;  %v4141_v26 = vld [vmem:[#allocation14 + $0xb0] ss:$8 sps:$4 sm:$0xff]   ;;  %v4142_v27 = vld [vmem:[#allocation14 + $0xc4] ss:$8 sps:$4 sm:$0xff]  }
  0xbe   :  { %v4144_v28 = vld [vmem:[#allocation14 + $0xc0] ss:$8 sps:$4 sm:$0xff]   ;;  %v4145_v29 = vld [vmem:[#allocation14 + $0xd4] ss:$8 sps:$4 sm:$0xff]   ;;  %v4147_v30 = vld [vmem:[#allocation14 + $0xd0] ss:$8 sps:$4 sm:$0xff]  }
  0xbf   :  { %473 = vmatpush1.bf16.msra.mxu0 %v4114_v8  ;;  %v4148_v31 = vld [vmem:[#allocation14 + $0xe4] ss:$8 sps:$4 sm:$0xff]   ;;  %v4150_v32 = vld [vmem:[#allocation14 + $0xe0] ss:$8 sps:$4 sm:$0xff]   ;;  %v4151_v33 = vld [vmem:[#allocation14 + $0xf4] ss:$8 sps:$4 sm:$0xff]  }
  0xc0   :  { %474 = vmatprep.subr.bf16.mxu0 %v4115_v9  ;;  %v4153_v34 = vld [vmem:[#allocation14 + $0xf0] ss:$8 sps:$4 sm:$0xff]   ;;  %v3490_v35 = vld [vmem:[#allocation11] ss:$0 sm:$0xff]  ;;  %v3491_v37 = vld [vmem:[#allocation12] ss:$0 sm:$0xff] }
  0xc1   :  { %v3488_v39 = vld [vmem:[#allocation6] ss:$0 sm:$0xff]  ;;  %v3489_v41 = vld [vmem:[#allocation9] ss:$0 sm:$0xff]  ;;  %v296_v50 = vld [vmem:[#allocation15] sm:$0x3] }
  0xc2   :  { %v305_v52 = vrot.slane %v296_v50, %v5133_v49  ;;  %v301_v55 = vrot.slane %v296_v50, %v5135_v51  ;;  %v4154_v60 = vld [vmem:[#allocation14 + $0x104] ss:$8 sps:$4 sm:$0xff]   ;;  %v4156_v61 = vld [vmem:[#allocation14 + $0x100] ss:$8 sps:$4 sm:$0xff]   ;;  %v4157_v62 = vld [vmem:[#allocation14 + $0x114] ss:$8 sps:$4 sm:$0xff]  }
  0xc3   :  { %475 = vmatpush1.bf16.msra.mxu0 %v4117_v10  ;;  %740 = vmatprep.subr.bf16.mxu1 %v4154_v60  ;;  %v4159_v63 = vld [vmem:[#allocation14 + $0x110] ss:$8 sps:$4 sm:$0xff]   ;;  %v4160_v0 = vld [vmem:[#allocation14 + $0x124] ss:$8 sps:$4 sm:$0xff]   ;;  %v4162_v1 = vld [vmem:[#allocation14 + $0x120] ss:$8 sps:$4 sm:$0xff]  }
  0xc4   :  { %476 = vmatprep.subr.bf16.mxu0 %v4118_v11  ;;  %741 = vmatpush1.bf16.msra.mxu1 %v4156_v61  ;;  %v4163_v2 = vld [vmem:[#allocation14 + $0x134] ss:$8 sps:$4 sm:$0xff]   ;;  %v4165_v3 = vld [vmem:[#allocation14 + $0x130] ss:$8 sps:$4 sm:$0xff]   ;;  %v4166_v4 = vld [vmem:[#allocation14 + $0x144] ss:$8 sps:$4 sm:$0xff]  }
  0xc5   :  { %742 = vmatprep.subr.bf16.mxu1 %v4157_v62  ;;  %v4168_v5 = vld [vmem:[#allocation14 + $0x140] ss:$8 sps:$4 sm:$0xff]   ;;  %v4169_v6 = vld [vmem:[#allocation14 + $0x154] ss:$8 sps:$4 sm:$0xff]   ;;  %v4171_v7 = vld [vmem:[#allocation14 + $0x150] ss:$8 sps:$4 sm:$0xff]  }
  0xc6   :  { %v4172_v8 = vld [vmem:[#allocation14 + $0x164] ss:$8 sps:$4 sm:$0xff]   ;;  %v4174_v9 = vld [vmem:[#allocation14 + $0x160] ss:$8 sps:$4 sm:$0xff]   ;;  %v4175_v10 = vld [vmem:[#allocation14 + $0x174] ss:$8 sps:$4 sm:$0xff]  }
  0xc7   :  { %477 = vmatpush1.bf16.msra.mxu0 %v4120_v12  ;;  %v4177_v11 = vld [vmem:[#allocation14 + $0x170] ss:$8 sps:$4 sm:$0xff]   ;;  %v4178_v12 = vld [vmem:[#allocation14 + $0x184] ss:$8 sps:$4 sm:$0xff]   ;;  %v4220_v50 = vld [vmem:[#allocation14 + $0x260] ss:$8 sps:$4 sm:$0xff]  }
  0xc8   :  { %478 = vmatprep.subr.bf16.mxu0 %v4121_v13  ;;  %743 = vmatpush1.bf16.msra.mxu1 %v4159_v63  ;;  %v4180_v13 = vld [vmem:[#allocation14 + $0x180] ss:$8 sps:$4 sm:$0xff]   ;;  %v4217_v47 = vld [vmem:[#allocation14 + $0x250] ss:$8 sps:$4 sm:$0xff]   ;;  %v4222_v48 = vld [vmem:[#allocation14 + $0x264] ss:$8 sps:$4 sm:$0xff]  }
  0xc9   :  { %744 = vmatprep.subr.bf16.mxu1 %v4160_v0  ;;  %v4237_v60 = vld [vmem:[#allocation14 + $0x2b4] ss:$8 sps:$4 sm:$0xff]   ;;  %v4235_v61 = vld [vmem:[#allocation14 + $0x2b0] ss:$8 sps:$4 sm:$0xff]   ;;  %v4240_v62 = vld [vmem:[#allocation14 + $0x2c4] ss:$8 sps:$4 sm:$0xff]  }
  0xca   :  { %v4238_v63 = vld [vmem:[#allocation14 + $0x2c0] ss:$8 sps:$4 sm:$0xff]   ;;  %v4243_v0 = vld [vmem:[#allocation14 + $0x2d4] ss:$8 sps:$4 sm:$0xff]   ;;  %s202_s11 = sshll.u32 %s4912_s1, 4  ;;  %s214_s23 = sshll.u32 %s4913_s4, 4  ;;  %s203_s11 = int_to_ptr.vmem [resolvable:$true] %s202_s11  ;;  %s215_s23 = int_to_ptr.vmem [resolvable:$true] %s214_s23 }
  0xcb   :  { %479 = vmatpush1.bf16.msra.mxu0 %v4123_v14  ;;  %v4181_v14 = vld [vmem:[#allocation14 + $0x194] ss:$8 sps:$4 sm:$0xff]   ;;  %s4760_s5 = scalar_lea.hbm %s5377_s12, 2048 }
  0xcc   :  { %480 = vmatprep.subr.bf16.mxu0 %v4124_v15  ;;  %745 = vmatpush1.bf16.msra.mxu1 %v4162_v1  ;;  %v4183_v15 = vld [vmem:[#allocation14 + $0x190] ss:$8 sps:$4 sm:$0xff]   ;;  %p4761_p2 = scmp.ne.s32.totalorder %s5377_s12, %s4760_s5  ;;  %p4764_p3 = scmp.lt.u32.totalorder %s4760_s5, %s5377_s12 }
  0xcd   :  { %746 = vmatprep.subr.bf16.mxu1 %v4163_v2  ;;  %v4241_v1 = vld [vmem:[#allocation14 + $0x2d0] ss:$8 sps:$4 sm:$0xff]   ;;  %v4246_v2 = vld [vmem:[#allocation14 + $0x2e4] ss:$8 sps:$4 sm:$0xff]  }
  0xce   :  { %p4766_p4 = pnand %p4764_p3, %p4761_p2 }
  0xcf   :  { %481 = vmatpush1.bf16.msra.mxu0 %v4126_v16  ;;  %v4184_v16 = vld [vmem:[#allocation14 + $0x1a4] ss:$8 sps:$4 sm:$0xff]  }
  0xd0   :  { %482 = vmatprep.subr.bf16.mxu0 %v4127_v17  ;;  %747 = vmatpush1.bf16.msra.mxu1 %v4165_v3  ;;  %v4244_v3 = vld [vmem:[#allocation14 + $0x2e0] ss:$8 sps:$4 sm:$0xff]  }
  0xd1   :  { %748 = vmatprep.subr.bf16.mxu1 %v4166_v4 }
  0xd3   :  { %483 = vmatpush1.bf16.msra.mxu0 %v4129_v18 }
  0xd4   :  { %484 = vmatprep.subr.bf16.mxu0 %v4130_v19  ;;  %749 = vmatpush1.bf16.msra.mxu1 %v4168_v5 }
  0xd5   :  { %750 = vmatprep.subr.bf16.mxu1 %v4169_v6 }
  0xd7   :  { %485 = vmatpush1.bf16.msra.mxu0 %v4132_v20 }
  0xd8   :  { %486 = vmatprep.subr.bf16.mxu0 %v4133_v21  ;;  %751 = vmatpush1.bf16.msra.mxu1 %v4171_v7 }
  0xd9   :  { %752 = vmatprep.subr.bf16.mxu1 %v4172_v8 }
  0xdb   :  { %487 = vmatpush1.bf16.msra.mxu0 %v4135_v22 }
  0xdc   :  { %488 = vmatprep.subr.bf16.mxu0 %v4136_v23  ;;  %753 = vmatpush1.bf16.msra.mxu1 %v4174_v9 }
  0xdd   :  { %754 = vmatprep.subr.bf16.mxu1 %v4175_v10 }
  0xdf   :  { %489 = vmatpush1.bf16.msra.mxu0 %v4138_v24 }
  0xe0   :  { %490 = vmatprep.subr.bf16.mxu0 %v4139_v25  ;;  %755 = vmatpush1.bf16.msra.mxu1 %v4177_v11  ;;  %v4186_v25 = vld [vmem:[#allocation14 + $0x1a0] ss:$8 sps:$4 sm:$0xff]  }
  0xe1   :  { %756 = vmatprep.subr.bf16.mxu1 %v4178_v12 }
  0xe3   :  { %491 = vmatpush1.bf16.msra.mxu0 %v4141_v26  ;;  %v4187_v26 = vld [vmem:[#allocation14 + $0x1b4] ss:$8 sps:$4 sm:$0xff]  }
  0xe4   :  { %492 = vmatprep.subr.bf16.mxu0 %v4142_v27  ;;  %757 = vmatpush1.bf16.msra.mxu1 %v4180_v13  ;;  %v4189_v27 = vld [vmem:[#allocation14 + $0x1b0] ss:$8 sps:$4 sm:$0xff]  }
  0xe5   :  { %758 = vmatprep.subr.bf16.mxu1 %v4181_v14 }
  0xe7   :  { %493 = vmatpush1.bf16.msra.mxu0 %v4144_v28  ;;  %v4190_v28 = vld [vmem:[#allocation14 + $0x1c4] ss:$8 sps:$4 sm:$0xff]  }
  0xe8   :  { %494 = vmatprep.subr.bf16.mxu0 %v4145_v29  ;;  %759 = vmatpush1.bf16.msra.mxu1 %v4183_v15  ;;  %v4192_v29 = vld [vmem:[#allocation14 + $0x1c0] ss:$8 sps:$4 sm:$0xff]  }
  0xe9   :  { %760 = vmatprep.subr.bf16.mxu1 %v4184_v16  ;;  %v4249_v16 = vld [vmem:[#allocation14 + $0x2f4] ss:$8 sps:$4 sm:$0xff]  }
  0xeb   :  { %495 = vmatpush1.bf16.msra.mxu0 %v4147_v30  ;;  %v4193_v30 = vld [vmem:[#allocation14 + $0x1d4] ss:$8 sps:$4 sm:$0xff]  }
  0xec   :  { %496 = vmatprep.subr.bf16.mxu0 %v4148_v31  ;;  %761 = vmatpush1.bf16.msra.mxu1 %v4186_v25  ;;  %v4195_v31 = vld [vmem:[#allocation14 + $0x1d0] ss:$8 sps:$4 sm:$0xff]  }
  0xed   :  { %762 = vmatprep.subr.bf16.mxu1 %v4187_v26 }
  0xef   :  { %497 = vmatpush1.bf16.msra.mxu0 %v4150_v32  ;;  %v4196_v32 = vld [vmem:[#allocation14 + $0x1e4] ss:$8 sps:$4 sm:$0xff]  }
  0xf0   :  { %498 = vmatprep.subr.bf16.mxu0 %v4151_v33  ;;  %763 = vmatpush1.bf16.msra.mxu1 %v4189_v27  ;;  %v4198_v33 = vld [vmem:[#allocation14 + $0x1e0] ss:$8 sps:$4 sm:$0xff]  }
  0xf1   :  { %764 = vmatprep.subr.bf16.mxu1 %v4190_v28 }
  0xf3   :  { %499 = vmatpush1.bf16.msra.mxu0 %v4153_v34  ;;  %v4199_v34 = vld [vmem:[#allocation14 + $0x1f4] ss:$8 sps:$4 sm:$0xff]  }
  0xf4   :  { %765 = vmatpush1.bf16.msra.mxu1 %v4192_v29 }
  0xf5   :  { %766 = vmatprep.subr.bf16.mxu1 %v4193_v30 }
  0xf8   :  { %767 = vmatpush1.bf16.msra.mxu1 %v4195_v31 }
  0xf9   :  { %768 = vmatprep.subr.bf16.mxu1 %v4196_v32 }
  0xfc   :  { %769 = vmatpush1.bf16.msra.mxu1 %v4198_v33 }
  0xfd   :  { %770 = vmatprep.subr.bf16.mxu1 %v4199_v34 }
 0x135   :  { %v245_v36 = vpop.permute.xlu0 %244 }
 0x136   :  { %v253_v38 = vmul.f32 %v3490_v35, %v245_v36  ;;  %v4201_v35 = vld [vmem:[#allocation14 + $0x1f0] ss:$8 sps:$4 sm:$0xff]   ;;  %v4202_v36 = vld [vmem:[#allocation14 + $0x200] ss:$8 sps:$4 sm:$0xff]  }
 0x137   :  { %771 = vmatpush1.bf16.msra.mxu1 %v4201_v35 }
 0x138   :  { %v261_v40 = vadd.f32 %v3491_v37, %v253_v38  ;;  %v4204_v37 = vld [vmem:[#allocation14 + $0x204] ss:$8 sps:$4 sm:$0xff]   ;;  %v4207_v38 = vld [vmem:[#allocation14 + $0x214] ss:$8 sps:$4 sm:$0xff]  }
 0x139   :  { %989 = vmatprep.subr.bf16.mxu0 %v4204_v37 }
 0x13a   :  { %v295_v44 = vpack.c.bf16 %v261_v40, %v261_v40  ;;  %v4210_v40 = vld [vmem:[#allocation14 + $0x224] ss:$8 sps:$4 sm:$0xff]  }
 0x13b   :  { %v223_v42 = vpop.permute.xlu0 %222 }
 0x13c   :  { %v231_v43 = vmul.f32 %v3488_v39, %v223_v42  ;;  %500 = vmatprep.mubr.bf16.mxu0 %v295_v44  ;;  %v4205_v39 = vld [vmem:[#allocation14 + $0x210] ss:$8 sps:$4 sm:$0xff]   ;;  %v4213_v42 = vld [vmem:[#allocation14 + $0x234] ss:$8 sps:$4 sm:$0xff]   ;;  %v4216_v44 = vld [vmem:[#allocation14 + $0x244] ss:$8 sps:$4 sm:$0xff]  }
 0x13e   :  { %v239_v45 = vadd.f32 %v3489_v41, %v231_v43  ;;  %v4208_v41 = vld [vmem:[#allocation14 + $0x220] ss:$8 sps:$4 sm:$0xff]   ;;  %v4211_v43 = vld [vmem:[#allocation14 + $0x230] ss:$8 sps:$4 sm:$0xff]  }
 0x140   :  { %v294_v46 = vpack.c.bf16 %v239_v45, %v239_v45  ;;  %v4214_v45 = vld [vmem:[#allocation14 + $0x240] ss:$8 sps:$4 sm:$0xff]  }
 0x142   :  { %501 = vmatmul.mubr.bf16.vlgmr.msra.gmra.mrb[0].mxu0 %v294_v46  ;;  %v4219_v46 = vld [vmem:[#allocation14 + $0x254] ss:$8 sps:$4 sm:$0xff]  }
 0x143   :  { %990 = vmatpush1.bf16.msra.mxu0 %v4202_v36 }
 0x144   :  { %991 = vmatprep.subr.bf16.mxu0 %v4207_v38  ;;  %v4250_v38 = vld [vmem:[#allocation14 + $0x300] ss:$8 sps:$4 sm:$0xff]  }
 0x147   :  { %992 = vmatpush1.bf16.msra.mxu0 %v4205_v39  ;;  %v4252_v39 = vld [vmem:[#allocation14 + $0x304] ss:$8 sps:$4 sm:$0xff]  }
 0x148   :  { %993 = vmatprep.subr.bf16.mxu0 %v4210_v40  ;;  %v4255_v40 = vld [vmem:[#allocation14 + $0x314] ss:$8 sps:$4 sm:$0xff]   ;;  %1260 = vmatprep.subr.bf16.mxu1 %v4252_v39  ;;  %v4331_v39 = vld [vmem:[#allocation14 + $0x4b0] ss:$8 sps:$4 sm:$0xff]  }
 0x14b   :  { %994 = vmatpush1.bf16.msra.mxu0 %v4208_v41  ;;  %v4253_v41 = vld [vmem:[#allocation14 + $0x310] ss:$8 sps:$4 sm:$0xff]  }
 0x14c   :  { %995 = vmatprep.subr.bf16.mxu0 %v4213_v42  ;;  %v4258_v42 = vld [vmem:[#allocation14 + $0x324] ss:$8 sps:$4 sm:$0xff]  }
 0x14f   :  { %996 = vmatpush1.bf16.msra.mxu0 %v4211_v43  ;;  %v4256_v43 = vld [vmem:[#allocation14 + $0x320] ss:$8 sps:$4 sm:$0xff]  }
 0x150   :  { %997 = vmatprep.subr.bf16.mxu0 %v4216_v44  ;;  %v4261_v44 = vld [vmem:[#allocation14 + $0x334] ss:$8 sps:$4 sm:$0xff]  }
 0x153   :  { %998 = vmatpush1.bf16.msra.mxu0 %v4214_v45  ;;  %v4259_v45 = vld [vmem:[#allocation14 + $0x330] ss:$8 sps:$4 sm:$0xff]  }
 0x154   :  { %999 = vmatprep.subr.bf16.mxu0 %v4219_v46  ;;  %v4264_v46 = vld [vmem:[#allocation14 + $0x344] ss:$8 sps:$4 sm:$0xff]  }
 0x157   :  { %1000 = vmatpush1.bf16.msra.mxu0 %v4217_v47  ;;  %v4262_v47 = vld [vmem:[#allocation14 + $0x340] ss:$8 sps:$4 sm:$0xff]  }
 0x158   :  { %1001 = vmatprep.subr.bf16.mxu0 %v4222_v48  ;;  %v4267_v48 = vld [vmem:[#allocation14 + $0x354] ss:$8 sps:$4 sm:$0xff]  }
 0x15b   :  { %1002 = vmatpush1.bf16.msra.mxu0 %v4220_v50  ;;  %v4265_v50 = vld [vmem:[#allocation14 + $0x350] ss:$8 sps:$4 sm:$0xff]  }
 0x215   :  { %v502_v53 = vpop.f32.mrb[0].mxu0 }
 0x216   :  { %v504_v54 = vpop.f32.mrb[1].mxu0  ;;  %v503_v59 = vadd.f32 %v502_v53, %v301_v55  ;;  %v4223_v53 = vld [vmem:[#allocation14 + $0x270] ss:$8 sps:$4 sm:$0xff]   ;;  %v4226_v55 = vld [vmem:[#allocation14 + $0x280] ss:$8 sps:$4 sm:$0xff]  }
 0x217   :  { %v505_v56 = vadd.f32 %v504_v54, %v305_v52  ;;  %v506_v57 = vpop.f32.mrb[2].mxu0  ;;  %v4225_v52 = vld [vmem:[#allocation14 + $0x274] ss:$8 sps:$4 sm:$0xff]   ;;  %v4228_v54 = vld [vmem:[#allocation14 + $0x284] ss:$8 sps:$4 sm:$0xff]  }
 0x218   :  { %v507_v58 = vpop.f32.mrb[3].mxu0  ;;  %1003 = vmatprep.subr.bf16.mxu0 %v4225_v52  ;;  %v4229_v57 = vld [vmem:[#allocation14 + $0x290] ss:$8 sps:$4 sm:$0xff]   ;;  %v4270_v52 = vld [vmem:[#allocation14 + $0x364] ss:$8 sps:$4 sm:$0xff]  }
 0x219   :  { %521 = vadd.xlane.f32.xlu1 %v505_v56  ;;  %1004 = vmatpush1.bf16.msra.mxu0 %v4223_v53  ;;  %v4234_v58 = vld [vmem:[#allocation14 + $0x2a4] ss:$8 sps:$4 sm:$0xff]   ;;  %v4268_v53 = vld [vmem:[#allocation14 + $0x360] ss:$8 sps:$4 sm:$0xff]  }
 0x21a   :  { %1005 = vmatprep.subr.bf16.mxu0 %v4228_v54  ;;  %v4273_v54 = vld [vmem:[#allocation14 + $0x374] ss:$8 sps:$4 sm:$0xff]  }
 0x21d   :  { %509 = vadd.xlane.f32.xlu1 %v503_v59  ;;  %1006 = vmatpush1.bf16.msra.mxu0 %v4226_v55  ;;  %v4271_v55 = vld [vmem:[#allocation14 + $0x370] ss:$8 sps:$4 sm:$0xff]  }
 0x2a6   :  { %v522_v17 = vpop.xlane.xlu1 %521 }
 0x2a7   :  { %v523_v18 = vmul.f32 0.0078125, %v522_v17  ;;  %v4247_v17 = vld [vmem:[#allocation14 + $0x2f0] ss:$8 sps:$4 sm:$0xff]  }
 0x2a9   :  { %v5139_v19 = vsub.f32 %v505_v56, %v523_v18  ;;  %v4231_v56 = vld [vmem:[#allocation14 + $0x294] ss:$8 sps:$4 sm:$0xff]   ;;  %v568_v18 = vld [vmem:[#allocation15 + $0x2] sm:$0x3] }
 0x2aa   :  { %v510_v20 = vpop.xlane.xlu1 %509  ;;  %1007 = vmatprep.subr.bf16.mxu0 %v4231_v56  ;;  %v4276_v56 = vld [vmem:[#allocation14 + $0x384] ss:$8 sps:$4 sm:$0xff]  }
 0x2ab   :  { %v512_v21 = vmul.f32 0.0078125, %v510_v20  ;;  %v525_v22 = vmul.f32 %v5139_v19, %v5139_v19  ;;  %1008 = vmatpush1.bf16.msra.mxu0 %v4229_v57  ;;  %v573_v20 = vrot.slane %v568_v18, %v5135_v51  ;;  %v4274_v57 = vld [vmem:[#allocation14 + $0x380] ss:$8 sps:$4 sm:$0xff]  }
 0x2ac   :  { %1009 = vmatprep.subr.bf16.mxu0 %v4234_v58  ;;  %v4279_v58 = vld [vmem:[#allocation14 + $0x394] ss:$8 sps:$4 sm:$0xff]  }
 0x2ad   :  { %v5143_v23 = vsub.f32 %v503_v59, %v512_v21  ;;  %526 = vadd.xlane.f32.xlu0 %v525_v22  ;;  %v4232_v59 = vld [vmem:[#allocation14 + $0x2a0] ss:$8 sps:$4 sm:$0xff]   ;;  %v577_v21 = vrot.slane %v568_v18, %v5133_v49  ;;  %v4303_v18 = vld [vmem:[#allocation14 + $0x414] ss:$8 sps:$4 sm:$0xff]  }
 0x2af   :  { %v514_v24 = vmul.f32 %v5143_v23, %v5143_v23  ;;  %1010 = vmatpush1.bf16.msra.mxu0 %v4232_v59  ;;  %v4277_v59 = vld [vmem:[#allocation14 + $0x390] ss:$8 sps:$4 sm:$0xff]  }
 0x2b0   :  { %1011 = vmatprep.subr.bf16.mxu0 %v4237_v60  ;;  %v4282_v60 = vld [vmem:[#allocation14 + $0x3a4] ss:$8 sps:$4 sm:$0xff]  }
 0x2b1   :  { %515 = vadd.xlane.f32.xlu1 %v514_v24 }
 0x2b3   :  { %1012 = vmatpush1.bf16.msra.mxu0 %v4235_v61  ;;  %v4280_v61 = vld [vmem:[#allocation14 + $0x3a0] ss:$8 sps:$4 sm:$0xff]  }
 0x2b4   :  { %1013 = vmatprep.subr.bf16.mxu0 %v4240_v62 }
 0x2b7   :  { %1014 = vmatpush1.bf16.msra.mxu0 %v4238_v63 }
 0x2b8   :  { %1015 = vmatprep.subr.bf16.mxu0 %v4243_v0 }
 0x2bb   :  { %1016 = vmatpush1.bf16.msra.mxu0 %v4241_v1 }
 0x2bc   :  { %1017 = vmatprep.subr.bf16.mxu0 %v4246_v2 }
 0x2bf   :  { %1018 = vmatpush1.bf16.msra.mxu0 %v4244_v3 }
 0x2c0   :  { %1019 = vmatprep.subr.bf16.mxu0 %v4249_v16  ;;  %v4298_v16 = vld [vmem:[#allocation14 + $0x400] ss:$8 sps:$4 sm:$0xff]  }
 0x2c3   :  { %1020 = vmatpush1.bf16.msra.mxu0 %v4247_v17  ;;  %v4300_v17 = vld [vmem:[#allocation14 + $0x404] ss:$8 sps:$4 sm:$0xff]  }
 0x2c4   :  { %1509 = vmatprep.subr.bf16.mxu0 %v4300_v17 }
 0x33a   :  { %v527_v4 = vpop.xlane.xlu0 %526 }
 0x33b   :  { %v528_v5 = vmul.f32 0.0078125, %v527_v4 }
 0x33d   :  { %v529_v6 = vadd.f32 1e-05, %v528_v5 }
 0x33e   :  { %v516_v7 = vpop.xlane.xlu1 %515 }
 0x33f   :  { %4538 = vrsqrt.f32 %v529_v6  ;;  %v517_v8 = vmul.f32 0.0078125, %v516_v7  ;;  %v4285_v6 = vld [vmem:[#allocation14 + $0x3b4] ss:$8 sps:$4 sm:$0xff]   ;;  %v4283_v7 = vld [vmem:[#allocation14 + $0x3b0] ss:$8 sps:$4 sm:$0xff]  }
 0x341   :  { %v518_v9 = vadd.f32 1e-05, %v517_v8  ;;  %v4288_v8 = vld [vmem:[#allocation14 + $0x3c4] ss:$8 sps:$4 sm:$0xff]  }
 0x343   :  { %4540 = vrsqrt.f32 %v518_v9  ;;  %v4286_v9 = vld [vmem:[#allocation14 + $0x3c0] ss:$8 sps:$4 sm:$0xff]  }
 0x349   :  { %v4539_v10 = vpop.eup %4538 }
 0x34a   :  { %v531_v11 = vmul.f32 %v4539_v10, %v5139_v19  ;;  %v4289_v10 = vld [vmem:[#allocation14 + $0x3d0] ss:$8 sps:$4 sm:$0xff]  }
 0x34c   :  { %v566_v12 = vpack.c.bf16 %v531_v11, %v531_v11  ;;  %v4291_v11 = vld [vmem:[#allocation14 + $0x3d4] ss:$8 sps:$4 sm:$0xff]  }
 0x34d   :  { %v4541_v13 = vpop.eup %4540 }
 0x34e   :  { %772 = vmatprep.mubr.bf16.mxu1 %v566_v12  ;;  %v520_v14 = vmul.f32 %v4541_v13, %v5143_v23  ;;  %v817_v23 = vld [vmem:[#allocation15 + $0x4] sm:$0x3]  ;;  %v4292_v13 = vld [vmem:[#allocation14 + $0x3e0] ss:$8 sps:$4 sm:$0xff]  }
 0x34f   :  { %v826_v30 = vrot.slane %v817_v23, %v5133_v49  ;;  %v822_v33 = vrot.slane %v817_v23, %v5135_v51  ;;  %v4294_v12 = vld [vmem:[#allocation14 + $0x3e4] ss:$8 sps:$4 sm:$0xff]   ;;  %v4316_v23 = vld [vmem:[#allocation14 + $0x460] ss:$8 sps:$4 sm:$0xff]  }
 0x350   :  { %v565_v15 = vpack.c.bf16 %v520_v14, %v520_v14  ;;  %v4297_v14 = vld [vmem:[#allocation14 + $0x3f4] ss:$8 sps:$4 sm:$0xff]  }
 0x352   :  { %773 = vmatmul.mubr.bf16.vlgmr.msra.gmra.mrb[0].mxu1 %v565_v15  ;;  %v4295_v15 = vld [vmem:[#allocation14 + $0x3f0] ss:$8 sps:$4 sm:$0xff]  }
 0x353   :  { %1261 = vmatpush1.bf16.msra.mxu1 %v4250_v38  ;;  %v4333_v38 = vld [vmem:[#allocation14 + $0x4b4] ss:$8 sps:$4 sm:$0xff]  }
 0x354   :  { %1262 = vmatprep.subr.bf16.mxu1 %v4255_v40  ;;  %v4336_v40 = vld [vmem:[#allocation14 + $0x4c4] ss:$8 sps:$4 sm:$0xff]  }
 0x357   :  { %1263 = vmatpush1.bf16.msra.mxu1 %v4253_v41  ;;  %v4334_v41 = vld [vmem:[#allocation14 + $0x4c0] ss:$8 sps:$4 sm:$0xff]  }
 0x358   :  { %1264 = vmatprep.subr.bf16.mxu1 %v4258_v42  ;;  %v4339_v42 = vld [vmem:[#allocation14 + $0x4d4] ss:$8 sps:$4 sm:$0xff]  }
 0x35b   :  { %1265 = vmatpush1.bf16.msra.mxu1 %v4256_v43  ;;  %v4337_v43 = vld [vmem:[#allocation14 + $0x4d0] ss:$8 sps:$4 sm:$0xff]  }
 0x35c   :  { %1266 = vmatprep.subr.bf16.mxu1 %v4261_v44  ;;  %v4342_v44 = vld [vmem:[#allocation14 + $0x4e4] ss:$8 sps:$4 sm:$0xff]  }
 0x35f   :  { %1267 = vmatpush1.bf16.msra.mxu1 %v4259_v45  ;;  %v4340_v45 = vld [vmem:[#allocation14 + $0x4e0] ss:$8 sps:$4 sm:$0xff]  }
 0x360   :  { %1268 = vmatprep.subr.bf16.mxu1 %v4264_v46 }
 0x363   :  { %1269 = vmatpush1.bf16.msra.mxu1 %v4262_v47 }
 0x364   :  { %1270 = vmatprep.subr.bf16.mxu1 %v4267_v48 }
 0x367   :  { %1271 = vmatpush1.bf16.msra.mxu1 %v4265_v50 }
 0x368   :  { %1272 = vmatprep.subr.bf16.mxu1 %v4270_v52 }
 0x36b   :  { %1273 = vmatpush1.bf16.msra.mxu1 %v4268_v53 }
 0x36c   :  { %1274 = vmatprep.subr.bf16.mxu1 %v4273_v54 }
 0x36f   :  { %1275 = vmatpush1.bf16.msra.mxu1 %v4271_v55 }
 0x370   :  { %1276 = vmatprep.subr.bf16.mxu1 %v4276_v56 }
 0x373   :  { %1277 = vmatpush1.bf16.msra.mxu1 %v4274_v57 }
 0x374   :  { %1278 = vmatprep.subr.bf16.mxu1 %v4279_v58 }
 0x377   :  { %1279 = vmatpush1.bf16.msra.mxu1 %v4277_v59 }
 0x378   :  { %1280 = vmatprep.subr.bf16.mxu1 %v4282_v60  ;;  %v4345_v60 = vld [vmem:[#allocation14 + $0x4f4] ss:$8 sps:$4 sm:$0xff]  }
 0x37b   :  { %1281 = vmatpush1.bf16.msra.mxu1 %v4280_v61  ;;  %v4343_v61 = vld [vmem:[#allocation14 + $0x4f0] ss:$8 sps:$4 sm:$0xff]  }
 0x37c   :  { %1282 = vmatprep.subr.bf16.mxu1 %v4285_v6 }
 0x37f   :  { %1283 = vmatpush1.bf16.msra.mxu1 %v4283_v7 }
 0x380   :  { %1284 = vmatprep.subr.bf16.mxu1 %v4288_v8 }
 0x383   :  { %1285 = vmatpush1.bf16.msra.mxu1 %v4286_v9 }
 0x384   :  { %1286 = vmatprep.subr.bf16.mxu1 %v4291_v11 }
 0x387   :  { %1287 = vmatpush1.bf16.msra.mxu1 %v4289_v10 }
 0x388   :  { %1288 = vmatprep.subr.bf16.mxu1 %v4294_v12 }
 0x38b   :  { %1289 = vmatpush1.bf16.msra.mxu1 %v4292_v13 }
 0x38c   :  { %1290 = vmatprep.subr.bf16.mxu1 %v4297_v14 }
 0x38f   :  { %1291 = vmatpush1.bf16.msra.mxu1 %v4295_v15 }
 0x425   :  { %v774_v22 = vpop.f32.mrb[0].mxu1 }
 0x426   :  { %v775_v24 = vadd.f32 %v774_v22, %v573_v20  ;;  %v776_v25 = vpop.f32.mrb[1].mxu1  ;;  %v4301_v20 = vld [vmem:[#allocation14 + $0x410] ss:$8 sps:$4 sm:$0xff]   ;;  %v4304_v22 = vld [vmem:[#allocation14 + $0x420] ss:$8 sps:$4 sm:$0xff]  }
 0x427   :  { %v777_v19 = vadd.f32 %v776_v25, %v577_v21  ;;  %v778_v26 = vpop.f32.mrb[2].mxu1  ;;  %v4306_v21 = vld [vmem:[#allocation14 + $0x424] ss:$8 sps:$4 sm:$0xff]   ;;  %v4307_v25 = vld [vmem:[#allocation14 + $0x430] ss:$8 sps:$4 sm:$0xff]  }
 0x428   :  { %v779_v27 = vpop.f32.mrb[3].mxu1  ;;  %v814_v29 = vpack.c.bf16 %v775_v24, %v775_v24  ;;  %v4309_v24 = vld [vmem:[#allocation14 + $0x434] ss:$8 sps:$4 sm:$0xff]   ;;  %v4310_v26 = vld [vmem:[#allocation14 + $0x440] ss:$8 sps:$4 sm:$0xff]  }
 0x429   :  { %v815_v28 = vpack.c.bf16 %v777_v19, %v777_v19  ;;  %v4312_v19 = vld [vmem:[#allocation14 + $0x444] ss:$8 sps:$4 sm:$0xff]   ;;  %v4315_v27 = vld [vmem:[#allocation14 + $0x454] ss:$8 sps:$4 sm:$0xff]  }
 0x42b   :  { %1021 = vmatprep.mubr.bf16.mxu0 %v815_v28  ;;  %v4313_v28 = vld [vmem:[#allocation14 + $0x450] ss:$8 sps:$4 sm:$0xff]  }
 0x42c   :  { %1022 = vmatmul.mubr.bf16.vlgmr.msra.gmra.mrb[4].mxu0 %v814_v29  ;;  %v4318_v29 = vld [vmem:[#allocation14 + $0x464] ss:$8 sps:$4 sm:$0xff]  }
 0x42d   :  { %1510 = vmatpush1.bf16.msra.mxu0 %v4298_v16 }
 0x42e   :  { %1511 = vmatprep.subr.bf16.mxu0 %v4303_v18  ;;  %v4346_v18 = vld [vmem:[#allocation14 + $0x500] ss:$8 sps:$4 sm:$0xff]  }
 0x431   :  { %1512 = vmatpush1.bf16.msra.mxu0 %v4301_v20  ;;  %v4348_v20 = vld [vmem:[#allocation14 + $0x504] ss:$8 sps:$4 sm:$0xff]  }
 0x432   :  { %1513 = vmatprep.subr.bf16.mxu0 %v4306_v21  ;;  %v4351_v21 = vld [vmem:[#allocation14 + $0x514] ss:$8 sps:$4 sm:$0xff]   ;;  %1780 = vmatprep.subr.bf16.mxu1 %v4348_v20  ;;  %v4427_v20 = vld [vmem:[#allocation14 + $0x6b0] ss:$8 sps:$4 sm:$0xff]  }
 0x435   :  { %1514 = vmatpush1.bf16.msra.mxu0 %v4304_v22  ;;  %v4349_v22 = vld [vmem:[#allocation14 + $0x510] ss:$8 sps:$4 sm:$0xff]  }
 0x436   :  { %1515 = vmatprep.subr.bf16.mxu0 %v4309_v24  ;;  %v4354_v24 = vld [vmem:[#allocation14 + $0x524] ss:$8 sps:$4 sm:$0xff]  }
 0x439   :  { %1516 = vmatpush1.bf16.msra.mxu0 %v4307_v25  ;;  %v4352_v25 = vld [vmem:[#allocation14 + $0x520] ss:$8 sps:$4 sm:$0xff]  }
 0x43a   :  { %1517 = vmatprep.subr.bf16.mxu0 %v4312_v19  ;;  %v4357_v19 = vld [vmem:[#allocation14 + $0x534] ss:$8 sps:$4 sm:$0xff]  }
 0x43d   :  { %1518 = vmatpush1.bf16.msra.mxu0 %v4310_v26  ;;  %v4355_v26 = vld [vmem:[#allocation14 + $0x530] ss:$8 sps:$4 sm:$0xff]  }
 0x43e   :  { %1519 = vmatprep.subr.bf16.mxu0 %v4315_v27  ;;  %v4360_v27 = vld [vmem:[#allocation14 + $0x544] ss:$8 sps:$4 sm:$0xff]  }
 0x441   :  { %1520 = vmatpush1.bf16.msra.mxu0 %v4313_v28  ;;  %v4358_v28 = vld [vmem:[#allocation14 + $0x540] ss:$8 sps:$4 sm:$0xff]  }
 0x442   :  { %1521 = vmatprep.subr.bf16.mxu0 %v4318_v29  ;;  %v4363_v29 = vld [vmem:[#allocation14 + $0x554] ss:$8 sps:$4 sm:$0xff]  }
 0x445   :  { %1522 = vmatpush1.bf16.msra.mxu0 %v4316_v23  ;;  %v4361_v23 = vld [vmem:[#allocation14 + $0x550] ss:$8 sps:$4 sm:$0xff]  }
 0x4ff   :  { %v1023_v31 = vpop.f32.mrb[4].mxu0 }
 0x500   :  { %v1025_v32 = vpop.f32.mrb[5].mxu0  ;;  %v1024_v37 = vadd.f32 %v1023_v31, %v822_v33  ;;  %v4319_v31 = vld [vmem:[#allocation14 + $0x470] ss:$8 sps:$4 sm:$0xff]   ;;  %v4322_v33 = vld [vmem:[#allocation14 + $0x480] ss:$8 sps:$4 sm:$0xff]  }
 0x501   :  { %v1026_v34 = vadd.f32 %v1025_v32, %v826_v30  ;;  %v1027_v35 = vpop.f32.mrb[6].mxu0  ;;  %v4321_v30 = vld [vmem:[#allocation14 + $0x474] ss:$8 sps:$4 sm:$0xff]   ;;  %v4324_v32 = vld [vmem:[#allocation14 + $0x484] ss:$8 sps:$4 sm:$0xff]  }
 0x502   :  { %v1028_v36 = vpop.f32.mrb[7].mxu0  ;;  %1523 = vmatprep.subr.bf16.mxu0 %v4321_v30  ;;  %v4325_v35 = vld [vmem:[#allocation14 + $0x490] ss:$8 sps:$4 sm:$0xff]   ;;  %v4366_v30 = vld [vmem:[#allocation14 + $0x564] ss:$8 sps:$4 sm:$0xff]  }
 0x503   :  { %1041 = vadd.xlane.f32.xlu1 %v1026_v34  ;;  %1524 = vmatpush1.bf16.msra.mxu0 %v4319_v31  ;;  %v4330_v36 = vld [vmem:[#allocation14 + $0x4a4] ss:$8 sps:$4 sm:$0xff]   ;;  %v4364_v31 = vld [vmem:[#allocation14 + $0x560] ss:$8 sps:$4 sm:$0xff]  }
 0x504   :  { %1525 = vmatprep.subr.bf16.mxu0 %v4324_v32  ;;  %v4369_v32 = vld [vmem:[#allocation14 + $0x574] ss:$8 sps:$4 sm:$0xff]  }
 0x507   :  { %1030 = vadd.xlane.f32.xlu1 %v1024_v37  ;;  %1526 = vmatpush1.bf16.msra.mxu0 %v4322_v33  ;;  %v4367_v33 = vld [vmem:[#allocation14 + $0x570] ss:$8 sps:$4 sm:$0xff]  }
 0x590   :  { %v1042_v62 = vpop.xlane.xlu1 %1041 }
 0x591   :  { %v1043_v63 = vmul.f32 0.0078125, %v1042_v62  ;;  %v1088_v62 = vld [vmem:[#allocation15 + $0x6] sm:$0x3] }
 0x593   :  { %v5153_v0 = vsub.f32 %v1026_v34, %v1043_v63  ;;  %v4327_v34 = vld [vmem:[#allocation14 + $0x494] ss:$8 sps:$4 sm:$0xff]   ;;  %v1093_v63 = vrot.slane %v1088_v62, %v5135_v51 }
 0x594   :  { %v1031_v1 = vpop.xlane.xlu1 %1030  ;;  %1527 = vmatprep.subr.bf16.mxu0 %v4327_v34  ;;  %v4372_v34 = vld [vmem:[#allocation14 + $0x584] ss:$8 sps:$4 sm:$0xff]  }
 0x595   :  { %v1032_v2 = vmul.f32 0.0078125, %v1031_v1  ;;  %v1045_v3 = vmul.f32 %v5153_v0, %v5153_v0  ;;  %1528 = vmatpush1.bf16.msra.mxu0 %v4325_v35  ;;  %v1097_v1 = vrot.slane %v1088_v62, %v5133_v49  ;;  %v4370_v35 = vld [vmem:[#allocation14 + $0x580] ss:$8 sps:$4 sm:$0xff]   ;;  %v4399_v62 = vld [vmem:[#allocation14 + $0x614] ss:$8 sps:$4 sm:$0xff]  }
 0x596   :  { %1529 = vmatprep.subr.bf16.mxu0 %v4330_v36  ;;  %v4375_v36 = vld [vmem:[#allocation14 + $0x594] ss:$8 sps:$4 sm:$0xff]  }
 0x597   :  { %v5157_v4 = vsub.f32 %v1024_v37, %v1032_v2  ;;  %1046 = vadd.xlane.f32.xlu1 %v1045_v3  ;;  %v4328_v37 = vld [vmem:[#allocation14 + $0x4a0] ss:$8 sps:$4 sm:$0xff]  }
 0x599   :  { %v1034_v5 = vmul.f32 %v5157_v4, %v5157_v4  ;;  %1530 = vmatpush1.bf16.msra.mxu0 %v4328_v37  ;;  %v4373_v37 = vld [vmem:[#allocation14 + $0x590] ss:$8 sps:$4 sm:$0xff]  }
 0x59a   :  { %1531 = vmatprep.subr.bf16.mxu0 %v4333_v38  ;;  %v4378_v38 = vld [vmem:[#allocation14 + $0x5a4] ss:$8 sps:$4 sm:$0xff]  }
 0x59b   :  { %1035 = vadd.xlane.f32.xlu1 %v1034_v5 }
 0x59d   :  { %1532 = vmatpush1.bf16.msra.mxu0 %v4331_v39  ;;  %v4376_v39 = vld [vmem:[#allocation14 + $0x5a0] ss:$8 sps:$4 sm:$0xff]  }
 0x59e   :  { %1533 = vmatprep.subr.bf16.mxu0 %v4336_v40 }
 0x5a1   :  { %1534 = vmatpush1.bf16.msra.mxu0 %v4334_v41 }
 0x5a2   :  { %1535 = vmatprep.subr.bf16.mxu0 %v4339_v42 }
 0x5a5   :  { %1536 = vmatpush1.bf16.msra.mxu0 %v4337_v43 }
 0x5a6   :  { %1537 = vmatprep.subr.bf16.mxu0 %v4342_v44 }
 0x5a9   :  { %1538 = vmatpush1.bf16.msra.mxu0 %v4340_v45 }
 0x5aa   :  { %1539 = vmatprep.subr.bf16.mxu0 %v4345_v60  ;;  %v4394_v60 = vld [vmem:[#allocation14 + $0x600] ss:$8 sps:$4 sm:$0xff]  }
 0x5ad   :  { %1540 = vmatpush1.bf16.msra.mxu0 %v4343_v61  ;;  %v4396_v61 = vld [vmem:[#allocation14 + $0x604] ss:$8 sps:$4 sm:$0xff]  }
 0x5ae   :  { %2029 = vmatprep.subr.bf16.mxu0 %v4396_v61 }
 0x624   :  { %v1047_v46 = vpop.xlane.xlu1 %1046 }
 0x625   :  { %v1048_v47 = vmul.f32 0.0078125, %v1047_v46 }
 0x627   :  { %v1049_v48 = vadd.f32 1e-05, %v1048_v47 }
 0x628   :  { %v1036_v50 = vpop.xlane.xlu1 %1035 }
 0x629   :  { %4542 = vrsqrt.f32 %v1049_v48  ;;  %v1037_v52 = vmul.f32 0.0078125, %v1036_v50  ;;  %v4381_v48 = vld [vmem:[#allocation14 + $0x5b4] ss:$8 sps:$4 sm:$0xff]   ;;  %v4379_v50 = vld [vmem:[#allocation14 + $0x5b0] ss:$8 sps:$4 sm:$0xff]  }
 0x62b   :  { %v1038_v53 = vadd.f32 1e-05, %v1037_v52  ;;  %v4384_v52 = vld [vmem:[#allocation14 + $0x5c4] ss:$8 sps:$4 sm:$0xff]  }
 0x62d   :  { %4544 = vrsqrt.f32 %v1038_v53  ;;  %v4382_v53 = vld [vmem:[#allocation14 + $0x5c0] ss:$8 sps:$4 sm:$0xff]  }
 0x633   :  { %v4543_v54 = vpop.eup %4542 }
 0x634   :  { %v1051_v55 = vmul.f32 %v4543_v54, %v5153_v0  ;;  %v4385_v54 = vld [vmem:[#allocation14 + $0x5d0] ss:$8 sps:$4 sm:$0xff]  }
 0x636   :  { %v1086_v56 = vpack.c.bf16 %v1051_v55, %v1051_v55  ;;  %v4387_v55 = vld [vmem:[#allocation14 + $0x5d4] ss:$8 sps:$4 sm:$0xff]  }
 0x637   :  { %v4545_v57 = vpop.eup %4544 }
 0x638   :  { %1292 = vmatprep.mubr.bf16.mxu1 %v1086_v56  ;;  %v1040_v58 = vmul.f32 %v4545_v57, %v5157_v4  ;;  %v1337_v4 = vld [vmem:[#allocation15 + $0x8] sm:$0x3]  ;;  %v4390_v56 = vld [vmem:[#allocation14 + $0x5e4] ss:$8 sps:$4 sm:$0xff]  }
 0x639   :  { %v1346_v10 = vrot.slane %v1337_v4, %v5133_v49  ;;  %v1342_v13 = vrot.slane %v1337_v4, %v5135_v51  ;;  %v4388_v57 = vld [vmem:[#allocation14 + $0x5e0] ss:$8 sps:$4 sm:$0xff]  }
 0x63a   :  { %v1085_v59 = vpack.c.bf16 %v1040_v58, %v1040_v58  ;;  %v4393_v58 = vld [vmem:[#allocation14 + $0x5f4] ss:$8 sps:$4 sm:$0xff]   ;;  %v4412_v4 = vld [vmem:[#allocation14 + $0x660] ss:$8 sps:$4 sm:$0xff]  }
 0x63c   :  { %1293 = vmatmul.mubr.bf16.vlgmr.msra.gmra.mrb[4].mxu1 %v1085_v59  ;;  %v4391_v59 = vld [vmem:[#allocation14 + $0x5f0] ss:$8 sps:$4 sm:$0xff]  }
 0x63d   :  { %1781 = vmatpush1.bf16.msra.mxu1 %v4346_v18  ;;  %v4429_v18 = vld [vmem:[#allocation14 + $0x6b4] ss:$8 sps:$4 sm:$0xff]  }
 0x63e   :  { %1782 = vmatprep.subr.bf16.mxu1 %v4351_v21  ;;  %v4432_v21 = vld [vmem:[#allocation14 + $0x6c4] ss:$8 sps:$4 sm:$0xff]  }
 0x641   :  { %1783 = vmatpush1.bf16.msra.mxu1 %v4349_v22  ;;  %v4430_v22 = vld [vmem:[#allocation14 + $0x6c0] ss:$8 sps:$4 sm:$0xff]  }
 0x642   :  { %1784 = vmatprep.subr.bf16.mxu1 %v4354_v24  ;;  %v4435_v24 = vld [vmem:[#allocation14 + $0x6d4] ss:$8 sps:$4 sm:$0xff]  }
 0x645   :  { %1785 = vmatpush1.bf16.msra.mxu1 %v4352_v25  ;;  %v4433_v25 = vld [vmem:[#allocation14 + $0x6d0] ss:$8 sps:$4 sm:$0xff]  }
 0x646   :  { %1786 = vmatprep.subr.bf16.mxu1 %v4357_v19  ;;  %v4438_v19 = vld [vmem:[#allocation14 + $0x6e4] ss:$8 sps:$4 sm:$0xff]  }
 0x649   :  { %1787 = vmatpush1.bf16.msra.mxu1 %v4355_v26  ;;  %v4436_v26 = vld [vmem:[#allocation14 + $0x6e0] ss:$8 sps:$4 sm:$0xff]  }
 0x64a   :  { %1788 = vmatprep.subr.bf16.mxu1 %v4360_v27 }
 0x64d   :  { %1789 = vmatpush1.bf16.msra.mxu1 %v4358_v28 }
 0x64e   :  { %1790 = vmatprep.subr.bf16.mxu1 %v4363_v29 }
 0x651   :  { %1791 = vmatpush1.bf16.msra.mxu1 %v4361_v23 }
 0x652   :  { %1792 = vmatprep.subr.bf16.mxu1 %v4366_v30 }
 0x655   :  { %1793 = vmatpush1.bf16.msra.mxu1 %v4364_v31 }
 0x656   :  { %1794 = vmatprep.subr.bf16.mxu1 %v4369_v32 }
 0x659   :  { %1795 = vmatpush1.bf16.msra.mxu1 %v4367_v33 }
 0x65a   :  { %1796 = vmatprep.subr.bf16.mxu1 %v4372_v34 }
 0x65d   :  { %1797 = vmatpush1.bf16.msra.mxu1 %v4370_v35 }
 0x65e   :  { %1798 = vmatprep.subr.bf16.mxu1 %v4375_v36 }
 0x661   :  { %1799 = vmatpush1.bf16.msra.mxu1 %v4373_v37 }
 0x662   :  { %1800 = vmatprep.subr.bf16.mxu1 %v4378_v38  ;;  %v4441_v38 = vld [vmem:[#allocation14 + $0x6f4] ss:$8 sps:$4 sm:$0xff]  }
 0x665   :  { %1801 = vmatpush1.bf16.msra.mxu1 %v4376_v39  ;;  %v4439_v39 = vld [vmem:[#allocation14 + $0x6f0] ss:$8 sps:$4 sm:$0xff]  }
 0x666   :  { %1802 = vmatprep.subr.bf16.mxu1 %v4381_v48 }
 0x669   :  { %1803 = vmatpush1.bf16.msra.mxu1 %v4379_v50 }
 0x66a   :  { %1804 = vmatprep.subr.bf16.mxu1 %v4384_v52 }
 0x66d   :  { %1805 = vmatpush1.bf16.msra.mxu1 %v4382_v53 }
 0x66e   :  { %1806 = vmatprep.subr.bf16.mxu1 %v4387_v55 }
 0x671   :  { %1807 = vmatpush1.bf16.msra.mxu1 %v4385_v54 }
 0x672   :  { %1808 = vmatprep.subr.bf16.mxu1 %v4390_v56 }
 0x675   :  { %1809 = vmatpush1.bf16.msra.mxu1 %v4388_v57 }
 0x676   :  { %1810 = vmatprep.subr.bf16.mxu1 %v4393_v58 }
 0x679   :  { %1811 = vmatpush1.bf16.msra.mxu1 %v4391_v59 }
 0x70f   :  { %v1294_v2 = vpop.f32.mrb[4].mxu1 }
 0x710   :  { %v1295_v3 = vadd.f32 %v1294_v2, %v1093_v63  ;;  %v1296_v5 = vpop.f32.mrb[5].mxu1  ;;  %v4397_v63 = vld [vmem:[#allocation14 + $0x610] ss:$8 sps:$4 sm:$0xff]   ;;  %v4400_v2 = vld [vmem:[#allocation14 + $0x620] ss:$8 sps:$4 sm:$0xff]  }
 0x711   :  { %v1297_v0 = vadd.f32 %v1296_v5, %v1097_v1  ;;  %v1298_v6 = vpop.f32.mrb[6].mxu1  ;;  %v4402_v1 = vld [vmem:[#allocation14 + $0x624] ss:$8 sps:$4 sm:$0xff]   ;;  %v4403_v5 = vld [vmem:[#allocation14 + $0x630] ss:$8 sps:$4 sm:$0xff]  }
 0x712   :  { %v1299_v7 = vpop.f32.mrb[7].mxu1  ;;  %v1334_v9 = vpack.c.bf16 %v1295_v3, %v1295_v3  ;;  %v4405_v3 = vld [vmem:[#allocation14 + $0x634] ss:$8 sps:$4 sm:$0xff]   ;;  %v4406_v6 = vld [vmem:[#allocation14 + $0x640] ss:$8 sps:$4 sm:$0xff]  }
 0x713   :  { %v1335_v8 = vpack.c.bf16 %v1297_v0, %v1297_v0  ;;  %v4408_v0 = vld [vmem:[#allocation14 + $0x644] ss:$8 sps:$4 sm:$0xff]   ;;  %v4411_v7 = vld [vmem:[#allocation14 + $0x654] ss:$8 sps:$4 sm:$0xff]  }
 0x715   :  { %1541 = vmatprep.mubr.bf16.mxu0 %v1335_v8  ;;  %v4409_v8 = vld [vmem:[#allocation14 + $0x650] ss:$8 sps:$4 sm:$0xff]  }
 0x716   :  { %1542 = vmatmul.mubr.bf16.vlgmr.msra.gmra.mrb[8].mxu0 %v1334_v9  ;;  %v4414_v9 = vld [vmem:[#allocation14 + $0x664] ss:$8 sps:$4 sm:$0xff]  }
 0x717   :  { %2030 = vmatpush1.bf16.msra.mxu0 %v4394_v60 }
 0x718   :  { %2031 = vmatprep.subr.bf16.mxu0 %v4399_v62  ;;  %v4442_v62 = vld [vmem:[#allocation14 + $0x700] ss:$8 sps:$4 sm:$0xff]  }
 0x71b   :  { %2032 = vmatpush1.bf16.msra.mxu0 %v4397_v63  ;;  %v4444_v63 = vld [vmem:[#allocation14 + $0x704] ss:$8 sps:$4 sm:$0xff]  }
 0x71c   :  { %2033 = vmatprep.subr.bf16.mxu0 %v4402_v1  ;;  %v4447_v1 = vld [vmem:[#allocation14 + $0x714] ss:$8 sps:$4 sm:$0xff]   ;;  %2300 = vmatprep.subr.bf16.mxu1 %v4444_v63  ;;  %v4523_v63 = vld [vmem:[#allocation14 + $0x8b0] ss:$8 sps:$4 sm:$0xff]  }
 0x71f   :  { %2034 = vmatpush1.bf16.msra.mxu0 %v4400_v2  ;;  %v4445_v2 = vld [vmem:[#allocation14 + $0x710] ss:$8 sps:$4 sm:$0xff]  }
 0x720   :  { %2035 = vmatprep.subr.bf16.mxu0 %v4405_v3  ;;  %v4450_v3 = vld [vmem:[#allocation14 + $0x724] ss:$8 sps:$4 sm:$0xff]  }
 0x723   :  { %2036 = vmatpush1.bf16.msra.mxu0 %v4403_v5  ;;  %v4448_v5 = vld [vmem:[#allocation14 + $0x720] ss:$8 sps:$4 sm:$0xff]  }
 0x724   :  { %2037 = vmatprep.subr.bf16.mxu0 %v4408_v0  ;;  %v4453_v0 = vld [vmem:[#allocation14 + $0x734] ss:$8 sps:$4 sm:$0xff]  }
 0x727   :  { %2038 = vmatpush1.bf16.msra.mxu0 %v4406_v6  ;;  %v4451_v6 = vld [vmem:[#allocation14 + $0x730] ss:$8 sps:$4 sm:$0xff]  }
 0x728   :  { %2039 = vmatprep.subr.bf16.mxu0 %v4411_v7  ;;  %v4456_v7 = vld [vmem:[#allocation14 + $0x744] ss:$8 sps:$4 sm:$0xff]  }
 0x72b   :  { %2040 = vmatpush1.bf16.msra.mxu0 %v4409_v8  ;;  %v4454_v8 = vld [vmem:[#allocation14 + $0x740] ss:$8 sps:$4 sm:$0xff]  }
 0x72c   :  { %2041 = vmatprep.subr.bf16.mxu0 %v4414_v9  ;;  %v4459_v9 = vld [vmem:[#allocation14 + $0x754] ss:$8 sps:$4 sm:$0xff]  }
 0x72f   :  { %2042 = vmatpush1.bf16.msra.mxu0 %v4412_v4  ;;  %v4457_v4 = vld [vmem:[#allocation14 + $0x750] ss:$8 sps:$4 sm:$0xff]  }
 0x7e9   :  { %v1543_v11 = vpop.f32.mrb[8].mxu0 }
 0x7ea   :  { %v1545_v12 = vpop.f32.mrb[9].mxu0  ;;  %v1544_v17 = vadd.f32 %v1543_v11, %v1342_v13  ;;  %v4415_v11 = vld [vmem:[#allocation14 + $0x670] ss:$8 sps:$4 sm:$0xff]   ;;  %v4418_v13 = vld [vmem:[#allocation14 + $0x680] ss:$8 sps:$4 sm:$0xff]  }
 0x7eb   :  { %v1546_v14 = vadd.f32 %v1545_v12, %v1346_v10  ;;  %v1547_v15 = vpop.f32.mrb[10].mxu0  ;;  %v4417_v10 = vld [vmem:[#allocation14 + $0x674] ss:$8 sps:$4 sm:$0xff]   ;;  %v4420_v12 = vld [vmem:[#allocation14 + $0x684] ss:$8 sps:$4 sm:$0xff]  }
 0x7ec   :  { %v1548_v16 = vpop.f32.mrb[11].mxu0  ;;  %2043 = vmatprep.subr.bf16.mxu0 %v4417_v10  ;;  %v4421_v15 = vld [vmem:[#allocation14 + $0x690] ss:$8 sps:$4 sm:$0xff]   ;;  %v4462_v10 = vld [vmem:[#allocation14 + $0x764] ss:$8 sps:$4 sm:$0xff]  }
 0x7ed   :  { %1561 = vadd.xlane.f32.xlu1 %v1546_v14  ;;  %2044 = vmatpush1.bf16.msra.mxu0 %v4415_v11  ;;  %v4426_v16 = vld [vmem:[#allocation14 + $0x6a4] ss:$8 sps:$4 sm:$0xff]   ;;  %v4460_v11 = vld [vmem:[#allocation14 + $0x760] ss:$8 sps:$4 sm:$0xff]  }
 0x7ee   :  { %2045 = vmatprep.subr.bf16.mxu0 %v4420_v12  ;;  %v4465_v12 = vld [vmem:[#allocation14 + $0x774] ss:$8 sps:$4 sm:$0xff]  }
 0x7f1   :  { %1550 = vadd.xlane.f32.xlu1 %v1544_v17  ;;  %2046 = vmatpush1.bf16.msra.mxu0 %v4418_v13  ;;  %v4463_v13 = vld [vmem:[#allocation14 + $0x770] ss:$8 sps:$4 sm:$0xff]  }
 0x87a   :  { %v1562_v40 = vpop.xlane.xlu1 %1561 }
 0x87b   :  { %v1563_v41 = vmul.f32 0.0078125, %v1562_v40  ;;  %v1608_v40 = vld [vmem:[#allocation15 + $0xa] sm:$0x3] }
 0x87d   :  { %v5167_v42 = vsub.f32 %v1546_v14, %v1563_v41  ;;  %v4423_v14 = vld [vmem:[#allocation14 + $0x694] ss:$8 sps:$4 sm:$0xff]   ;;  %v1613_v41 = vrot.slane %v1608_v40, %v5135_v51 }
 0x87e   :  { %v1551_v43 = vpop.xlane.xlu1 %1550  ;;  %2047 = vmatprep.subr.bf16.mxu0 %v4423_v14  ;;  %v4468_v14 = vld [vmem:[#allocation14 + $0x784] ss:$8 sps:$4 sm:$0xff]  }
 0x87f   :  { %v1552_v44 = vmul.f32 0.0078125, %v1551_v43  ;;  %v1565_v45 = vmul.f32 %v5167_v42, %v5167_v42  ;;  %2048 = vmatpush1.bf16.msra.mxu0 %v4421_v15  ;;  %v1617_v43 = vrot.slane %v1608_v40, %v5133_v49  ;;  %v4466_v15 = vld [vmem:[#allocation14 + $0x780] ss:$8 sps:$4 sm:$0xff]   ;;  %v4495_v40 = vld [vmem:[#allocation14 + $0x814] ss:$8 sps:$4 sm:$0xff]  }
 0x880   :  { %2049 = vmatprep.subr.bf16.mxu0 %v4426_v16  ;;  %v4471_v16 = vld [vmem:[#allocation14 + $0x794] ss:$8 sps:$4 sm:$0xff]  }
 0x881   :  { %v5171_v46 = vsub.f32 %v1544_v17, %v1552_v44  ;;  %1566 = vadd.xlane.f32.xlu1 %v1565_v45  ;;  %v4424_v17 = vld [vmem:[#allocation14 + $0x6a0] ss:$8 sps:$4 sm:$0xff]  }
 0x883   :  { %v1554_v47 = vmul.f32 %v5171_v46, %v5171_v46  ;;  %2050 = vmatpush1.bf16.msra.mxu0 %v4424_v17  ;;  %v4469_v17 = vld [vmem:[#allocation14 + $0x790] ss:$8 sps:$4 sm:$0xff]  }
 0x884   :  { %2051 = vmatprep.subr.bf16.mxu0 %v4429_v18  ;;  %v4474_v18 = vld [vmem:[#allocation14 + $0x7a4] ss:$8 sps:$4 sm:$0xff]  }
 0x885   :  { %1555 = vadd.xlane.f32.xlu0 %v1554_v47 }
 0x887   :  { %2052 = vmatpush1.bf16.msra.mxu0 %v4427_v20  ;;  %v4472_v20 = vld [vmem:[#allocation14 + $0x7a0] ss:$8 sps:$4 sm:$0xff]  }
 0x888   :  { %2053 = vmatprep.subr.bf16.mxu0 %v4432_v21 }
 0x88b   :  { %2054 = vmatpush1.bf16.msra.mxu0 %v4430_v22 }
 0x88c   :  { %2055 = vmatprep.subr.bf16.mxu0 %v4435_v24 }
 0x88f   :  { %2056 = vmatpush1.bf16.msra.mxu0 %v4433_v25 }
 0x890   :  { %2057 = vmatprep.subr.bf16.mxu0 %v4438_v19 }
 0x893   :  { %2058 = vmatpush1.bf16.msra.mxu0 %v4436_v26 }
 0x894   :  { %2059 = vmatprep.subr.bf16.mxu0 %v4441_v38  ;;  %v4490_v38 = vld [vmem:[#allocation14 + $0x800] ss:$8 sps:$4 sm:$0xff]  }
 0x897   :  { %2060 = vmatpush1.bf16.msra.mxu0 %v4439_v39  ;;  %v4492_v39 = vld [vmem:[#allocation14 + $0x804] ss:$8 sps:$4 sm:$0xff]  }
 0x898   :  { %2549 = vmatprep.subr.bf16.mxu0 %v4492_v39 }
 0x90e   :  { %v1567_v27 = vpop.xlane.xlu1 %1566 }
 0x90f   :  { %v1568_v28 = vmul.f32 0.0078125, %v1567_v27 }
 0x911   :  { %v1569_v29 = vadd.f32 1e-05, %v1568_v28 }
 0x912   :  { %v1556_v23 = vpop.xlane.xlu0 %1555 }
 0x913   :  { %4546 = vrsqrt.f32 %v1569_v29  ;;  %v1557_v30 = vmul.f32 0.0078125, %v1556_v23  ;;  %v4477_v29 = vld [vmem:[#allocation14 + $0x7b4] ss:$8 sps:$4 sm:$0xff]   ;;  %v4475_v23 = vld [vmem:[#allocation14 + $0x7b0] ss:$8 sps:$4 sm:$0xff]  }
 0x915   :  { %v1558_v31 = vadd.f32 1e-05, %v1557_v30  ;;  %v4480_v30 = vld [vmem:[#allocation14 + $0x7c4] ss:$8 sps:$4 sm:$0xff]  }
 0x917   :  { %4548 = vrsqrt.f32 %v1558_v31  ;;  %v4478_v31 = vld [vmem:[#allocation14 + $0x7c0] ss:$8 sps:$4 sm:$0xff]  }
 0x91d   :  { %v4547_v32 = vpop.eup %4546 }
 0x91e   :  { %v1571_v33 = vmul.f32 %v4547_v32, %v5167_v42  ;;  %v4483_v32 = vld [vmem:[#allocation14 + $0x7d4] ss:$8 sps:$4 sm:$0xff]  }
 0x920   :  { %v1606_v34 = vpack.c.bf16 %v1571_v33, %v1571_v33  ;;  %v4481_v33 = vld [vmem:[#allocation14 + $0x7d0] ss:$8 sps:$4 sm:$0xff]  }
 0x921   :  { %v4549_v35 = vpop.eup %4548 }
 0x922   :  { %1812 = vmatprep.mubr.bf16.mxu1 %v1606_v34  ;;  %v1560_v36 = vmul.f32 %v4549_v35, %v5171_v46  ;;  %v1857_v46 = vld [vmem:[#allocation15 + $0xc] sm:$0x3]  ;;  %v4484_v35 = vld [vmem:[#allocation14 + $0x7e0] ss:$8 sps:$4 sm:$0xff]  }
 0x923   :  { %v1862_v54 = vrot.slane %v1857_v46, %v5135_v51  ;;  %v1866_v55 = vrot.slane %v1857_v46, %v5133_v49  ;;  %v4486_v34 = vld [vmem:[#allocation14 + $0x7e4] ss:$8 sps:$4 sm:$0xff]   ;;  %v4508_v46 = vld [vmem:[#allocation14 + $0x860] ss:$8 sps:$4 sm:$0xff]  }
 0x924   :  { %v1605_v37 = vpack.c.bf16 %v1560_v36, %v1560_v36  ;;  %v4489_v36 = vld [vmem:[#allocation14 + $0x7f4] ss:$8 sps:$4 sm:$0xff]  }
 0x926   :  { %1813 = vmatmul.mubr.bf16.vlgmr.msra.gmra.mrb[8].mxu1 %v1605_v37  ;;  %v4487_v37 = vld [vmem:[#allocation14 + $0x7f0] ss:$8 sps:$4 sm:$0xff]  }
 0x927   :  { %2301 = vmatpush1.bf16.msra.mxu1 %v4442_v62  ;;  %v4525_v62 = vld [vmem:[#allocation14 + $0x8b4] ss:$8 sps:$4 sm:$0xff]  }
 0x928   :  { %2302 = vmatprep.subr.bf16.mxu1 %v4447_v1  ;;  %v4528_v1 = vld [vmem:[#allocation14 + $0x8c4] ss:$8 sps:$4 sm:$0xff]  }
 0x92b   :  { %2303 = vmatpush1.bf16.msra.mxu1 %v4445_v2  ;;  %v4526_v2 = vld [vmem:[#allocation14 + $0x8c0] ss:$8 sps:$4 sm:$0xff]  }
 0x92c   :  { %2304 = vmatprep.subr.bf16.mxu1 %v4450_v3  ;;  %v4531_v3 = vld [vmem:[#allocation14 + $0x8d4] ss:$8 sps:$4 sm:$0xff]  }
 0x92f   :  { %2305 = vmatpush1.bf16.msra.mxu1 %v4448_v5  ;;  %v4529_v5 = vld [vmem:[#allocation14 + $0x8d0] ss:$8 sps:$4 sm:$0xff]  }
 0x930   :  { %2306 = vmatprep.subr.bf16.mxu1 %v4453_v0  ;;  %v4534_v0 = vld [vmem:[#allocation14 + $0x8e4] ss:$8 sps:$4 sm:$0xff]  }
 0x933   :  { %2307 = vmatpush1.bf16.msra.mxu1 %v4451_v6  ;;  %v4532_v6 = vld [vmem:[#allocation14 + $0x8e0] ss:$8 sps:$4 sm:$0xff]  }
 0x934   :  { %2308 = vmatprep.subr.bf16.mxu1 %v4456_v7 }
 0x937   :  { %2309 = vmatpush1.bf16.msra.mxu1 %v4454_v8 }
 0x938   :  { %2310 = vmatprep.subr.bf16.mxu1 %v4459_v9 }
 0x93b   :  { %2311 = vmatpush1.bf16.msra.mxu1 %v4457_v4 }
 0x93c   :  { %2312 = vmatprep.subr.bf16.mxu1 %v4462_v10 }
 0x93f   :  { %2313 = vmatpush1.bf16.msra.mxu1 %v4460_v11 }
 0x940   :  { %2314 = vmatprep.subr.bf16.mxu1 %v4465_v12 }
 0x943   :  { %2315 = vmatpush1.bf16.msra.mxu1 %v4463_v13 }
 0x944   :  { %2316 = vmatprep.subr.bf16.mxu1 %v4468_v14 }
 0x947   :  { %2317 = vmatpush1.bf16.msra.mxu1 %v4466_v15 }
 0x948   :  { %2318 = vmatprep.subr.bf16.mxu1 %v4471_v16 }
 0x94b   :  { %2319 = vmatpush1.bf16.msra.mxu1 %v4469_v17 }
 0x94c   :  { %2320 = vmatprep.subr.bf16.mxu1 %v4474_v18  ;;  %v4537_v18 = vld [vmem:[#allocation14 + $0x8f4] ss:$8 sps:$4 sm:$0xff]  }
 0x94f   :  { %2321 = vmatpush1.bf16.msra.mxu1 %v4472_v20  ;;  %v4535_v20 = vld [vmem:[#allocation14 + $0x8f0] ss:$8 sps:$4 sm:$0xff]  }
 0x950   :  { %2322 = vmatprep.subr.bf16.mxu1 %v4477_v29 }
 0x953   :  { %2323 = vmatpush1.bf16.msra.mxu1 %v4475_v23 }
 0x954   :  { %2324 = vmatprep.subr.bf16.mxu1 %v4480_v30 }
 0x957   :  { %2325 = vmatpush1.bf16.msra.mxu1 %v4478_v31 }
 0x958   :  { %2326 = vmatprep.subr.bf16.mxu1 %v4483_v32 }
 0x95b   :  { %2327 = vmatpush1.bf16.msra.mxu1 %v4481_v33 }
 0x95c   :  { %2328 = vmatprep.subr.bf16.mxu1 %v4486_v34 }
 0x95f   :  { %2329 = vmatpush1.bf16.msra.mxu1 %v4484_v35 }
 0x960   :  { %2330 = vmatprep.subr.bf16.mxu1 %v4489_v36 }
 0x963   :  { %2331 = vmatpush1.bf16.msra.mxu1 %v4487_v37 }
 0x9f9   :  { %v1814_v44 = vpop.f32.mrb[8].mxu1 }
 0x9fa   :  { %v1815_v45 = vadd.f32 %v1814_v44, %v1613_v41  ;;  %v1816_v47 = vpop.f32.mrb[9].mxu1  ;;  %v4493_v41 = vld [vmem:[#allocation14 + $0x810] ss:$8 sps:$4 sm:$0xff]   ;;  %v4496_v44 = vld [vmem:[#allocation14 + $0x820] ss:$8 sps:$4 sm:$0xff]  }
 0x9fb   :  { %v1817_v42 = vadd.f32 %v1816_v47, %v1617_v43  ;;  %v1818_v48 = vpop.f32.mrb[10].mxu1  ;;  %v4498_v43 = vld [vmem:[#allocation14 + $0x824] ss:$8 sps:$4 sm:$0xff]   ;;  %v4499_v47 = vld [vmem:[#allocation14 + $0x830] ss:$8 sps:$4 sm:$0xff]  }
 0x9fc   :  { %v1819_v50 = vpop.f32.mrb[11].mxu1  ;;  %v1854_v53 = vpack.c.bf16 %v1815_v45, %v1815_v45  ;;  %v4501_v45 = vld [vmem:[#allocation14 + $0x834] ss:$8 sps:$4 sm:$0xff]   ;;  %v4502_v48 = vld [vmem:[#allocation14 + $0x840] ss:$8 sps:$4 sm:$0xff]  }
 0x9fd   :  { %v1855_v52 = vpack.c.bf16 %v1817_v42, %v1817_v42  ;;  %v4504_v42 = vld [vmem:[#allocation14 + $0x844] ss:$8 sps:$4 sm:$0xff]   ;;  %v4507_v50 = vld [vmem:[#allocation14 + $0x854] ss:$8 sps:$4 sm:$0xff]  }
 0x9ff   :  { %2061 = vmatprep.mubr.bf16.mxu0 %v1855_v52  ;;  %v4505_v52 = vld [vmem:[#allocation14 + $0x850] ss:$8 sps:$4 sm:$0xff]  }
 0xa00   :  { %2062 = vmatmul.mubr.bf16.vlgmr.msra.gmra.mrb[12].mxu0 %v1854_v53  ;;  %v4510_v53 = vld [vmem:[#allocation14 + $0x864] ss:$8 sps:$4 sm:$0xff]  }
 0xa01   :  { %2550 = vmatpush1.bf16.msra.mxu0 %v4490_v38 }
 0xa02   :  { %2551 = vmatprep.subr.bf16.mxu0 %v4495_v40 }
 0xa05   :  { %2552 = vmatpush1.bf16.msra.mxu0 %v4493_v41 }
 0xa06   :  { %2553 = vmatprep.subr.bf16.mxu0 %v4498_v43 }
 0xa09   :  { %2554 = vmatpush1.bf16.msra.mxu0 %v4496_v44 }
 0xa0a   :  { %2555 = vmatprep.subr.bf16.mxu0 %v4501_v45 }
 0xa0d   :  { %2556 = vmatpush1.bf16.msra.mxu0 %v4499_v47 }
 0xa0e   :  { %2557 = vmatprep.subr.bf16.mxu0 %v4504_v42 }
 0xa11   :  { %2558 = vmatpush1.bf16.msra.mxu0 %v4502_v48 }
 0xa12   :  { %2559 = vmatprep.subr.bf16.mxu0 %v4507_v50 }
 0xa15   :  { %2560 = vmatpush1.bf16.msra.mxu0 %v4505_v52 }
 0xa16   :  { %2561 = vmatprep.subr.bf16.mxu0 %v4510_v53 }
 0xa19   :  { %2562 = vmatpush1.bf16.msra.mxu0 %v4508_v46 }
 0xad3   :  { %v2063_v56 = vpop.f32.mrb[12].mxu0 }
 0xad4   :  { %v2064_v57 = vadd.f32 %v2063_v56, %v1862_v54  ;;  %v2065_v58 = vpop.f32.mrb[13].mxu0  ;;  %v4513_v54 = vld [vmem:[#allocation14 + $0x874] ss:$8 sps:$4 sm:$0xff]   ;;  %v4516_v56 = vld [vmem:[#allocation14 + $0x884] ss:$8 sps:$4 sm:$0xff]  }
 0xad5   :  { %v2066_v59 = vadd.f32 %v2065_v58, %v1866_v55  ;;  %v2067_v60 = vpop.f32.mrb[14].mxu0  ;;  %v4511_v55 = vld [vmem:[#allocation14 + $0x870] ss:$8 sps:$4 sm:$0xff]   ;;  %2563 = vmatprep.subr.bf16.mxu0 %v4513_v54  ;;  %v4519_v58 = vld [vmem:[#allocation14 + $0x894] ss:$8 sps:$4 sm:$0xff]  }
 0xad6   :  { %v2068_v61 = vpop.f32.mrb[15].mxu0  ;;  %2070 = vadd.xlane.f32.xlu0 %v2064_v57  ;;  %2564 = vmatpush1.bf16.msra.mxu0 %v4511_v55  ;;  %v4522_v60 = vld [vmem:[#allocation14 + $0x8a4] ss:$8 sps:$4 sm:$0xff]  }
 0xad7   :  { %2081 = vadd.xlane.f32.xlu1 %v2066_v59  ;;  %2565 = vmatprep.subr.bf16.mxu0 %v4516_v56  ;;  %v4520_v61 = vld [vmem:[#allocation14 + $0x8a0] ss:$8 sps:$4 sm:$0xff]  }
 0xb63   :  { %v2071_v21 = vpop.xlane.xlu0 %2070 }
 0xb64   :  { %v2072_v22 = vmul.f32 0.0078125, %v2071_v21  ;;  %v2082_v24 = vpop.xlane.xlu1 %2081  ;;  %v2128_v21 = vld [vmem:[#allocation15 + $0xe] sm:$0x3] }
 0xb65   :  { %v2083_v25 = vmul.f32 0.0078125, %v2082_v24  ;;  %v2137_v24 = vrot.slane %v2128_v21, %v5133_v49 }
 0xb66   :  { %v5181_v19 = vsub.f32 %v2064_v57, %v2072_v22  ;;  %v4514_v57 = vld [vmem:[#allocation14 + $0x880] ss:$8 sps:$4 sm:$0xff]   ;;  %v2133_v22 = vrot.slane %v2128_v21, %v5135_v51 }
 0xb67   :  { %v5183_v26 = vsub.f32 %v2066_v59, %v2083_v25  ;;  %2566 = vmatpush1.bf16.msra.mxu0 %v4514_v57  ;;  %v4517_v59 = vld [vmem:[#allocation14 + $0x890] ss:$8 sps:$4 sm:$0xff]  }
 0xb68   :  { %v2074_v27 = vmul.f32 %v5181_v19, %v5181_v19  ;;  %2567 = vmatprep.subr.bf16.mxu0 %v4519_v58 }
 0xb69   :  { %v2085_v28 = vmul.f32 %v5183_v26, %v5183_v26 }
 0xb6a   :  { %2075 = vadd.xlane.f32.xlu0 %v2074_v27 }
 0xb6b   :  { %2086 = vadd.xlane.f32.xlu1 %v2085_v28  ;;  %2568 = vmatpush1.bf16.msra.mxu0 %v4517_v59 }
 0xb6c   :  { %2569 = vmatprep.subr.bf16.mxu0 %v4522_v60 }
 0xb6f   :  { %2570 = vmatpush1.bf16.msra.mxu0 %v4520_v61 }
 0xb70   :  { %2571 = vmatprep.subr.bf16.mxu0 %v4525_v62 }
 0xb73   :  { %2572 = vmatpush1.bf16.msra.mxu0 %v4523_v63 }
 0xb74   :  { %2573 = vmatprep.subr.bf16.mxu0 %v4528_v1 }
 0xb77   :  { %2574 = vmatpush1.bf16.msra.mxu0 %v4526_v2 }
 0xb78   :  { %2575 = vmatprep.subr.bf16.mxu0 %v4531_v3 }
 0xb7b   :  { %2576 = vmatpush1.bf16.msra.mxu0 %v4529_v5 }
 0xb7c   :  { %2577 = vmatprep.subr.bf16.mxu0 %v4534_v0 }
 0xb7f   :  { %2578 = vmatpush1.bf16.msra.mxu0 %v4532_v6 }
 0xb80   :  { %2579 = vmatprep.subr.bf16.mxu0 %v4537_v18 }
 0xb83   :  { %2580 = vmatpush1.bf16.msra.mxu0 %v4535_v20 }
 0xbf7   :  { %v2076_v7 = vpop.xlane.xlu0 %2075 }
 0xbf8   :  { %v2077_v8 = vmul.f32 0.0078125, %v2076_v7  ;;  %v2087_v9 = vpop.xlane.xlu1 %2086 }
 0xbf9   :  { %v2088_v4 = vmul.f32 0.0078125, %v2087_v9 }
 0xbfa   :  { %v2078_v10 = vadd.f32 1e-05, %v2077_v8 }
 0xbfb   :  { %v2089_v11 = vadd.f32 1e-05, %v2088_v4 }
 0xbfc   :  { %4550 = vrsqrt.f32 %v2078_v10 }
 0xbfd   :  { %4552 = vrsqrt.f32 %v2089_v11 }
 0xc06   :  { %v4551_v12 = vpop.eup %4550 }
 0xc07   :  { %v4553_v13 = vpop.eup %4552  ;;  %v2080_v14 = vmul.f32 %v4551_v12, %v5181_v19 }
 0xc08   :  { %v2091_v15 = vmul.f32 %v4553_v13, %v5183_v26 }
 0xc09   :  { %v2125_v17 = vpack.c.bf16 %v2080_v14, %v2080_v14 }
 0xc0a   :  { %v2126_v16 = vpack.c.bf16 %v2091_v15, %v2091_v15 }
 0xc0c   :  { %2332 = vmatprep.mubr.bf16.mxu1 %v2126_v16 }
 0xc0d   :  { %2333 = vmatmul.mubr.bf16.vlgmr.msra.gmra.mrb[12].mxu1 %v2125_v17 }
 0xce0   :  { %v2334_v25 = vpop.f32.mrb[12].mxu1 }
 0xce1   :  { %v2335_v27 = vadd.f32 %v2334_v25, %v2133_v22  ;;  %v2336_v28 = vpop.f32.mrb[13].mxu1 }
 0xce2   :  { %v2337_v29 = vadd.f32 %v2336_v28, %v2137_v24  ;;  %v2338_v19 = vpop.f32.mrb[14].mxu1 }
 0xce3   :  { %v2339_v23 = vpop.f32.mrb[15].mxu1  ;;  %v2374_v30 = vpack.c.bf16 %v2335_v27, %v2335_v27 }
 0xce4   :  { %v2375_v26 = vpack.c.bf16 %v2337_v29, %v2337_v29 }
 0xce6   :  { %2581 = vmatprep.mubr.bf16.mxu0 %v2375_v26 }
 0xce7   :  { %2582 = vmatmul.mubr.bf16.vlgmr.msra.gmra.mrb[16].mxu0 %v2374_v30 }
 0xce8   :  { %4769 = shalt.err (!%p4766_p4)  }
 0xce9   :  { %s4770_s27 = scalar_lea.vmem %s203_s11, 2048  ;;  %p4775_p6 = scmp.lt.s32.totalorder %s203_s11, %s203_s11 }
 0xcea   :  { %p4771_p5 = scmp.ne.s32.totalorder %s203_s11, %s4770_s27  ;;  %p4776_p7 = scmp.lt.s32.totalorder %s4770_s27, %s4770_s27 }
 0xcec   :  { %p4777_p8 = por %p4776_p7, %p4775_p6 }
 0xcee   :  { %p4778_p9 = pnand %p4777_p8, %p4771_p5 }
 0xcf0   :  { %4781 = shalt.err (!%p4778_p9)  }
 0xcf1   :  { %205 = dma.hbm_to_vmem [thread:$0]  %s5377_s12, 2048, %s203_s11, [#allocation5 + $0x1] }
 0xcf2   :  { %s4782_s28 = scalar_lea.hbm %s5378_s13, 9216 }
 0xcf3   :  { %p4783_p10 = scmp.ne.s32.totalorder %s5378_s13, %s4782_s28  ;;  %p4786_p11 = scmp.lt.u32.totalorder %s4782_s28, %s5378_s13 }
 0xcf5   :  { %p4788_p12 = pnand %p4786_p11, %p4783_p10 }
 0xcf7   :  { %4791 = shalt.err (!%p4788_p12)  }
 0xcf8   :  { %s4792_s22 = scalar_lea.vmem %s215_s23, 9216  ;;  %p4797_p0 = scmp.lt.s32.totalorder %s215_s23, %s215_s23 }
 0xcf9   :  { %p4793_p13 = scmp.ne.s32.totalorder %s215_s23, %s4792_s22  ;;  %p4798_p1 = scmp.lt.s32.totalorder %s4792_s22, %s4792_s22 }
 0xcfb   :  { %p4799_p2 = por %p4798_p1, %p4797_p0 }
 0xcfd   :  { %p4800_p3 = pnand %p4799_p2, %p4793_p13 }
 0xcff   :  { %4803 = shalt.err (!%p4800_p3)  }
 0xd00   :  { %217 = dma.hbm_to_vmem [thread:$0]  %s5378_s13, 9216, %s215_s23, [#allocation5 + $0x2]  ;;  %v2377_v31 = vld [vmem:[#allocation15 + $0x10] sm:$0x3] }
 0xd01   :  { %v2382_v32 = vrot.slane %v2377_v31, %v5135_v51  ;;  %v2386_v33 = vrot.slane %v2377_v31, %v5133_v49 }
 0xdba   :  { %v2583_v34 = vpop.f32.mrb[16].mxu0 }
 0xdbb   :  { %v5219_v35 = vadd.f32 %v2583_v34, %v2382_v32  ;;  %v2585_v36 = vpop.f32.mrb[17].mxu0 }
 0xdbc   :  { %v5221_v37 = vadd.f32 %v2585_v36, %v2386_v33  ;;  %v2587_v38 = vpop.f32.mrb[18].mxu0 }
 0xdbd   :  { %2590 = vst [vmem:[#allocation21] sm:$0xff] %v5219_v35  ;;  %v2588_v39 = vpop.f32.mrb[19].mxu0 }
 0xdbe   :  { %2591 = vst [vmem:[#allocation22] sm:$0xff] %v5221_v37 }
 0xdbf   :  { %4880 = dma.done.wait [#allocation5], 8192 }
 0xdc0   :  { %4881 = vsyncadd [#allocation5], 4294959104 }
 0xdc1   :  { %4882 = dma.done.wait [#allocation5 + $0x1], 2048 }
 0xdc2   :  { %4883 = vsyncadd [#allocation5 + $0x1], 4294965248 }
 0xdc3   :  { %4884 = dma.done.wait [#allocation5 + $0x2], 9216 }
 0xdc4   :  { %4885 = vsyncadd [#allocation5 + $0x2], 4294958080  ;;  %v2639_v40 = vpack.c.bf16 %v5221_v37, %v5221_v37  ;;  %v2607_v41 = vld [vmem:[#allocation2 + $0x8] sm:$0xff]  ;;  %v2606_v43 = vld [vmem:[#allocation2] sm:$0xff]  ;;  %vm4915_vm0 = vmmov 0   ;;  %s4916_s13 = smov [#allocation22]  }
 0xdc5   :  { %v2609_v44 = vld [vmem:[#allocation2 + $0x18] sm:$0xff]  ;;  %2652 = vmatprep.subr.bf16.mxu1 %v2607_v41  ;;  %v2608_v45 = vld [vmem:[#allocation2 + $0x10] sm:$0xff]  ;;  %v2611_v47 = vld [vmem:[#allocation2 + $0x28] sm:$0xff]  ;;  %s3436_s20 = sshll.u32 %s4916_s13, 4  ;;  %s4917_s2 = smov [#allocation21]   ;;  %s3437_s20 = int_to_ptr.vmem [resolvable:$true] %s3436_s20 }
 0xdc6   :  { %2684 = vmatprep.mubr.bf16.mxu1 %v2639_v40  ;;  %2653 = vmatpush1.bf16.msra.mxu1 %v2606_v43  ;;  %v2610_v42 = vld [vmem:[#allocation2 + $0x20] sm:$0xff]  ;;  %v2613_v48 = vld [vmem:[#allocation2 + $0x38] sm:$0xff]  ;;  %v2699_v50 = vld [vmem:[#allocation2 + $0x108] sm:$0xff]  ;;  %v2638_v40 = vpack.c.bf16 %v5219_v35, %v5219_v35  ;;  %s3426_s24 = sshll.u32 %s4917_s2, 4  ;;  %s4804_s1 = scalar_lea.vmem %s3437_s20, 128  ;;  %s3427_s24 = int_to_ptr.vmem [resolvable:$true] %s3426_s24 }
 0xdc7   :  { %2654 = vmatprep.subr.bf16.mxu1 %v2609_v44  ;;  %v2612_v52 = vld [vmem:[#allocation2 + $0x30] sm:$0xff]  ;;  %2745 = vmatprep.subr.bf16.mxu0 %v2699_v50  ;;  %v2698_v53 = vld [vmem:[#allocation2 + $0x100] sm:$0xff]  ;;  %v2701_v46 = vld [vmem:[#allocation2 + $0x118] sm:$0xff]  ;;  %p4805_p4 = scmp.ne.s32.totalorder %s3437_s20, %s4804_s1  ;;  %p4809_p5 = scmp.lt.s32.totalorder %s3437_s20, %s3437_s20 }
 0xdc8   :  { %v2615_v54 = vld [vmem:[#allocation2 + $0x48] sm:$0xff]  ;;  %2746 = vmatpush1.bf16.msra.mxu0 %v2698_v53  ;;  %v2700_v55 = vld [vmem:[#allocation2 + $0x110] sm:$0xff]  ;;  %v2614_v57 = vld [vmem:[#allocation2 + $0x40] sm:$0xff]  ;;  %p4810_p6 = scmp.lt.s32.totalorder %s4804_s1, %s4804_s1 }
 0xdc9   :  { %2747 = vmatprep.subr.bf16.mxu0 %v2701_v46  ;;  %v2703_v56 = vld [vmem:[#allocation2 + $0x128] sm:$0xff]  ;;  %v2617_v58 = vld [vmem:[#allocation2 + $0x58] sm:$0xff]  ;;  %v2702_v59 = vld [vmem:[#allocation2 + $0x120] sm:$0xff] }
 0xdca   :  { %2655 = vmatpush1.bf16.msra.mxu1 %v2608_v45  ;;  %v2705_v60 = vld [vmem:[#allocation2 + $0x138] sm:$0xff]  ;;  %v2616_v61 = vld [vmem:[#allocation2 + $0x50] sm:$0xff]  ;;  %v2619_v62 = vld [vmem:[#allocation2 + $0x68] sm:$0xff]  ;;  %p4811_p7 = por %p4810_p6, %p4809_p5 }
 0xdcb   :  { %2656 = vmatprep.subr.bf16.mxu1 %v2611_v47  ;;  %v2704_v63 = vld [vmem:[#allocation2 + $0x130] sm:$0xff]  ;;  %v2707_v1 = vld [vmem:[#allocation2 + $0x148] sm:$0xff]  ;;  %v2618_v2 = vld [vmem:[#allocation2 + $0x60] sm:$0xff] }
 0xdcc   :  { %2748 = vmatpush1.bf16.msra.mxu0 %v2700_v55  ;;  %v2621_v3 = vld [vmem:[#allocation2 + $0x78] sm:$0xff]  ;;  %v2706_v5 = vld [vmem:[#allocation2 + $0x140] sm:$0xff]  ;;  %v2620_v6 = vld [vmem:[#allocation2 + $0x70] sm:$0xff]  ;;  %p4812_p8 = pnand %p4811_p7, %p4805_p4 }
 0xdcd   :  { %2749 = vmatprep.subr.bf16.mxu0 %v2703_v56  ;;  %v2709_v0 = vld [vmem:[#allocation2 + $0x158] sm:$0xff]  ;;  %v2623_v7 = vld [vmem:[#allocation2 + $0x88] sm:$0xff]  ;;  %v2708_v8 = vld [vmem:[#allocation2 + $0x150] sm:$0xff] }
 0xdce   :  { %2657 = vmatpush1.bf16.msra.mxu1 %v2610_v42  ;;  %v2711_v9 = vld [vmem:[#allocation2 + $0x168] sm:$0xff]  ;;  %v2622_v4 = vld [vmem:[#allocation2 + $0x80] sm:$0xff]  ;;  %v2625_v10 = vld [vmem:[#allocation2 + $0x98] sm:$0xff] }
 0xdcf   :  { %2658 = vmatprep.subr.bf16.mxu1 %v2613_v48  ;;  %v2710_v11 = vld [vmem:[#allocation2 + $0x160] sm:$0xff]  ;;  %v2713_v12 = vld [vmem:[#allocation2 + $0x178] sm:$0xff]  ;;  %v2624_v13 = vld [vmem:[#allocation2 + $0x90] sm:$0xff] }
 0xdd0   :  { %2750 = vmatpush1.bf16.msra.mxu0 %v2702_v59  ;;  %v2627_v14 = vld [vmem:[#allocation2 + $0xa8] sm:$0xff]  ;;  %v2712_v15 = vld [vmem:[#allocation2 + $0x170] sm:$0xff]  ;;  %v2626_v17 = vld [vmem:[#allocation2 + $0xa0] sm:$0xff] }
 0xdd1   :  { %2751 = vmatprep.subr.bf16.mxu0 %v2705_v60  ;;  %v2715_v16 = vld [vmem:[#allocation2 + $0x188] sm:$0xff]  ;;  %v2629_v18 = vld [vmem:[#allocation2 + $0xb8] sm:$0xff]  ;;  %v2714_v20 = vld [vmem:[#allocation2 + $0x180] sm:$0xff] }
 0xdd2   :  { %2659 = vmatpush1.bf16.msra.mxu1 %v2612_v52  ;;  %v2717_v21 = vld [vmem:[#allocation2 + $0x198] sm:$0xff]  ;;  %v2628_v22 = vld [vmem:[#allocation2 + $0xb0] sm:$0xff]  ;;  %v2631_v24 = vld [vmem:[#allocation2 + $0xc8] sm:$0xff] }
 0xdd3   :  { %2660 = vmatprep.subr.bf16.mxu1 %v2615_v54  ;;  %v2716_v25 = vld [vmem:[#allocation2 + $0x190] sm:$0xff]  ;;  %v2719_v27 = vld [vmem:[#allocation2 + $0x1a8] sm:$0xff]  ;;  %v2630_v28 = vld [vmem:[#allocation2 + $0xc0] sm:$0xff] }
 0xdd4   :  { %2752 = vmatpush1.bf16.msra.mxu0 %v2704_v63  ;;  %v2633_v29 = vld [vmem:[#allocation2 + $0xd8] sm:$0xff]  ;;  %v2718_v19 = vld [vmem:[#allocation2 + $0x1a0] sm:$0xff]  ;;  %v2632_v26 = vld [vmem:[#allocation2 + $0xd0] sm:$0xff] }
 0xdd5   :  { %2753 = vmatprep.subr.bf16.mxu0 %v2707_v1  ;;  %v2721_v23 = vld [vmem:[#allocation2 + $0x1b8] sm:$0xff]  ;;  %v2635_v30 = vld [vmem:[#allocation2 + $0xe8] sm:$0xff]  ;;  %v2720_v31 = vld [vmem:[#allocation2 + $0x1b0] sm:$0xff] }
 0xdd6   :  { %2661 = vmatpush1.bf16.msra.mxu1 %v2614_v57  ;;  %v2723_v32 = vld [vmem:[#allocation2 + $0x1c8] sm:$0xff]  ;;  %v2634_v33 = vld [vmem:[#allocation2 + $0xe0] sm:$0xff]  ;;  %v2637_v34 = vld [vmem:[#allocation2 + $0xf8] sm:$0xff] }
 0xdd7   :  { %2662 = vmatprep.subr.bf16.mxu1 %v2617_v58  ;;  %v2722_v36 = vld [vmem:[#allocation2 + $0x1c0] sm:$0xff]  ;;  %v2725_v38 = vld [vmem:[#allocation2 + $0x1d8] sm:$0xff]  ;;  %v2636_v39 = vld [vmem:[#allocation2 + $0xf0] sm:$0xff] }
 0xdd8   :  { %2754 = vmatpush1.bf16.msra.mxu0 %v2706_v5  ;;  %v2724_v41 = vld [vmem:[#allocation2 + $0x1d0] sm:$0xff]  ;;  %v2727_v43 = vld [vmem:[#allocation2 + $0x1e8] sm:$0xff]  ;;  %v2726_v44 = vld [vmem:[#allocation2 + $0x1e0] sm:$0xff] }
 0xdd9   :  { %2755 = vmatprep.subr.bf16.mxu0 %v2709_v0  ;;  %v2729_v45 = vld [vmem:[#allocation2 + $0x1f8] sm:$0xff]  ;;  %v2728_v47 = vld [vmem:[#allocation2 + $0x1f0] sm:$0xff]  ;;  %v2798_v42 = vld [vmem:[#allocation3 + $0x40] sm:$0xff] }
 0xdda   :  { %2663 = vmatpush1.bf16.msra.mxu1 %v2616_v61  ;;  %v2790_v48 = vld [vmem:[#allocation3] sm:$0xff]  ;;  %v2799_v50 = vld [vmem:[#allocation3 + $0x48] sm:$0xff]  ;;  %v2800_v53 = vld [vmem:[#allocation3 + $0x50] sm:$0xff] }
 0xddb   :  { %2664 = vmatprep.subr.bf16.mxu1 %v2619_v62  ;;  %v2791_v52 = vld [vmem:[#allocation3 + $0x8] sm:$0xff]  ;;  %v2792_v46 = vld [vmem:[#allocation3 + $0x10] sm:$0xff]  ;;  %v2801_v54 = vld [vmem:[#allocation3 + $0x58] sm:$0xff] }
 0xddc   :  { %2756 = vmatpush1.bf16.msra.mxu0 %v2708_v8  ;;  %v2793_v55 = vld [vmem:[#allocation3 + $0x18] sm:$0xff]  ;;  %v2802_v56 = vld [vmem:[#allocation3 + $0x60] sm:$0xff]  ;;  %v2803_v58 = vld [vmem:[#allocation3 + $0x68] sm:$0xff] }
 0xddd   :  { %2757 = vmatprep.subr.bf16.mxu0 %v2711_v9  ;;  %v2794_v57 = vld [vmem:[#allocation3 + $0x20] sm:$0xff]  ;;  %v2640_v59 = vld [vmem:[#allocation17] sm:$0x3] }
 0xdde   :  { %2665 = vmatpush1.bf16.msra.mxu1 %v2618_v2  ;;  %v2645_v60 = vrot.slane %v2640_v59, %v5135_v51  ;;  %v2649_v61 = vrot.slane %v2640_v59, %v5133_v49 }
 0xddf   :  { %2666 = vmatprep.subr.bf16.mxu1 %v2621_v3 }
 0xde0   :  { %2758 = vmatpush1.bf16.msra.mxu0 %v2710_v11  ;;  %v2804_v11 = vld [vmem:[#allocation3 + $0x70] sm:$0xff] }
 0xde1   :  { %2759 = vmatprep.subr.bf16.mxu0 %v2713_v12  ;;  %v2796_v12 = vld [vmem:[#allocation3 + $0x30] sm:$0xff] }
 0xde2   :  { %2667 = vmatpush1.bf16.msra.mxu1 %v2620_v6 }
 0xde3   :  { %2668 = vmatprep.subr.bf16.mxu1 %v2623_v7 }
 0xde4   :  { %2760 = vmatpush1.bf16.msra.mxu0 %v2712_v15  ;;  %v4914_v15 = vmov 0.0  }
 0xde5   :  { %2761 = vmatprep.subr.bf16.mxu0 %v2715_v16  ;;  %v2733_v16 = vld [vmem:[#allocation17 + $0x2] sm:$0x3] }
 0xde6   :  { %2669 = vmatpush1.bf16.msra.mxu1 %v2622_v4 }
 0xde7   :  { %2670 = vmatprep.subr.bf16.mxu1 %v2625_v10  ;;  %v2795_v10 = vld [vmem:[#allocation3 + $0x28] sm:$0xff] }
 0xde8   :  { %2762 = vmatpush1.bf16.msra.mxu0 %v2714_v20 }
 0xde9   :  { %2763 = vmatprep.subr.bf16.mxu0 %v2717_v21 }
 0xdea   :  { %2671 = vmatpush1.bf16.msra.mxu1 %v2624_v13  ;;  %v2805_v13 = vld [vmem:[#allocation3 + $0x78] sm:$0xff] }
 0xdeb   :  { %2672 = vmatprep.subr.bf16.mxu1 %v2627_v14  ;;  %v2797_v14 = vld [vmem:[#allocation3 + $0x38] sm:$0xff] }
 0xdec   :  { %2764 = vmatpush1.bf16.msra.mxu0 %v2716_v25 }
 0xded   :  { %2765 = vmatprep.subr.bf16.mxu0 %v2719_v27 }
 0xdee   :  { %2673 = vmatpush1.bf16.msra.mxu1 %v2626_v17  ;;  %v2738_v17 = vrot.slane %v2733_v16, %v5135_v51  ;;  %v2857_v51 = vld [vmem:[#allocation4 + $0x10] sm:$0xff] }
 0xdef   :  { %2674 = vmatprep.subr.bf16.mxu1 %v2629_v18  ;;  %v2742_v18 = vrot.slane %v2733_v16, %v5133_v49  ;;  %v2856_v49 = vld [vmem:[#allocation4 + $0x8] sm:$0xff]  ;;  %v3782_v16 = vld [vmem:[#allocation20 + $0x1] ss:$0 sm:$0xff] }
 0xdf0   :  { %2766 = vmatpush1.bf16.msra.mxu0 %v2718_v19 }
 0xdf1   :  { %2767 = vmatprep.subr.bf16.mxu0 %v2721_v23 }
 0xdf2   :  { %2675 = vmatpush1.bf16.msra.mxu1 %v2628_v22 }
 0xdf3   :  { %2676 = vmatprep.subr.bf16.mxu1 %v2631_v24 }
 0xdf4   :  { %2768 = vmatpush1.bf16.msra.mxu0 %v2720_v31  ;;  %v2855_v31 = vld [vmem:[#allocation4] sm:$0xff] }
 0xdf5   :  { %2769 = vmatprep.subr.bf16.mxu0 %v2723_v32  ;;  %v2860_v32 = vld [vmem:[#allocation4 + $0x28] sm:$0xff] }
 0xdf6   :  { %2677 = vmatpush1.bf16.msra.mxu1 %v2630_v28 }
 0xdf7   :  { %2678 = vmatprep.subr.bf16.mxu1 %v2633_v29 }
 0xdf8   :  { %2770 = vmatpush1.bf16.msra.mxu0 %v2722_v36 }
 0xdf9   :  { %2771 = vmatprep.subr.bf16.mxu0 %v2725_v38  ;;  %v3780_v38 = vld [vmem:[#allocation18] ss:$0 sm:$0xff] }
 0xdfa   :  { %2679 = vmatpush1.bf16.msra.mxu1 %v2632_v26 }
 0xdfb   :  { %2680 = vmatprep.subr.bf16.mxu1 %v2635_v30 }
 0xdfc   :  { %2772 = vmatpush1.bf16.msra.mxu0 %v2724_v41 }
 0xdfd   :  { %2773 = vmatprep.subr.bf16.mxu0 %v2727_v43 }
 0xdfe   :  { %2681 = vmatpush1.bf16.msra.mxu1 %v2634_v33  ;;  %v2861_v33 = vld [vmem:[#allocation4 + $0x30] sm:$0xff] }
 0xdff   :  { %2682 = vmatprep.subr.bf16.mxu1 %v2637_v34  ;;  %v2862_v34 = vld [vmem:[#allocation4 + $0x38] sm:$0xff] }
 0xe00   :  { %2774 = vmatpush1.bf16.msra.mxu0 %v2726_v44 }
 0xe01   :  { %2775 = vmatprep.subr.bf16.mxu0 %v2729_v45 }
 0xe02   :  { %2683 = vmatpush1.bf16.msra.mxu1 %v2636_v39 }
 0xe03   :  { %3793 = vmatprep.subr.bf16.mxu1 %v2798_v42 }
 0xe04   :  { %2776 = vmatpush1.bf16.msra.mxu0 %v2728_v47  ;;  %v3781_v47 = vld [vmem:[#allocation20] ss:$0 sm:$0xff] }
 0xe05   :  { %2685 = vmatmul.mubr.bf16.vlgmr.msra.gmra.mrb[16].mxu1 %v2638_v40  ;;  %3916 = vmatprep.subr.bf16.mxu0 %v4914_v15 }
 0xe06   :  { %3794 = vmatpush3.bf16.msra.mxu1 %v2790_v48 }
 0xe07   :  { %3795 = vmatprep.subr.bf16.mxu1 %v2799_v50 }
 0xe0a   :  { %3796 = vmatpush3.bf16.msra.mxu1 %v2791_v52 }
 0xe0b   :  { %3797 = vmatprep.subr.bf16.mxu1 %v2800_v53 }
 0xe0e   :  { %3798 = vmatpush3.bf16.msra.mxu1 %v2792_v46  ;;  %v2923_v46 = vld [vmem:[#allocation4 + $0x40] sm:$0xff] }
 0xe0f   :  { %3799 = vmatprep.subr.bf16.mxu1 %v2801_v54  ;;  %v2924_v54 = vld [vmem:[#allocation4 + $0x48] sm:$0xff] }
 0xe12   :  { %3800 = vmatpush3.bf16.msra.mxu1 %v2793_v55  ;;  %v2925_v55 = vld [vmem:[#allocation4 + $0x50] sm:$0xff] }
 0xe13   :  { %3801 = vmatprep.subr.bf16.mxu1 %v2802_v56 }
 0xe16   :  { %3802 = vmatpush3.bf16.msra.mxu1 %v2794_v57 }
 0xe17   :  { %3803 = vmatprep.subr.bf16.mxu1 %v2803_v58 }
 0xe1a   :  { %3804 = vmatpush3.bf16.msra.mxu1 %v2795_v10 }
 0xe1b   :  { %3805 = vmatprep.subr.bf16.mxu1 %v2804_v11 }
 0xe1e   :  { %3806 = vmatpush3.bf16.msra.mxu1 %v2796_v12 }
 0xe1f   :  { %3807 = vmatprep.subr.bf16.mxu1 %v2805_v13 }
 0xe22   :  { %3808 = vmatpush3.bf16.msra.mxu1 %v2797_v14  ;;  %v2988_v14 = vld [vmem:[#allocation4 + $0xb8] sm:$0xff] }
 0xe23   :  { %3896 = vmatprep.subr.bf16.mxu1 %v4914_v15 }
 0xed8   :  { %v2686_v62 = vpop.f32.mrb[16].mxu1 }
 0xed9   :  { %v2687_v63 = vadd.f32 %v2686_v62, %v2645_v60  ;;  %v2688_v1 = vpop.f32.mrb[17].mxu1  ;;  %v2926_v60 = vld [vmem:[#allocation4 + $0x58] sm:$0xff]  ;;  %v2928_v62 = vld [vmem:[#allocation4 + $0x68] sm:$0xff] }
 0xeda   :  { %v2689_v2 = vadd.f32 %v2688_v1, %v2649_v61  ;;  %v2690_v3 = vpop.f32.mrb[18].mxu1  ;;  %v2927_v61 = vld [vmem:[#allocation4 + $0x60] sm:$0xff]  ;;  %v2930_v1 = vld [vmem:[#allocation4 + $0x78] sm:$0xff] }
 0xedb   :  { %v2693_v5 = vmul.f32 %v2687_v63, %v5219_v35  ;;  %v2691_v0 = vpop.f32.mrb[19].mxu1  ;;  %v2929_v63 = vld [vmem:[#allocation4 + $0x70] sm:$0xff]  ;;  %v2982_v3 = vld [vmem:[#allocation4 + $0x88] sm:$0xff] }
 0xedc   :  { %v2694_v6 = vmul.f32 %v2689_v2, %v5221_v37  ;;  %v2981_v2 = vld [vmem:[#allocation4 + $0x80] sm:$0xff]  ;;  %v2984_v0 = vld [vmem:[#allocation4 + $0x98] sm:$0xff] }
 0xedd   :  { %v2695_v7 = vadd.f32 %v2693_v5, %v5219_v35  ;;  %v2983_v5 = vld [vmem:[#allocation4 + $0x90] sm:$0xff] }
 0xede   :  { %v2696_v8 = vadd.f32 %v2694_v6, %v5221_v37  ;;  %v2985_v6 = vld [vmem:[#allocation4 + $0xa0] sm:$0xff] }
 0xedf   :  { %v2730_v4 = vpack.c.bf16 %v2695_v7, %v2695_v7 }
 0xee0   :  { %v2731_v9 = vpack.c.bf16 %v2696_v8, %v2696_v8 }
 0xee2   :  { %2777 = vmatprep.mubr.bf16.mxu0 %v2731_v9 }
 0xee3   :  { %2778 = vmatmul.mubr.bf16.vlgmr.msra.gmra.mrb[20].mxu0 %v2730_v4 }
 0xee4   :  { %3932 = vmatprep.mubr.msk.bf16.mxu0 %vm4915_vm0, %v4914_v15  ;;  %3917 = vmatpush3.bf16.msra.mxu0 %v2923_v46 }
 0xee5   :  { %3918 = vmatprep.subr.bf16.mxu0 %v4914_v15 }
 0xee8   :  { %3919 = vmatpush3.bf16.msra.mxu0 %v2924_v54  ;;  %v3115_v54 = vld [vmem:[#allocation4 + $0x138] sm:$0xff] }
 0xee9   :  { %3920 = vmatprep.subr.bf16.mxu0 %v4914_v15 }
 0xeec   :  { %3921 = vmatpush3.bf16.msra.mxu0 %v2925_v55  ;;  %v3784_v55 = vld [vmem:[#allocation20 + $0x3] ss:$0 sm:$0xff] }
 0xeed   :  { %3922 = vmatprep.subr.bf16.mxu0 %v4914_v15 }
 0xef0   :  { %3923 = vmatpush3.bf16.msra.mxu0 %v2926_v60 }
 0xef1   :  { %3924 = vmatprep.subr.bf16.mxu0 %v4914_v15 }
 0xef4   :  { %3925 = vmatpush3.bf16.msra.mxu0 %v2927_v61 }
 0xef5   :  { %3926 = vmatprep.subr.bf16.mxu0 %v4914_v15 }
 0xef8   :  { %3927 = vmatpush3.bf16.msra.mxu0 %v2928_v62  ;;  %v3785_v62 = vld [vmem:[#allocation20 + $0x4] ss:$0 sm:$0xff] }
 0xef9   :  { %3928 = vmatprep.subr.bf16.mxu0 %v4914_v15 }
 0xefc   :  { %3929 = vmatpush3.bf16.msra.mxu0 %v2929_v63 }
 0xefd   :  { %3930 = vmatprep.subr.bf16.mxu0 %v4914_v15 }
 0xf00   :  { %3931 = vmatpush3.bf16.msra.mxu0 %v2930_v1 }
 0xf01   :  { %3956 = vmatprep.subr.bf16.mxu0 %v4914_v15 }
 0xfb6   :  { %v2779_v20 = vpop.f32.mrb[20].mxu0 }
 0xfb7   :  { %v2780_v21 = vadd.f32 %v2779_v20, %v2738_v17  ;;  %v2781_v22 = vpop.f32.mrb[21].mxu0 }
 0xfb8   :  { %v2782_v24 = vadd.f32 %v2781_v22, %v2742_v18  ;;  %v2783_v25 = vpop.f32.mrb[22].mxu0 }
 0xfb9   :  { %v2786_v27 = vmul.f32 %v2780_v21, %v5219_v35  ;;  %v2784_v28 = vpop.f32.mrb[23].mxu0  ;;  %v2858_v35 = vld [vmem:[#allocation4 + $0x18] sm:$0xff]  ;;  %v3783_v25 = vld [vmem:[#allocation20 + $0x2] ss:$0 sm:$0xff] }
 0xfba   :  { %v2787_v29 = vmul.f32 %v2782_v24, %v5221_v37  ;;  %v2859_v37 = vld [vmem:[#allocation4 + $0x20] sm:$0xff] }
 0xfbb   :  { %v2788_v19 = vadd.f32 %v2786_v27, %v2695_v7  ;;  %v2986_v7 = vld [vmem:[#allocation4 + $0xa8] sm:$0xff] }
 0xfbc   :  { %v2789_v23 = vadd.f32 %v2787_v29, %v2696_v8  ;;  %v2987_v8 = vld [vmem:[#allocation4 + $0xb0] sm:$0xff] }
 0xfbd   :  { %v2806_v30 = vpack.c.bf16 %v2788_v19, %v2788_v19 }
 0xfbe   :  { %v2807_v26 = vpack.c.bf16 %v2789_v23, %v2789_v23 }
 0xfc0   :  { %2847 = vmatprep.mubr.bf16.mxu1 %v2807_v26  ;;  %v3050_v26 = vld [vmem:[#allocation4 + $0xc0] sm:$0xff] }
 0xfc1   :  { %2848 = vmatmul.mubr.bf16.vlgmr.msra.gmra.mrb[20].mxu1 %v2806_v30  ;;  %v3051_v30 = vld [vmem:[#allocation4 + $0xc8] sm:$0xff] }
 0xfc2   :  { %3897 = vmatpush3.bf16.msra.mxu1 %v2855_v31  ;;  %3912 = vmatprep.mubr.msk.bf16.mxu1 %vm4915_vm0, %v4914_v15  ;;  %v3052_v31 = vld [vmem:[#allocation4 + $0xd0] sm:$0xff] }
 0xfc3   :  { %3898 = vmatprep.subr.bf16.mxu1 %v4914_v15 }
 0xfc6   :  { %3899 = vmatpush3.bf16.msra.mxu1 %v2856_v49 }
 0xfc7   :  { %3900 = vmatprep.subr.bf16.mxu1 %v4914_v15 }
 0xfca   :  { %3901 = vmatpush3.bf16.msra.mxu1 %v2857_v51 }
 0xfcb   :  { %3902 = vmatprep.subr.bf16.mxu1 %v4914_v15 }
 0xfce   :  { %3903 = vmatpush3.bf16.msra.mxu1 %v2858_v35 }
 0xfcf   :  { %3904 = vmatprep.subr.bf16.mxu1 %v4914_v15 }
 0xfd2   :  { %3905 = vmatpush3.bf16.msra.mxu1 %v2859_v37 }
 0xfd3   :  { %3906 = vmatprep.subr.bf16.mxu1 %v4914_v15 }
 0xfd6   :  { %3907 = vmatpush3.bf16.msra.mxu1 %v2860_v32  ;;  %v3053_v32 = vld [vmem:[#allocation4 + $0xd8] sm:$0xff] }
 0xfd7   :  { %3908 = vmatprep.subr.bf16.mxu1 %v4914_v15 }
 0xfda   :  { %3909 = vmatpush3.bf16.msra.mxu1 %v2861_v33  ;;  %v3054_v33 = vld [vmem:[#allocation4 + $0xe0] sm:$0xff] }
 0xfdb   :  { %3910 = vmatprep.subr.bf16.mxu1 %v4914_v15 }
 0xfde   :  { %3911 = vmatpush3.bf16.msra.mxu1 %v2862_v34  ;;  %v3055_v34 = vld [vmem:[#allocation4 + $0xe8] sm:$0xff] }
 0xfdf   :  { %3936 = vmatprep.subr.bf16.mxu1 %v4914_v15 }
0x1094   :  { %v3809_v36 = vpop.f32.mrb[20].mxu1 }
0x1095   :  { %v3810_v39 = vpop.f32.mrb[21].mxu1 }
0x1096   :  { %v3811_v40 = vadd.f32 %v3810_v39, %v3809_v36  ;;  %v3812_v41 = vpop.f32.mrb[22].mxu1  ;;  %v3056_v36 = vld [vmem:[#allocation4 + $0xf0] sm:$0xff]  ;;  %v3108_v39 = vld [vmem:[#allocation4 + $0x100] sm:$0xff] }
0x1097   :  { %v3813_v43 = vpop.f32.mrb[23].mxu1  ;;  %v3110_v41 = vld [vmem:[#allocation4 + $0x110] sm:$0xff] }
0x1098   :  { %v2850_v44 = vadd.f32 %v3811_v40, %v3780_v38  ;;  %v3057_v38 = vld [vmem:[#allocation4 + $0xf8] sm:$0xff]  ;;  %v3109_v40 = vld [vmem:[#allocation4 + $0x108] sm:$0xff] }
0x1099   :  { %v3111_v43 = vld [vmem:[#allocation4 + $0x118] sm:$0xff] }
0x109a   :  { %v2863_v45 = vpack.c.bf16 %v2850_v44, %v2850_v44  ;;  %v3112_v44 = vld [vmem:[#allocation4 + $0x120] sm:$0xff] }
0x109c   :  { %3913 = vmatmul.mubr.bf16.vlgmr.msra.gmra.mrb[24].mxu1 %v2863_v45  ;;  %v3113_v45 = vld [vmem:[#allocation4 + $0x128] sm:$0xff] }
0x109d   :  { %3952 = vmatprep.mubr.msk.bf16.mxu1 %vm4915_vm0, %v4914_v15  ;;  %3937 = vmatpush3.bf16.msra.mxu1 %v2981_v2 }
0x109e   :  { %3938 = vmatprep.subr.bf16.mxu1 %v4914_v15 }
0x10a1   :  { %3939 = vmatpush3.bf16.msra.mxu1 %v2982_v3 }
0x10a2   :  { %3940 = vmatprep.subr.bf16.mxu1 %v4914_v15 }
0x10a5   :  { %3941 = vmatpush3.bf16.msra.mxu1 %v2983_v5 }
0x10a6   :  { %3942 = vmatprep.subr.bf16.mxu1 %v4914_v15 }
0x10a9   :  { %3943 = vmatpush3.bf16.msra.mxu1 %v2984_v0  ;;  %v3177_v0 = vld [vmem:[#allocation4 + $0x140] sm:$0xff] }
0x10aa   :  { %3944 = vmatprep.subr.bf16.mxu1 %v4914_v15 }
0x10ad   :  { %3945 = vmatpush3.bf16.msra.mxu1 %v2985_v6  ;;  %v3178_v6 = vld [vmem:[#allocation4 + $0x148] sm:$0xff] }
0x10ae   :  { %3946 = vmatprep.subr.bf16.mxu1 %v4914_v15 }
0x10b1   :  { %3947 = vmatpush3.bf16.msra.mxu1 %v2986_v7  ;;  %v3179_v7 = vld [vmem:[#allocation4 + $0x150] sm:$0xff] }
0x10b2   :  { %3948 = vmatprep.subr.bf16.mxu1 %v4914_v15 }
0x10b5   :  { %3949 = vmatpush3.bf16.msra.mxu1 %v2987_v8 }
0x10b6   :  { %3950 = vmatprep.subr.bf16.mxu1 %v4914_v15 }
0x10b9   :  { %3951 = vmatpush3.bf16.msra.mxu1 %v2988_v14  ;;  %v3183_v14 = vld [vmem:[#allocation4 + $0x170] sm:$0xff] }
0x10ba   :  { %3976 = vmatprep.subr.bf16.mxu1 %v4914_v15 }
0x116f   :  { %v2905_v42 = vpop.f32.mrb[24].mxu1 }
0x1170   :  { %v2906_v48 = vadd.f32 %v3781_v47, %v2905_v42  ;;  %v3914_v50 = vpop.f32.mrb[25].mxu1  ;;  %v3114_v47 = vld [vmem:[#allocation4 + $0x130] sm:$0xff] }
0x1171   :  { %v2908_v52 = vpop.f32.mrb[26].mxu1 }
0x1172   :  { %2911 = vadd.xlane.f32.xlu0 %v2906_v48  ;;  %v3915_v53 = vpop.f32.mrb[27].mxu1 }
0x11ff   :  { %v2912_v56 = vpop.xlane.xlu0 %2911 }
0x1200   :  { %v2913_v57 = vmul.f32 0.0078125, %v2912_v56 }
0x1202   :  { %v2914_v58 = vsub.f32 %v2906_v48, %v2913_v57 }
0x1204   :  { %v2915_v59 = vmul.f32 %v2914_v58, %v2914_v58 }
0x1206   :  { %2916 = vadd.xlane.f32.xlu0 %v2915_v59 }
0x1293   :  { %v2917_v9 = vpop.xlane.xlu0 %2916 }
0x1294   :  { %v2918_v4 = vmul.f32 0.0078125, %v2917_v9 }
0x1296   :  { %v2919_v10 = vadd.f32 1e-05, %v2918_v4 }
0x1298   :  { %4554 = vrsqrt.f32 %v2919_v10 }
0x12a2   :  { %v4555_v11 = vpop.eup %4554 }
0x12a3   :  { %v2921_v12 = vmul.f32 %v4555_v11, %v2914_v58  ;;  %v3180_v11 = vld [vmem:[#allocation4 + $0x158] sm:$0xff] }
0x12a5   :  { %v2931_v13 = vpack.c.bf16 %v2921_v12, %v2921_v12  ;;  %v3181_v12 = vld [vmem:[#allocation4 + $0x160] sm:$0xff] }
0x12a7   :  { %3933 = vmatmul.mubr.bf16.vlgmr.msra.gmra.mrb[24].mxu0 %v2931_v13  ;;  %v3182_v13 = vld [vmem:[#allocation4 + $0x168] sm:$0xff] }
0x12a8   :  { %3972 = vmatprep.mubr.msk.bf16.mxu0 %vm4915_vm0, %v4914_v15  ;;  %3957 = vmatpush3.bf16.msra.mxu0 %v3050_v26 }
0x12a9   :  { %3958 = vmatprep.subr.bf16.mxu0 %v4914_v15 }
0x12ac   :  { %3959 = vmatpush3.bf16.msra.mxu0 %v3051_v30  ;;  %v3242_v30 = vld [vmem:[#allocation4 + $0x1b8] sm:$0xff] }
0x12ad   :  { %3960 = vmatprep.subr.bf16.mxu0 %v4914_v15 }
0x12b0   :  { %3961 = vmatpush3.bf16.msra.mxu0 %v3052_v31  ;;  %v3786_v31 = vld [vmem:[#allocation20 + $0x5] ss:$0 sm:$0xff] }
0x12b1   :  { %3962 = vmatprep.subr.bf16.mxu0 %v4914_v15 }
0x12b4   :  { %3963 = vmatpush3.bf16.msra.mxu0 %v3053_v32 }
0x12b5   :  { %3964 = vmatprep.subr.bf16.mxu0 %v4914_v15 }
0x12b8   :  { %3965 = vmatpush3.bf16.msra.mxu0 %v3054_v33 }
0x12b9   :  { %3966 = vmatprep.subr.bf16.mxu0 %v4914_v15 }
0x12bc   :  { %3967 = vmatpush3.bf16.msra.mxu0 %v3055_v34  ;;  %v3787_v34 = vld [vmem:[#allocation20 + $0x6] ss:$0 sm:$0xff] }
0x12bd   :  { %3968 = vmatprep.subr.bf16.mxu0 %v4914_v15 }
0x12c0   :  { %3969 = vmatpush3.bf16.msra.mxu0 %v3056_v36 }
0x12c1   :  { %3970 = vmatprep.subr.bf16.mxu0 %v4914_v15 }
0x12c4   :  { %3971 = vmatpush3.bf16.msra.mxu0 %v3057_v38 }
0x12c5   :  { %3996 = vmatprep.subr.bf16.mxu0 %v4914_v15 }
0x137a   :  { %v2974_v17 = vpop.f32.mrb[24].mxu0 }
0x137b   :  { %v2975_v18 = vadd.f32 %v3782_v16, %v2974_v17  ;;  %v3934_v20 = vpop.f32.mrb[25].mxu0  ;;  %v3184_v16 = vld [vmem:[#allocation4 + $0x178] sm:$0xff]  ;;  %v3235_v17 = vld [vmem:[#allocation4 + $0x180] sm:$0xff] }
0x137c   :  { %v2977_v21 = vpop.f32.mrb[26].mxu0  ;;  %v3237_v20 = vld [vmem:[#allocation4 + $0x190] sm:$0xff] }
0x137d   :  { %v2989_v22 = vpack.c.bf16 %v2975_v18, %v2975_v18  ;;  %v3935_v24 = vpop.f32.mrb[27].mxu0  ;;  %v3236_v18 = vld [vmem:[#allocation4 + $0x188] sm:$0xff]  ;;  %v3238_v21 = vld [vmem:[#allocation4 + $0x198] sm:$0xff] }
0x137e   :  { %v3240_v24 = vld [vmem:[#allocation4 + $0x1a8] sm:$0xff] }
0x137f   :  { %3953 = vmatmul.mubr.bf16.vlgmr.msra.gmra.mrb[28].mxu1 %v2989_v22  ;;  %v3239_v22 = vld [vmem:[#allocation4 + $0x1a0] sm:$0xff] }
0x1380   :  { %3992 = vmatprep.mubr.msk.bf16.mxu1 %vm4915_vm0, %v4914_v15  ;;  %3977 = vmatpush3.bf16.msra.mxu1 %v3108_v39 }
0x1381   :  { %3978 = vmatprep.subr.bf16.mxu1 %v4914_v15 }
0x1384   :  { %3979 = vmatpush3.bf16.msra.mxu1 %v3109_v40 }
0x1385   :  { %3980 = vmatprep.subr.bf16.mxu1 %v4914_v15 }
0x1388   :  { %3981 = vmatpush3.bf16.msra.mxu1 %v3110_v41 }
0x1389   :  { %3982 = vmatprep.subr.bf16.mxu1 %v4914_v15 }
0x138c   :  { %3983 = vmatpush3.bf16.msra.mxu1 %v3111_v43  ;;  %v3304_v43 = vld [vmem:[#allocation4 + $0x1c0] sm:$0xff] }
0x138d   :  { %3984 = vmatprep.subr.bf16.mxu1 %v4914_v15 }
0x1390   :  { %3985 = vmatpush3.bf16.msra.mxu1 %v3112_v44  ;;  %v3305_v44 = vld [vmem:[#allocation4 + $0x1c8] sm:$0xff] }
0x1391   :  { %3986 = vmatprep.subr.bf16.mxu1 %v4914_v15 }
0x1394   :  { %3987 = vmatpush3.bf16.msra.mxu1 %v3113_v45  ;;  %v3306_v45 = vld [vmem:[#allocation4 + $0x1d0] sm:$0xff] }
0x1395   :  { %3988 = vmatprep.subr.bf16.mxu1 %v4914_v15 }
0x1398   :  { %3989 = vmatpush3.bf16.msra.mxu1 %v3114_v47 }
0x1399   :  { %3990 = vmatprep.subr.bf16.mxu1 %v4914_v15 }
0x139c   :  { %3991 = vmatpush3.bf16.msra.mxu1 %v3115_v54  ;;  %v3310_v54 = vld [vmem:[#allocation4 + $0x1f0] sm:$0xff] }
0x139d   :  { %4016 = vmatprep.subr.bf16.mxu1 %v4914_v15 }
0x1452   :  { %v3032_v27 = vpop.f32.mrb[28].mxu1 }
0x1453   :  { %v3033_v28 = vadd.f32 %v3783_v25, %v3032_v27  ;;  %v3954_v29 = vpop.f32.mrb[29].mxu1  ;;  %v3241_v25 = vld [vmem:[#allocation4 + $0x1b0] sm:$0xff] }
0x1454   :  { %v3035_v19 = vpop.f32.mrb[30].mxu1 }
0x1455   :  { %3038 = vadd.xlane.f32.xlu1 %v3033_v28  ;;  %v3955_v23 = vpop.f32.mrb[31].mxu1 }
0x14e2   :  { %v3039_v49 = vpop.xlane.xlu1 %3038 }
0x14e3   :  { %v3040_v51 = vmul.f32 0.0078125, %v3039_v49 }
0x14e5   :  { %v3041_v35 = vsub.f32 %v3033_v28, %v3040_v51 }
0x14e7   :  { %v3042_v37 = vmul.f32 %v3041_v35, %v3041_v35 }
0x14e9   :  { %3043 = vadd.xlane.f32.xlu1 %v3042_v37 }
0x1576   :  { %v3044_v42 = vpop.xlane.xlu1 %3043 }
0x1577   :  { %v3045_v48 = vmul.f32 0.0078125, %v3044_v42 }
0x1579   :  { %v3046_v50 = vadd.f32 1e-05, %v3045_v48 }
0x157b   :  { %4556 = vrsqrt.f32 %v3046_v50 }
0x1585   :  { %v4557_v52 = vpop.eup %4556 }
0x1586   :  { %v3048_v53 = vmul.f32 %v4557_v52, %v3041_v35  ;;  %v3307_v52 = vld [vmem:[#allocation4 + $0x1d8] sm:$0xff] }
0x1588   :  { %v3058_v46 = vpack.c.bf16 %v3048_v53, %v3048_v53  ;;  %v3308_v53 = vld [vmem:[#allocation4 + $0x1e0] sm:$0xff] }
0x158a   :  { %3973 = vmatmul.mubr.bf16.vlgmr.msra.gmra.mrb[28].mxu0 %v3058_v46  ;;  %v3309_v46 = vld [vmem:[#allocation4 + $0x1e8] sm:$0xff] }
0x158b   :  { %4012 = vmatprep.mubr.msk.bf16.mxu0 %vm4915_vm0, %v4914_v15  ;;  %3997 = vmatpush3.bf16.msra.mxu0 %v3177_v0 }
0x158c   :  { %3998 = vmatprep.subr.bf16.mxu0 %v4914_v15 }
0x158f   :  { %3999 = vmatpush3.bf16.msra.mxu0 %v3178_v6  ;;  %v3369_v6 = vld [vmem:[#allocation4 + $0x238] sm:$0xff] }
0x1590   :  { %4000 = vmatprep.subr.bf16.mxu0 %v4914_v15 }
0x1593   :  { %4001 = vmatpush3.bf16.msra.mxu0 %v3179_v7  ;;  %v3788_v7 = vld [vmem:[#allocation20 + $0x7] ss:$0 sm:$0xff] }
0x1594   :  { %4002 = vmatprep.subr.bf16.mxu0 %v4914_v15 }
0x1597   :  { %4003 = vmatpush3.bf16.msra.mxu0 %v3180_v11 }
0x1598   :  { %4004 = vmatprep.subr.bf16.mxu0 %v4914_v15 }
0x159b   :  { %4005 = vmatpush3.bf16.msra.mxu0 %v3181_v12 }
0x159c   :  { %4006 = vmatprep.subr.bf16.mxu0 %v4914_v15 }
0x159f   :  { %4007 = vmatpush3.bf16.msra.mxu0 %v3182_v13 }
0x15a0   :  { %4008 = vmatprep.subr.bf16.mxu0 %v4914_v15 }
0x15a3   :  { %4009 = vmatpush3.bf16.msra.mxu0 %v3183_v14 }
0x15a4   :  { %4010 = vmatprep.subr.bf16.mxu0 %v4914_v15 }
0x15a7   :  { %4011 = vmatpush3.bf16.msra.mxu0 %v3184_v16 }
0x15a8   :  { %4036 = vmatprep.subr.bf16.mxu0 %v4914_v15 }
0x165d   :  { %v3101_v56 = vpop.f32.mrb[28].mxu0 }
0x165e   :  { %v3102_v57 = vadd.f32 %v3784_v55, %v3101_v56  ;;  %v3974_v58 = vpop.f32.mrb[29].mxu0  ;;  %v3311_v55 = vld [vmem:[#allocation4 + $0x1f8] sm:$0xff]  ;;  %v3362_v56 = vld [vmem:[#allocation4 + $0x200] sm:$0xff] }
0x165f   :  { %v3104_v59 = vpop.f32.mrb[30].mxu0  ;;  %v3364_v58 = vld [vmem:[#allocation4 + $0x210] sm:$0xff] }
0x1660   :  { %v3116_v60 = vpack.c.bf16 %v3102_v57, %v3102_v57  ;;  %v3975_v61 = vpop.f32.mrb[31].mxu0  ;;  %v3363_v57 = vld [vmem:[#allocation4 + $0x208] sm:$0xff]  ;;  %v3365_v59 = vld [vmem:[#allocation4 + $0x218] sm:$0xff] }
0x1661   :  { %v3367_v61 = vld [vmem:[#allocation4 + $0x228] sm:$0xff] }
0x1662   :  { %3993 = vmatmul.mubr.bf16.vlgmr.msra.gmra.mrb[32].mxu1 %v3116_v60  ;;  %v3366_v60 = vld [vmem:[#allocation4 + $0x220] sm:$0xff] }
0x1663   :  { %4032 = vmatprep.mubr.msk.bf16.mxu1 %vm4915_vm0, %v4914_v15  ;;  %4017 = vmatpush3.bf16.msra.mxu1 %v3235_v17 }
0x1664   :  { %4018 = vmatprep.subr.bf16.mxu1 %v4914_v15 }
0x1667   :  { %4019 = vmatpush3.bf16.msra.mxu1 %v3236_v18 }
0x1668   :  { %4020 = vmatprep.subr.bf16.mxu1 %v4914_v15 }
0x166b   :  { %4021 = vmatpush3.bf16.msra.mxu1 %v3237_v20 }
0x166c   :  { %4022 = vmatprep.subr.bf16.mxu1 %v4914_v15 }
0x166f   :  { %4023 = vmatpush3.bf16.msra.mxu1 %v3238_v21 }
0x1670   :  { %4024 = vmatprep.subr.bf16.mxu1 %v4914_v15 }
0x1673   :  { %4025 = vmatpush3.bf16.msra.mxu1 %v3239_v22 }
0x1674   :  { %4026 = vmatprep.subr.bf16.mxu1 %v4914_v15 }
0x1677   :  { %4027 = vmatpush3.bf16.msra.mxu1 %v3240_v24 }
0x1678   :  { %4028 = vmatprep.subr.bf16.mxu1 %v4914_v15 }
0x167b   :  { %4029 = vmatpush3.bf16.msra.mxu1 %v3241_v25 }
0x167c   :  { %4030 = vmatprep.subr.bf16.mxu1 %v4914_v15 }
0x167f   :  { %4031 = vmatpush3.bf16.msra.mxu1 %v3242_v30 }
0x1680   :  { %4056 = vmatprep.subr.bf16.mxu1 %v4914_v15 }
0x1735   :  { %v3159_v63 = vpop.f32.mrb[32].mxu1 }
0x1736   :  { %v3160_v1 = vadd.f32 %v3785_v62, %v3159_v63  ;;  %v3994_v2 = vpop.f32.mrb[33].mxu1  ;;  %v3368_v62 = vld [vmem:[#allocation4 + $0x230] sm:$0xff] }
0x1737   :  { %v3162_v3 = vpop.f32.mrb[34].mxu1 }
0x1738   :  { %3165 = vadd.xlane.f32.xlu0 %v3160_v1  ;;  %v3995_v5 = vpop.f32.mrb[35].mxu1 }
0x17c5   :  { %v3166_v8 = vpop.xlane.xlu0 %3165 }
0x17c6   :  { %v3167_v9 = vmul.f32 0.0078125, %v3166_v8 }
0x17c8   :  { %v3168_v4 = vsub.f32 %v3160_v1, %v3167_v9 }
0x17ca   :  { %v3169_v10 = vmul.f32 %v3168_v4, %v3168_v4 }
0x17cc   :  { %3170 = vadd.xlane.f32.xlu1 %v3169_v10 }
0x1859   :  { %v3171_v27 = vpop.xlane.xlu1 %3170 }
0x185a   :  { %v3172_v28 = vmul.f32 0.0078125, %v3171_v27 }
0x185c   :  { %v3173_v29 = vadd.f32 1e-05, %v3172_v28 }
0x185e   :  { %4558 = vrsqrt.f32 %v3173_v29 }
0x1868   :  { %v4559_v19 = vpop.eup %4558 }
0x1869   :  { %v3175_v23 = vmul.f32 %v4559_v19, %v3168_v4 }
0x186b   :  { %v3185_v26 = vpack.c.bf16 %v3175_v23, %v3175_v23 }
0x186d   :  { %4013 = vmatmul.mubr.bf16.vlgmr.msra.gmra.mrb[32].mxu0 %v3185_v26 }
0x186e   :  { %4052 = vmatprep.mubr.msk.bf16.mxu0 %vm4915_vm0, %v4914_v15  ;;  %4037 = vmatpush3.bf16.msra.mxu0 %v3304_v43 }
0x186f   :  { %4038 = vmatprep.subr.bf16.mxu0 %v4914_v15 }
0x1872   :  { %4039 = vmatpush3.bf16.msra.mxu0 %v3305_v44 }
0x1873   :  { %4040 = vmatprep.subr.bf16.mxu0 %v4914_v15 }
0x1876   :  { %4041 = vmatpush3.bf16.msra.mxu0 %v3306_v45 }
0x1877   :  { %4042 = vmatprep.subr.bf16.mxu0 %v4914_v15 }
0x187a   :  { %4043 = vmatpush3.bf16.msra.mxu0 %v3307_v52 }
0x187b   :  { %4044 = vmatprep.subr.bf16.mxu0 %v4914_v15 }
0x187e   :  { %4045 = vmatpush3.bf16.msra.mxu0 %v3308_v53 }
0x187f   :  { %4046 = vmatprep.subr.bf16.mxu0 %v4914_v15 }
0x1882   :  { %4047 = vmatpush3.bf16.msra.mxu0 %v3309_v46 }
0x1883   :  { %4048 = vmatprep.subr.bf16.mxu0 %v4914_v15 }
0x1886   :  { %4049 = vmatpush3.bf16.msra.mxu0 %v3310_v54 }
0x1887   :  { %4050 = vmatprep.subr.bf16.mxu0 %v4914_v15 }
0x188a   :  { %4051 = vmatpush3.bf16.msra.mxu0 %v3311_v55 }
0x1940   :  { %v3228_v49 = vpop.f32.mrb[32].mxu0 }
0x1941   :  { %v3229_v51 = vadd.f32 %v3786_v31, %v3228_v49  ;;  %v4014_v35 = vpop.f32.mrb[33].mxu0 }
0x1942   :  { %v3231_v37 = vpop.f32.mrb[34].mxu0 }
0x1943   :  { %v3243_v32 = vpack.c.bf16 %v3229_v51, %v3229_v51  ;;  %v4015_v33 = vpop.f32.mrb[35].mxu0 }
0x1945   :  { %4033 = vmatmul.mubr.bf16.vlgmr.msra.gmra.mrb[36].mxu1 %v3243_v32 }
0x1946   :  { %4072 = vmatprep.mubr.msk.bf16.mxu1 %vm4915_vm0, %v4914_v15  ;;  %4057 = vmatpush3.bf16.msra.mxu1 %v3362_v56 }
0x1947   :  { %4058 = vmatprep.subr.bf16.mxu1 %v4914_v15 }
0x194a   :  { %4059 = vmatpush3.bf16.msra.mxu1 %v3363_v57 }
0x194b   :  { %4060 = vmatprep.subr.bf16.mxu1 %v4914_v15 }
0x194e   :  { %4061 = vmatpush3.bf16.msra.mxu1 %v3364_v58 }
0x194f   :  { %4062 = vmatprep.subr.bf16.mxu1 %v4914_v15 }
0x1952   :  { %4063 = vmatpush3.bf16.msra.mxu1 %v3365_v59 }
0x1953   :  { %4064 = vmatprep.subr.bf16.mxu1 %v4914_v15 }
0x1956   :  { %4065 = vmatpush3.bf16.msra.mxu1 %v3366_v60 }
0x1957   :  { %4066 = vmatprep.subr.bf16.mxu1 %v4914_v15 }
0x195a   :  { %4067 = vmatpush3.bf16.msra.mxu1 %v3367_v61 }
0x195b   :  { %4068 = vmatprep.subr.bf16.mxu1 %v4914_v15 }
0x195e   :  { %4069 = vmatpush3.bf16.msra.mxu1 %v3368_v62 }
0x195f   :  { %4070 = vmatprep.subr.bf16.mxu1 %v4914_v15 }
0x1962   :  { %4071 = vmatpush3.bf16.msra.mxu1 %v3369_v6 }
0x1a18   :  { %v3286_v36 = vpop.f32.mrb[36].mxu1 }
0x1a19   :  { %v3287_v38 = vadd.f32 %v3787_v34, %v3286_v36  ;;  %v4034_v39 = vpop.f32.mrb[37].mxu1 }
0x1a1a   :  { %v3289_v40 = vpop.f32.mrb[38].mxu1 }
0x1a1b   :  { %3292 = vadd.xlane.f32.xlu0 %v3287_v38  ;;  %v4035_v41 = vpop.f32.mrb[39].mxu1 }
0x1aa8   :  { %v3293_v47 = vpop.xlane.xlu0 %3292 }
0x1aa9   :  { %v3294_v42 = vmul.f32 0.0078125, %v3293_v47 }
0x1aab   :  { %v3295_v48 = vsub.f32 %v3287_v38, %v3294_v42 }
0x1aad   :  { %v3296_v50 = vmul.f32 %v3295_v48, %v3295_v48 }
0x1aaf   :  { %3297 = vadd.xlane.f32.xlu1 %v3296_v50 }
0x1b3c   :  { %v3298_v63 = vpop.xlane.xlu1 %3297 }
0x1b3d   :  { %v3299_v1 = vmul.f32 0.0078125, %v3298_v63 }
0x1b3f   :  { %v3300_v2 = vadd.f32 1e-05, %v3299_v1 }
0x1b41   :  { %4560 = vrsqrt.f32 %v3300_v2 }
0x1b4b   :  { %v4561_v3 = vpop.eup %4560 }
0x1b4c   :  { %v3302_v5 = vmul.f32 %v4561_v3, %v3295_v48 }
0x1b4e   :  { %v3312_v0 = vpack.c.bf16 %v3302_v5, %v3302_v5 }
0x1b50   :  { %4053 = vmatmul.mubr.bf16.vlgmr.msra.gmra.mrb[36].mxu0 %v3312_v0 }
0x1c23   :  { %v3355_v8 = vpop.f32.mrb[36].mxu0 }
0x1c24   :  { %v3356_v9 = vadd.f32 %v3788_v7, %v3355_v8  ;;  %v4054_v4 = vpop.f32.mrb[37].mxu0 }
0x1c25   :  { %v3358_v10 = vpop.f32.mrb[38].mxu0 }
0x1c26   :  { %v3370_v11 = vpack.c.bf16 %v3356_v9, %v3356_v9  ;;  %v4055_v12 = vpop.f32.mrb[39].mxu0 }
0x1c28   :  { %4073 = vmatmul.mubr.bf16.vlgmr.msra.gmra.mrb[40].mxu1 %v3370_v11 }
0x1c29   :  { %4815 = shalt.err (!%p4812_p8)
}
0x1c2a   :  { %s4816_s23 = scalar_lea.hbm %s5380_s15, 128 }
0x1c2b   :  { %p4817_p9 = scmp.ne.s32.totalorder %s5380_s15, %s4816_s23  ;;  %p4820_p10 = scmp.lt.u32.totalorder %s4816_s23, %s5380_s15 }
0x1c2d   :  { %p4822_p11 = pnand %p4820_p10, %p4817_p9 }
0x1c2f   :  { %4825 = shalt.err (!%p4822_p11)
}
0x1c30   :  { %3439 = dma.vmem_to_hbm [thread:$0]  %s3437_s20, 128, %s5380_s15, [#allocation23]  }
0x1c31   :  { %s4826_s3 = scalar_lea.vmem %s3427_s24, 128  ;;  %p4831_p13 = scmp.lt.s32.totalorder %s3427_s24, %s3427_s24 }
0x1c32   :  { %p4827_p12 = scmp.ne.s32.totalorder %s3427_s24, %s4826_s3  ;;  %p4832_p0 = scmp.lt.s32.totalorder %s4826_s3, %s4826_s3 }
0x1c34   :  { %p4833_p1 = por %p4832_p0, %p4831_p13 }
0x1c36   :  { %p4834_p2 = pnand %p4833_p1, %p4827_p12 }
0x1c38   :  { %4837 = shalt.err (!%p4834_p2)
}
0x1c39   :  { %s4838_s17 = scalar_lea.hbm %s5379_s14, 128 }
0x1c3a   :  { %p4839_p3 = scmp.ne.s32.totalorder %s5379_s14, %s4838_s17  ;;  %p4842_p4 = scmp.lt.u32.totalorder %s4838_s17, %s5379_s14 }
0x1c3c   :  { %p4844_p5 = pnand %p4842_p4, %p4839_p3 }
0x1c3e   :  { %4847 = shalt.err (!%p4844_p5)
}
0x1c3f   :  { %3429 = dma.vmem_to_hbm [thread:$0]  %s3427_s24, 128, %s5379_s14, [#allocation8]   ;;  %v3789_v15 = vld [vmem:[#allocation20 + $0x8] ss:$0 sm:$0xff] }
0x1c40   :  { %s4918_s0 = smov [#allocation24]  }
0x1c41   :  { %s3446_s7 = sshll.u32 %s4918_s0, 4  ;;  %s3447_s7 = int_to_ptr.vmem [resolvable:$true] %s3446_s7 }
0x1c42   :  { %s4848_s22 = scalar_lea.vmem %s3447_s7, 128  ;;  %p4853_p7 = scmp.lt.s32.totalorder %s3447_s7, %s3447_s7 }
0x1c43   :  { %p4849_p6 = scmp.ne.s32.totalorder %s3447_s7, %s4848_s22  ;;  %p4854_p8 = scmp.lt.s32.totalorder %s4848_s22, %s4848_s22 }
0x1c45   :  { %p4855_p9 = por %p4854_p8, %p4853_p7 }
0x1c47   :  { %p4856_p10 = pnand %p4855_p9, %p4849_p6 }
0x1cfb   :  { %v3413_v13 = vpop.f32.mrb[40].mxu1 }
0x1cfc   :  { %v3414_v14 = vadd.f32 %v3789_v15, %v3413_v13  ;;  %v4074_v16 = vpop.f32.mrb[41].mxu1 }
0x1cfd   :  { %v3416_v17 = vpop.f32.mrb[42].mxu1 }
0x1cfe   :  { %3419 = vst [vmem:[#allocation24] sm:$0xff] %v3414_v14  ;;  %v4075_v18 = vpop.f32.mrb[43].mxu1 }
0x1cff   :  { %4859 = shalt.err (!%p4856_p10)
}
0x1d00   :  { %s4860_s14 = scalar_lea.hbm %s5381_s16, 128 }
0x1d01   :  { %p4861_p11 = scmp.ne.s32.totalorder %s5381_s16, %s4860_s14  ;;  %p4864_p12 = scmp.lt.u32.totalorder %s4860_s14, %s5381_s16 }
0x1d03   :  { %p4866_p13 = pnand %p4864_p12, %p4861_p11 }
0x1d05   :  { %4869 = shalt.err (!%p4866_p13)
}
0x1d06   :  { %3449 = dma.vmem_to_hbm [thread:$0]  %s3447_s7, 128, %s5381_s16, [#allocation23]  }
0x1d07   :  { %4886 = dma.done.wait [#allocation8], 128  }
0x1d08   :  { %4887 = vsyncadd [#allocation8], 4294967168 }
0x1d09   :  { %4888 = dma.done.wait [#allocation23], 256  }
0x1d0a   :  { %4889 = vsyncadd [#allocation23], 4294967040 }
0x1d0b   :  { %3459 = vsyncpa [#allocation7], 1 }
0x1d0c   :  { %3460 = vsyncpa [#allocation10], 1 }
0x1d0d   :  { %3461 = vsyncpa [#allocation13], 1 }
0x1d0e   :  { %3462 = vsyncpa [#allocation16], 1 }
0x1d0f   :  { %3463 = vsyncpa [#allocation19], 1 }
0x1d10   :  { %3464 = vsyncpa [#allocation8], 1 }
0x1d11   :  { %3465 = vsyncpa [#allocation23], 1 }
0x1d12   :  { %3466 = vsyncmov [#allocation5] }
0x1d15   :  { %s3467_s4 = vpop.sfrf %3466 }
0x1d16   :  { %p3790_p0 = scmp.ne.s32.totalorder %s3467_s4, 0 }
0x1d18   :  { %3471 = shalt.err (%p3790_p0)  }
0x1d19   :  { %3473 = vsyncmov [#allocation5 + $0x1] }
0x1d1c   :  { %s3474_s23 = vpop.sfrf %3473 }
0x1d1d   :  { %p3791_p1 = scmp.ne.s32.totalorder %s3474_s23, 0 }
0x1d1f   :  { %3478 = shalt.err (%p3791_p1)  }
0x1d20   :  { %3480 = vsyncmov [#allocation5 + $0x2] }
0x1d23   :  { %s3481_s16 = vpop.sfrf %3480 }
0x1d24   :  { %p3792_p2 = scmp.ne.s32.totalorder %s3481_s16, 0 }
0x1d26   :  { %3485 = shalt.err (%p3792_p2)  }

</bundles_post_ra>
